<compile_context>
chip_gen: v7x
topology: tpu7x:2x2x1
jax: 0.10.0
libtpu: 0.0.40
codegen_flags: <defaults>
</compile_context>

<pallas_src>
import jax
import jax.numpy as jnp
import numpy as np
from jax import lax
from jax.experimental import pallas as pl
from jax.experimental.pallas import tpu as pltpu


def _round_up(x, m):
    return (x + m - 1) // m * m


def _pick_batch_block(n, rows_per_image, target_rows=1024):
    """Largest divisor of n with bblk*Ho*Wo <= target (amortize per-step cost)."""
    cap = max(1, min(n, target_rows // max(1, rows_per_image)))
    for cand in range(cap, 0, -1):
        if n % cand == 0:
            return cand
    return 1


def _make_kernel(bblk, H, W, Cin_p, Chid_p, stride, downsample):
    Ho, Wo = H // stride, W // stride
    M = bblk * Ho * Wo
    Hp2, Wp2 = Ho + 2, Wo + 2

    def kernel(x_ref, w1_ref, g1_ref, c1_ref, w2_ref, g2_ref, c2_ref,
               wd_ref, bd_ref, o_ref, hp_ref):
        # ---------- conv1: 3x3 stride `stride`, via one im2col matmul ----------
        taps = []
        for kh in range(3):
            for kw in range(3):
                if stride == 1:
                    # x_ref: (bblk, H+2, W+2, Cin_p), zero-padded in the wrapper
                    p = x_ref[:, pl.ds(kh, Ho), pl.ds(kw, Wo), :]
                else:
                    # x_ref: (bblk, 4, Hq, Wq, Cin_p) row/col-parity planes;
                    # tap (kh,kw) of the stride-2 conv is a contiguous slice.
                    t = (kh % 2) * 2 + (kw % 2)
                    p = x_ref[:, pl.ds(t, 1), pl.ds(kh // 2, Ho),
                              pl.ds(kw // 2, Wo), :]
                taps.append(p.reshape(M, Cin_p).astype(jnp.bfloat16))
        patch1 = jnp.concatenate(taps, axis=-1)                 # (M, 9*Cin_p)
        h = jnp.dot(patch1, w1_ref[...],
                    preferred_element_type=jnp.float32)         # (M, Chid_p)

        # conv1-bias + BatchNorm1 (eval, folded) + SiLU, in f32 on the VPU
        h = h * g1_ref[...] + c1_ref[...]
        h = h * jax.nn.sigmoid(h)

        # ---------- stage hidden in padded scratch (bf16) ----------
        # Only the 1-pixel border is re-zeroed (cheap); interior is overwritten
        # every step. Done every step (not just step 0) so the kernel stays
        # correct if the "parallel" axis is sharded across TensorCores.
        zr = jnp.zeros((bblk, 1, Wp2, Chid_p), hp_ref.dtype)
        zc = jnp.zeros((bblk, Hp2, 1, Chid_p), hp_ref.dtype)
        hp_ref[:, pl.ds(0, 1), :, :] = zr
        hp_ref[:, pl.ds(Ho + 1, 1), :, :] = zr
        hp_ref[:, :, pl.ds(0, 1), :] = zc
        hp_ref[:, :, pl.ds(Wo + 1, 1), :] = zc
        hp_ref[:, pl.ds(1, Ho), pl.ds(1, Wo), :] = (
            h.reshape(bblk, Ho, Wo, Chid_p).astype(hp_ref.dtype))

        # ---------- conv2: 3x3 stride 1, via one im2col matmul ----------
        taps2 = []
        for kh in range(3):
            for kw in range(3):
                q = hp_ref[:, pl.ds(kh, Ho), pl.ds(kw, Wo), :]
                taps2.append(q.reshape(M, Chid_p))              # already bf16
        patch2 = jnp.concatenate(taps2, axis=-1)                # (M, 9*Chid_p)
        z = jnp.dot(patch2, w2_ref[...],
                    preferred_element_type=jnp.float32)
        z = z * g2_ref[...] + c2_ref[...]                       # bias + BN2

        # ---------- shortcut ----------
        if downsample:
            # 1x1 stride-2 conv: unpadded x[2i,2j] == parity plane (1,1).
            xs = x_ref[:, pl.ds(3, 1), pl.ds(0, Ho), pl.ds(0, Wo), :]
            sc = jnp.dot(xs.reshape(M, Cin_p).astype(jnp.bfloat16), wd_ref[...],
                         preferred_element_type=jnp.float32) + bd_ref[...]
        else:
            # identity: interior of the padded input (Cin_p == Chid_p here)
            sc = x_ref[:, pl.ds(1, Ho), pl.ds(1, Wo), :].reshape(M, Cin_p)

        # ---------- add + final SiLU ----------
        y = sc + z
        y = y * jax.nn.sigmoid(y)
        o_ref[...] = y.reshape(bblk, Ho, Wo, Chid_p).astype(o_ref.dtype)

    return kernel


def resblock_forward(x_nchw, raw, downsample):
    """Fused ResBlock forward. `raw` holds torch-layout params (OIHW weights,
    per-channel BN gamma/beta/running_mean/running_var, conv biases, eps)."""
    eps = raw["eps"]
    w1, b1, w2, b2 = raw["w1"], raw["b1"], raw["w2"], raw["b2"]
    wd, bd = raw["wd"], raw["bd"]

    Chid, Cin = int(w1.shape[0]), int(w1.shape[1])
    stride = 2 if downsample else 1
    N, Cx, H, W = x_nchw.shape
    assert Cx == Cin
    if not downsample:
        assert Cin == Chid, "identity shortcut requires input_dim == hidden_dim"
    assert H % stride == 0 and W % stride == 0
    Ho, Wo = H // stride, W // stride

    LANE = 128
    Cin_p, Chid_p = _round_up(Cin, LANE), _round_up(Chid, LANE)
    bblk = _pick_batch_block(N, Ho * Wo)

    # ---- fold conv bias + eval-mode BN into per-channel scale/shift ----
    g1v = raw["gamma1"] * lax.rsqrt(raw["var1"] + eps)
    c1v = g1v * (b1 - raw["mean1"]) + raw["beta1"]
    g2v = raw["gamma2"] * lax.rsqrt(raw["var2"] + eps)
    c2v = g2v * (b2 - raw["mean2"]) + raw["beta2"]

    def vec(v, cp):  # (C,) -> (1, Cp) f32, zero-padded lanes
        return jnp.pad(v.astype(jnp.float32), (0, cp - v.shape[0]))[None, :]

    g1, c1 = vec(g1v, Chid_p), vec(c1v, Chid_p)
    g2, c2 = vec(g2v, Chid_p), vec(c2v, Chid_p)
    bdp = vec(bd, Chid_p)

    # ---- weights: OIHW -> HWIO -> channel-pad -> im2col-flatten -> bf16 ----
    def prep3x3(w, cip, cop):
        hwio = jnp.transpose(w, (2, 3, 1, 0)).astype(jnp.float32)   # (3,3,Ci,Co)
        hwio = jnp.pad(hwio, ((0, 0), (0, 0),
                              (0, cip - hwio.shape[2]),
                              (0, cop - hwio.shape[3])))
        return hwio.reshape(9 * cip, cop).astype(jnp.bfloat16)

    w1f = prep3x3(w1, Cin_p, Chid_p)                                # (9*Cin_p, Chid_p)
    w2f = prep3x3(w2, Chid_p, Chid_p)                               # (9*Chid_p, Chid_p)
    wdf = jnp.pad(jnp.transpose(wd[:, :, 0, 0], (1, 0)).astype(jnp.float32),
                  ((0, Cin_p - Cin), (0, Chid_p - Chid))).astype(jnp.bfloat16)

    # ---- input: NCHW -> NHWC, zero-pad channels to 128 lanes, spatial pad 1 ----
    x = jnp.transpose(x_nchw, (0, 2, 3, 1)).astype(jnp.float32)
    x = jnp.pad(x, ((0, 0), (0, 0), (0, 0), (0, Cin_p - Cin)))
    xp = jnp.pad(x, ((0, 0), (1, 1), (1, 1), (0, 0)))               # (N,H+2,W+2,Cin_p)
    if stride == 2:
        # split padded input into 4 row/col parity planes so every stride-2 tap
        # (and the 1x1 shortcut) is a contiguous slice inside the kernel.
        Hq, Wq = (H + 2) // 2, (W + 2) // 2
        xp = jnp.transpose(xp.reshape(N, Hq, 2, Wq, 2, Cin_p), (0, 2, 4, 1, 3, 5))
        xp = xp.reshape(N, 4, Hq, Wq, Cin_p)
        x_spec = pl.BlockSpec((bblk, 4, Hq, Wq, Cin_p),
                              lambda n: (n, 0, 0, 0, 0))
    else:
        x_spec = pl.BlockSpec((bblk, H + 2, W + 2, Cin_p),
                              lambda n: (n, 0, 0, 0))

    # grid-invariant params: constant index_map (not re-fetched per step).
    def cspec(arr):
        zeros = (0,) * arr.ndim
        return pl.BlockSpec(arr.shape, lambda n, _z=zeros: _z)

    kernel = _make_kernel(bblk, H, W, Cin_p, Chid_p, stride, downsample)

    grid_spec = pltpu.PrefetchScalarGridSpec(
        num_scalar_prefetch=0,
        grid=(N // bblk,),
        in_specs=[x_spec, cspec(w1f), cspec(g1), cspec(c1),
                  cspec(w2f), cspec(g2), cspec(c2), cspec(wdf), cspec(bdp)],
        out_specs=pl.BlockSpec((bblk, Ho, Wo, Chid_p), lambda n: (n, 0, 0, 0)),
        scratch_shapes=[pltpu.VMEM((bblk, Ho + 2, Wo + 2, Chid_p), jnp.bfloat16)],
    )

    out = pl.pallas_call(
        kernel,
        out_shape=jax.ShapeDtypeStruct((N, Ho, Wo, Chid_p), jnp.float32),
        grid_spec=grid_spec,
        compiler_params=pltpu.CompilerParams(
            dimension_semantics=("parallel",),
            vmem_limit_bytes=32 * 1024 * 1024),
    )(xp, w1f, g1, c1, w2f, g2, c2, wdf, bdp)

    return jnp.transpose(out[..., :Chid], (0, 3, 1, 2))            # back to NCHW


# --------------------------- pure-JAX reference ---------------------------
def _ref_forward(x_nchw, p, downsample):
    eps = p["eps"]
    s = 2 if downsample else 1
    dn = ("NHWC", "HWIO", "NHWC")
    x = jnp.transpose(x_nchw, (0, 2, 3, 1)).astype(jnp.float32)

    def bn(h, gamma, beta, mean, var):
        return (h - mean) * gamma * lax.rsqrt(var + eps) + beta

    w1 = jnp.transpose(p["w1"], (2, 3, 1, 0)).astype(jnp.float32)
    z = lax.conv_general_dilated(x, w1, (s, s), ((1, 1), (1, 1)),
                                 dimension_numbers=dn) + p["b1"]
    z = jax.nn.silu(bn(z, p["gamma1"], p["beta1"], p["mean1"], p["var1"]))
    w2 = jnp.transpose(p["w2"], (2, 3, 1, 0)).astype(jnp.float32)
    z = lax.conv_general_dilated(z, w2, (1, 1), ((1, 1), (1, 1)),
                                 dimension_numbers=dn) + p["b2"]
    z = bn(z, p["gamma2"], p["beta2"], p["mean2"], p["var2"])
    if downsample:
        wdm = jnp.transpose(p["wd"], (2, 3, 1, 0)).astype(jnp.float32)
        sc = lax.conv_general_dilated(x, wdm, (s, s), ((0, 0), (0, 0)),
                                      dimension_numbers=dn) + p["bd"]
    else:
        sc = x
    y = jax.nn.silu(sc + z)
    return jnp.transpose(y, (0, 3, 1, 2))


def _make_raw_params(key, Cin, Chid, scale=0.1, eps=1e-5):
    ks = jax.random.split(key, 14)
    f32 = jnp.float32
    return dict(
        w1=scale * jax.random.normal(ks[0], (Chid, Cin, 3, 3), f32),
        b1=scale * jax.random.normal(ks[1], (Chid,), f32),
        gamma1=jax.random.uniform(ks[2], (Chid,), f32, 0.5, 1.5),
        beta1=scale * jax.random.normal(ks[3], (Chid,), f32),
        mean1=scale * jax.random.normal(ks[4], (Chid,), f32),
        var1=jax.random.uniform(ks[5], (Chid,), f32, 0.5, 1.5),
        w2=scale * jax.random.normal(ks[6], (Chid, Chid, 3, 3), f32),
        b2=scale * jax.random.normal(ks[7], (Chid,), f32),
        gamma2=jax.random.uniform(ks[8], (Chid,), f32, 0.5, 1.5),
        beta2=scale * jax.random.normal(ks[9], (Chid,), f32),
        mean2=scale * jax.random.normal(ks[10], (Chid,), f32),
        var2=jax.random.uniform(ks[11], (Chid,), f32, 0.5, 1.5),
        wd=scale * jax.random.normal(ks[12], (Chid, Cin, 1, 1), f32),
        bd=scale * jax.random.normal(ks[13], (Chid,), f32),
        eps=eps,
    )


if __name__ == "__main__":
    key = jax.random.PRNGKey(0)
    kx, kp1, kp2 = jax.random.split(key, 3)
    N, Cin, Chid, H, W = 2, 4, 8, 16, 16

    x = jax.random.normal(kx, (N, Cin, H, W), jnp.float32)

    # --- downsample=True: (2,4,16,16) -> (2,8,8,8), 1x1-stride-2 shortcut ---
    raw_ds = _make_raw_params(kp1, Cin, Chid)
    out = jax.block_until_ready(resblock_forward(x, raw_ds, downsample=True))
    assert out.shape == (N, Chid, H // 2, W // 2), out.shape
    ref = _ref_forward(x, raw_ds, True)
    np.testing.assert_allclose(np.asarray(out), np.asarray(ref),
                               atol=3e-2, rtol=3e-2)

    # --- downsample=False: identity shortcut (input_dim == hidden_dim == 4) ---
    raw_nd = _make_raw_params(kp2, Cin, Cin)
    out_nd = jax.block_until_ready(resblock_forward(x, raw_nd, downsample=False))
    assert out_nd.shape == (N, Cin, H, W), out_nd.shape
    ref_nd = _ref_forward(x, raw_nd, False)
    np.testing.assert_allclose(np.asarray(out_nd), np.asarray(ref_nd),
                               atol=3e-2, rtol=3e-2)

    print("KERNEL_OK")
</pallas_src>

<mosaic_0001>
module attributes {stable_mosaic.version = 11 : i64} {
  func.func @kernel(%arg0: i32, %arg1: memref<2x4x9x9x128xf32, #tpu.memory_space<vmem>>, %arg2: memref<1152x128xbf16, #tpu.memory_space<vmem>>, %arg3: memref<1x128xf32, #tpu.memory_space<vmem>>, %arg4: memref<1x128xf32, #tpu.memory_space<vmem>>, %arg5: memref<1152x128xbf16, #tpu.memory_space<vmem>>, %arg6: memref<1x128xf32, #tpu.memory_space<vmem>>, %arg7: memref<1x128xf32, #tpu.memory_space<vmem>>, %arg8: memref<128x128xbf16, #tpu.memory_space<vmem>>, %arg9: memref<1x128xf32, #tpu.memory_space<vmem>>, %arg10: memref<2x8x8x128xf32, #tpu.memory_space<vmem>>, %arg11: memref<2x10x10x128xbf16, #tpu.memory_space<vmem>>) attributes {dimension_semantics = [#tpu.dimension_semantics<parallel>], iteration_bounds = array<i64: 1>, scalar_prefetch = 0 : i64, scratch_operands = 1 : i64, tpu.core_type = #tpu.core_type<tc>, window_params = [{transform_indices = @transform_0, window_bounds = array<i64: 2, 4, 9, 9, 128>}, {pipeline_mode = #tpu.pipeline_mode<synchronous>, transform_indices = @transform_1, window_bounds = array<i64: 1152, 128>}, {pipeline_mode = #tpu.pipeline_mode<synchronous>, transform_indices = @transform_2, window_bounds = array<i64: 1, 128>}, {pipeline_mode = #tpu.pipeline_mode<synchronous>, transform_indices = @transform_3, window_bounds = array<i64: 1, 128>}, {pipeline_mode = #tpu.pipeline_mode<synchronous>, transform_indices = @transform_4, window_bounds = array<i64: 1152, 128>}, {pipeline_mode = #tpu.pipeline_mode<synchronous>, transform_indices = @transform_5, window_bounds = array<i64: 1, 128>}, {pipeline_mode = #tpu.pipeline_mode<synchronous>, transform_indices = @transform_6, window_bounds = array<i64: 1, 128>}, {pipeline_mode = #tpu.pipeline_mode<synchronous>, transform_indices = @transform_7, window_bounds = array<i64: 128, 128>}, {pipeline_mode = #tpu.pipeline_mode<synchronous>, transform_indices = @transform_8, window_bounds = array<i64: 1, 128>}, {transform_indices = @transform_9, window_bounds = array<i64: 2, 8, 8, 128>}]} {
    %c0 = arith.constant 0 : index
    %c0_0 = arith.constant 0 : index
    %c0_1 = arith.constant 0 : index
    %c0_2 = arith.constant 0 : index
    %c0_3 = arith.constant 0 : index
    %0 = vector.load %arg1[%c0, %c0_0, %c0_1, %c0_2, %c0_3] : memref<2x4x9x9x128xf32, #tpu.memory_space<vmem>>, vector<2x1x8x8x128xf32>
    %1 = vector.shape_cast %0 : vector<2x1x8x8x128xf32> to vector<128x128xf32>
    %2 = arith.truncf %1 : vector<128x128xf32> to vector<128x128xbf16>
    %c0_4 = arith.constant 0 : index
    %c1 = arith.constant 1 : index
    %c0_5 = arith.constant 0 : index
    %c0_6 = arith.constant 0 : index
    %c0_7 = arith.constant 0 : index
    %3 = vector.load %arg1[%c0_4, %c1, %c0_5, %c0_6, %c0_7] : memref<2x4x9x9x128xf32, #tpu.memory_space<vmem>>, vector<2x1x8x8x128xf32>
    %4 = vector.shape_cast %3 : vector<2x1x8x8x128xf32> to vector<128x128xf32>
    %5 = arith.truncf %4 : vector<128x128xf32> to vector<128x128xbf16>
    %c0_8 = arith.constant 0 : index
    %c0_9 = arith.constant 0 : index
    %c0_10 = arith.constant 0 : index
    %c1_11 = arith.constant 1 : index
    %c0_12 = arith.constant 0 : index
    %6 = vector.load %arg1[%c0_8, %c0_9, %c0_10, %c1_11, %c0_12] : memref<2x4x9x9x128xf32, #tpu.memory_space<vmem>>, vector<2x1x8x8x128xf32>
    %7 = vector.shape_cast %6 : vector<2x1x8x8x128xf32> to vector<128x128xf32>
    %8 = arith.truncf %7 : vector<128x128xf32> to vector<128x128xbf16>
    %c0_13 = arith.constant 0 : index
    %c2 = arith.constant 2 : index
    %c0_14 = arith.constant 0 : index
    %c0_15 = arith.constant 0 : index
    %c0_16 = arith.constant 0 : index
    %9 = vector.load %arg1[%c0_13, %c2, %c0_14, %c0_15, %c0_16] : memref<2x4x9x9x128xf32, #tpu.memory_space<vmem>>, vector<2x1x8x8x128xf32>
    %10 = vector.shape_cast %9 : vector<2x1x8x8x128xf32> to vector<128x128xf32>
    %11 = arith.truncf %10 : vector<128x128xf32> to vector<128x128xbf16>
    %c0_17 = arith.constant 0 : index
    %c3 = arith.constant 3 : index
    %c0_18 = arith.constant 0 : index
    %c0_19 = arith.constant 0 : index
    %c0_20 = arith.constant 0 : index
    %12 = vector.load %arg1[%c0_17, %c3, %c0_18, %c0_19, %c0_20] : memref<2x4x9x9x128xf32, #tpu.memory_space<vmem>>, vector<2x1x8x8x128xf32>
    %13 = vector.shape_cast %12 : vector<2x1x8x8x128xf32> to vector<128x128xf32>
    %14 = arith.truncf %13 : vector<128x128xf32> to vector<128x128xbf16>
    %c0_21 = arith.constant 0 : index
    %c2_22 = arith.constant 2 : index
    %c0_23 = arith.constant 0 : index
    %c1_24 = arith.constant 1 : index
    %c0_25 = arith.constant 0 : index
    %15 = vector.load %arg1[%c0_21, %c2_22, %c0_23, %c1_24, %c0_25] : memref<2x4x9x9x128xf32, #tpu.memory_space<vmem>>, vector<2x1x8x8x128xf32>
    %16 = vector.shape_cast %15 : vector<2x1x8x8x128xf32> to vector<128x128xf32>
    %17 = arith.truncf %16 : vector<128x128xf32> to vector<128x128xbf16>
    %c0_26 = arith.constant 0 : index
    %c0_27 = arith.constant 0 : index
    %c1_28 = arith.constant 1 : index
    %c0_29 = arith.constant 0 : index
    %c0_30 = arith.constant 0 : index
    %18 = vector.load %arg1[%c0_26, %c0_27, %c1_28, %c0_29, %c0_30] : memref<2x4x9x9x128xf32, #tpu.memory_space<vmem>>, vector<2x1x8x8x128xf32>
    %19 = vector.shape_cast %18 : vector<2x1x8x8x128xf32> to vector<128x128xf32>
    %20 = arith.truncf %19 : vector<128x128xf32> to vector<128x128xbf16>
    %c0_31 = arith.constant 0 : index
    %c1_32 = arith.constant 1 : index
    %c1_33 = arith.constant 1 : index
    %c0_34 = arith.constant 0 : index
    %c0_35 = arith.constant 0 : index
    %21 = vector.load %arg1[%c0_31, %c1_32, %c1_33, %c0_34, %c0_35] : memref<2x4x9x9x128xf32, #tpu.memory_space<vmem>>, vector<2x1x8x8x128xf32>
    %22 = vector.shape_cast %21 : vector<2x1x8x8x128xf32> to vector<128x128xf32>
    %23 = arith.truncf %22 : vector<128x128xf32> to vector<128x128xbf16>
    %c0_36 = arith.constant 0 : index
    %c0_37 = arith.constant 0 : index
    %c1_38 = arith.constant 1 : index
    %c1_39 = arith.constant 1 : index
    %c0_40 = arith.constant 0 : index
    %24 = vector.load %arg1[%c0_36, %c0_37, %c1_38, %c1_39, %c0_40] : memref<2x4x9x9x128xf32, #tpu.memory_space<vmem>>, vector<2x1x8x8x128xf32>
    %25 = vector.shape_cast %24 : vector<2x1x8x8x128xf32> to vector<128x128xf32>
    %26 = arith.truncf %25 : vector<128x128xf32> to vector<128x128xbf16>
    %27 = tpu.concatenate %2, %5, %8, %11, %14, %17, %20, %23, %26 in 1 : vector<128x128xbf16>, vector<128x128xbf16>, vector<128x128xbf16>, vector<128x128xbf16>, vector<128x128xbf16>, vector<128x128xbf16>, vector<128x128xbf16>, vector<128x128xbf16>, vector<128x128xbf16> -> vector<128x1152xbf16>
    %c0_41 = arith.constant 0 : index
    %c0_42 = arith.constant 0 : index
    %28 = vector.load %arg2[%c0_41, %c0_42] : memref<1152x128xbf16, #tpu.memory_space<vmem>>, vector<1152x128xbf16>
    %cst = arith.constant dense<0.000000e+00> : vector<128x128xf32>
    %29 = tpu.matmul %27, %28, %cst {dimension_numbers = #tpu.dot_dimension_numbers<[1], [0], [0], [1], [0, 0, 1, 1], [], []>} : vector<128x1152xbf16>, vector<1152x128xbf16>, vector<128x128xf32> -> vector<128x128xf32>
    %c0_43 = arith.constant 0 : index
    %c0_44 = arith.constant 0 : index
    %30 = vector.load %arg3[%c0_43, %c0_44] : memref<1x128xf32, #tpu.memory_space<vmem>>, vector<1x128xf32>
    %31 = vector.broadcast %30 : vector<1x128xf32> to vector<128x128xf32>
    %32 = arith.mulf %29, %31 : vector<128x128xf32>
    %c0_45 = arith.constant 0 : index
    %c0_46 = arith.constant 0 : index
    %33 = vector.load %arg4[%c0_45, %c0_46] : memref<1x128xf32, #tpu.memory_space<vmem>>, vector<1x128xf32>
    %34 = vector.broadcast %33 : vector<1x128xf32> to vector<128x128xf32>
    %35 = arith.addf %32, %34 : vector<128x128xf32>
    %36 = arith.negf %35 : vector<128x128xf32>
    %37 = math.exp %36 : vector<128x128xf32>
    %cst_47 = arith.constant 1.000000e+00 : f32
    %38 = vector.broadcast %cst_47 : f32 to vector<128x128xf32>
    %39 = arith.addf %38, %37 : vector<128x128xf32>
    %40 = arith.divf %38, %39 : vector<128x128xf32>
    %41 = arith.mulf %35, %40 : vector<128x128xf32>
    %cst_48 = arith.constant 0.000000e+00 : bf16
    %42 = vector.broadcast %cst_48 : bf16 to vector<2x1x10x128xbf16>
    %cst_49 = arith.constant 0.000000e+00 : bf16
    %43 = vector.broadcast %cst_49 : bf16 to vector<2x10x1x128xbf16>
    %c0_50 = arith.constant 0 : index
    %c0_51 = arith.constant 0 : index
    %c0_52 = arith.constant 0 : index
    %c0_53 = arith.constant 0 : index
    %44 = vector.load %arg11[%c0_50, %c0_51, %c0_52, %c0_53] : memref<2x10x10x128xbf16, #tpu.memory_space<vmem>>, vector<2x1x10x128xbf16>
    tpu.vector_store %arg11[%c0_50, %c0_51, %c0_52, %c0_53], %42 {strides = array<i32>} : memref<2x10x10x128xbf16, #tpu.memory_space<vmem>>, vector<2x1x10x128xbf16>,
    %c0_54 = arith.constant 0 : index
    %c9 = arith.constant 9 : index
    %c0_55 = arith.constant 0 : index
    %c0_56 = arith.constant 0 : index
    %45 = vector.load %arg11[%c0_54, %c9, %c0_55, %c0_56] : memref<2x10x10x128xbf16, #tpu.memory_space<vmem>>, vector<2x1x10x128xbf16>
    tpu.vector_store %arg11[%c0_54, %c9, %c0_55, %c0_56], %42 {strides = array<i32>} : memref<2x10x10x128xbf16, #tpu.memory_space<vmem>>, vector<2x1x10x128xbf16>,
    %c0_57 = arith.constant 0 : index
    %c0_58 = arith.constant 0 : index
    %c0_59 = arith.constant 0 : index
    %c0_60 = arith.constant 0 : index
    %46 = vector.load %arg11[%c0_57, %c0_58, %c0_59, %c0_60] : memref<2x10x10x128xbf16, #tpu.memory_space<vmem>>, vector<2x10x1x128xbf16>
    tpu.vector_store %arg11[%c0_57, %c0_58, %c0_59, %c0_60], %43 {strides = array<i32>} : memref<2x10x10x128xbf16, #tpu.memory_space<vmem>>, vector<2x10x1x128xbf16>,
    %c0_61 = arith.constant 0 : index
    %c0_62 = arith.constant 0 : index
    %c9_63 = arith.constant 9 : index
    %c0_64 = arith.constant 0 : index
    %47 = vector.load %arg11[%c0_61, %c0_62, %c9_63, %c0_64] : memref<2x10x10x128xbf16, #tpu.memory_space<vmem>>, vector<2x10x1x128xbf16>
    tpu.vector_store %arg11[%c0_61, %c0_62, %c9_63, %c0_64], %43 {strides = array<i32>} : memref<2x10x10x128xbf16, #tpu.memory_space<vmem>>, vector<2x10x1x128xbf16>,
    %48 = vector.shape_cast %41 : vector<128x128xf32> to vector<2x8x8x128xf32>
    %49 = arith.truncf %48 : vector<2x8x8x128xf32> to vector<2x8x8x128xbf16>
    %c0_65 = arith.constant 0 : index
    %c1_66 = arith.constant 1 : index
    %c1_67 = arith.constant 1 : index
    %c0_68 = arith.constant 0 : index
    %50 = vector.load %arg11[%c0_65, %c1_66, %c1_67, %c0_68] : memref<2x10x10x128xbf16, #tpu.memory_space<vmem>>, vector<2x8x8x128xbf16>
    tpu.vector_store %arg11[%c0_65, %c1_66, %c1_67, %c0_68], %49 {strides = array<i32>} : memref<2x10x10x128xbf16, #tpu.memory_space<vmem>>, vector<2x8x8x128xbf16>,
    %c0_69 = arith.constant 0 : index
    %c0_70 = arith.constant 0 : index
    %c0_71 = arith.constant 0 : index
    %c0_72 = arith.constant 0 : index
    %51 = vector.load %arg11[%c0_69, %c0_70, %c0_71, %c0_72] : memref<2x10x10x128xbf16, #tpu.memory_space<vmem>>, vector<2x8x8x128xbf16>
    %52 = vector.shape_cast %51 : vector<2x8x8x128xbf16> to vector<128x128xbf16>
    %c0_73 = arith.constant 0 : index
    %c0_74 = arith.constant 0 : index
    %c1_75 = arith.constant 1 : index
    %c0_76 = arith.constant 0 : index
    %53 = vector.load %arg11[%c0_73, %c0_74, %c1_75, %c0_76] : memref<2x10x10x128xbf16, #tpu.memory_space<vmem>>, vector<2x8x8x128xbf16>
    %54 = vector.shape_cast %53 : vector<2x8x8x128xbf16> to vector<128x128xbf16>
    %c0_77 = arith.constant 0 : index
    %c0_78 = arith.constant 0 : index
    %c2_79 = arith.constant 2 : index
    %c0_80 = arith.constant 0 : index
    %55 = vector.load %arg11[%c0_77, %c0_78, %c2_79, %c0_80] : memref<2x10x10x128xbf16, #tpu.memory_space<vmem>>, vector<2x8x8x128xbf16>
    %56 = vector.shape_cast %55 : vector<2x8x8x128xbf16> to vector<128x128xbf16>
    %c0_81 = arith.constant 0 : index
    %c1_82 = arith.constant 1 : index
    %c0_83 = arith.constant 0 : index
    %c0_84 = arith.constant 0 : index
    %57 = vector.load %arg11[%c0_81, %c1_82, %c0_83, %c0_84] : memref<2x10x10x128xbf16, #tpu.memory_space<vmem>>, vector<2x8x8x128xbf16>
    %58 = vector.shape_cast %57 : vector<2x8x8x128xbf16> to vector<128x128xbf16>
    %c0_85 = arith.constant 0 : index
    %c1_86 = arith.constant 1 : index
    %c1_87 = arith.constant 1 : index
    %c0_88 = arith.constant 0 : index
    %59 = vector.load %arg11[%c0_85, %c1_86, %c1_87, %c0_88] : memref<2x10x10x128xbf16, #tpu.memory_space<vmem>>, vector<2x8x8x128xbf16>
    %60 = vector.shape_cast %59 : vector<2x8x8x128xbf16> to vector<128x128xbf16>
    %c0_89 = arith.constant 0 : index
    %c1_90 = arith.constant 1 : index
    %c2_91 = arith.constant 2 : index
    %c0_92 = arith.constant 0 : index
    %61 = vector.load %arg11[%c0_89, %c1_90, %c2_91, %c0_92] : memref<2x10x10x128xbf16, #tpu.memory_space<vmem>>, vector<2x8x8x128xbf16>
    %62 = vector.shape_cast %61 : vector<2x8x8x128xbf16> to vector<128x128xbf16>
    %c0_93 = arith.constant 0 : index
    %c2_94 = arith.constant 2 : index
    %c0_95 = arith.constant 0 : index
    %c0_96 = arith.constant 0 : index
    %63 = vector.load %arg11[%c0_93, %c2_94, %c0_95, %c0_96] : memref<2x10x10x128xbf16, #tpu.memory_space<vmem>>, vector<2x8x8x128xbf16>
    %64 = vector.shape_cast %63 : vector<2x8x8x128xbf16> to vector<128x128xbf16>
    %c0_97 = arith.constant 0 : index
    %c2_98 = arith.constant 2 : index
    %c1_99 = arith.constant 1 : index
    %c0_100 = arith.constant 0 : index
    %65 = vector.load %arg11[%c0_97, %c2_98, %c1_99, %c0_100] : memref<2x10x10x128xbf16, #tpu.memory_space<vmem>>, vector<2x8x8x128xbf16>
    %66 = vector.shape_cast %65 : vector<2x8x8x128xbf16> to vector<128x128xbf16>
    %c0_101 = arith.constant 0 : index
    %c2_102 = arith.constant 2 : index
    %c2_103 = arith.constant 2 : index
    %c0_104 = arith.constant 0 : index
    %67 = vector.load %arg11[%c0_101, %c2_102, %c2_103, %c0_104] : memref<2x10x10x128xbf16, #tpu.memory_space<vmem>>, vector<2x8x8x128xbf16>
    %68 = vector.shape_cast %67 : vector<2x8x8x128xbf16> to vector<128x128xbf16>
    %69 = tpu.concatenate %52, %54, %56, %58, %60, %62, %64, %66, %68 in 1 : vector<128x128xbf16>, vector<128x128xbf16>, vector<128x128xbf16>, vector<128x128xbf16>, vector<128x128xbf16>, vector<128x128xbf16>, vector<128x128xbf16>, vector<128x128xbf16>, vector<128x128xbf16> -> vector<128x1152xbf16>
    %c0_105 = arith.constant 0 : index
    %c0_106 = arith.constant 0 : index
    %70 = vector.load %arg5[%c0_105, %c0_106] : memref<1152x128xbf16, #tpu.memory_space<vmem>>, vector<1152x128xbf16>
    %cst_107 = arith.constant dense<0.000000e+00> : vector<128x128xf32>
    %71 = tpu.matmul %69, %70, %cst_107 {dimension_numbers = #tpu.dot_dimension_numbers<[1], [0], [0], [1], [0, 0, 1, 1], [], []>} : vector<128x1152xbf16>, vector<1152x128xbf16>, vector<128x128xf32> -> vector<128x128xf32>
    %c0_108 = arith.constant 0 : index
    %c0_109 = arith.constant 0 : index
    %72 = vector.load %arg6[%c0_108, %c0_109] : memref<1x128xf32, #tpu.memory_space<vmem>>, vector<1x128xf32>
    %73 = vector.broadcast %72 : vector<1x128xf32> to vector<128x128xf32>
    %74 = arith.mulf %71, %73 : vector<128x128xf32>
    %c0_110 = arith.constant 0 : index
    %c0_111 = arith.constant 0 : index
    %75 = vector.load %arg7[%c0_110, %c0_111] : memref<1x128xf32, #tpu.memory_space<vmem>>, vector<1x128xf32>
    %76 = vector.broadcast %75 : vector<1x128xf32> to vector<128x128xf32>
    %77 = arith.addf %74, %76 : vector<128x128xf32>
    %c0_112 = arith.constant 0 : index
    %c3_113 = arith.constant 3 : index
    %c0_114 = arith.constant 0 : index
    %c0_115 = arith.constant 0 : index
    %c0_116 = arith.constant 0 : index
    %78 = vector.load %arg1[%c0_112, %c3_113, %c0_114, %c0_115, %c0_116] : memref<2x4x9x9x128xf32, #tpu.memory_space<vmem>>, vector<2x1x8x8x128xf32>
    %79 = vector.shape_cast %78 : vector<2x1x8x8x128xf32> to vector<128x128xf32>
    %80 = arith.truncf %79 : vector<128x128xf32> to vector<128x128xbf16>
    %c0_117 = arith.constant 0 : index
    %c0_118 = arith.constant 0 : index
    %81 = vector.load %arg8[%c0_117, %c0_118] : memref<128x128xbf16, #tpu.memory_space<vmem>>, vector<128x128xbf16>
    %cst_119 = arith.constant dense<0.000000e+00> : vector<128x128xf32>
    %82 = tpu.matmul %80, %81, %cst_119 {dimension_numbers = #tpu.dot_dimension_numbers<[1], [0], [0], [1], [0, 0, 1, 1], [], []>} : vector<128x128xbf16>, vector<128x128xbf16>, vector<128x128xf32> -> vector<128x128xf32>
    %c0_120 = arith.constant 0 : index
    %c0_121 = arith.constant 0 : index
    %83 = vector.load %arg9[%c0_120, %c0_121] : memref<1x128xf32, #tpu.memory_space<vmem>>, vector<1x128xf32>
    %84 = vector.broadcast %83 : vector<1x128xf32> to vector<128x128xf32>
    %85 = arith.addf %82, %84 : vector<128x128xf32>
    %86 = arith.addf %85, %77 : vector<128x128xf32>
    %87 = arith.negf %86 : vector<128x128xf32>
    %88 = math.exp %87 : vector<128x128xf32>
    %cst_122 = arith.constant 1.000000e+00 : f32
    %89 = vector.broadcast %cst_122 : f32 to vector<128x128xf32>
    %90 = arith.addf %89, %88 : vector<128x128xf32>
    %91 = arith.divf %89, %90 : vector<128x128xf32>
    %92 = arith.mulf %86, %91 : vector<128x128xf32>
    %93 = vector.shape_cast %92 : vector<128x128xf32> to vector<2x8x8x128xf32>
    %c0_123 = arith.constant 0 : index
    %c0_124 = arith.constant 0 : index
    %c0_125 = arith.constant 0 : index
    %c0_126 = arith.constant 0 : index
    %94 = vector.load %arg10[%c0_123, %c0_124, %c0_125, %c0_126] : memref<2x8x8x128xf32, #tpu.memory_space<vmem>>, vector<2x8x8x128xf32>
    tpu.vector_store %arg10[%c0_123, %c0_124, %c0_125, %c0_126], %93 {strides = array<i32>} : memref<2x8x8x128xf32, #tpu.memory_space<vmem>>, vector<2x8x8x128xf32>,
    return
  }
  func.func @transform_0(%arg0: i32) -> (i32, i32, i32, i32, i32) {
    %c0_i32 = arith.constant 0 : i32
    %c0_i32_0 = arith.constant 0 : i32
    %c0_i32_1 = arith.constant 0 : i32
    %c0_i32_2 = arith.constant 0 : i32
    %c0_i32_3 = arith.constant 0 : i32
    return %arg0, %c0_i32, %c0_i32_0, %c0_i32_1, %c0_i32_2 : i32, i32, i32, i32, i32
  }
  func.func @transform_1(%arg0: i32) -> (i32, i32) {
    %c0_i32 = arith.constant 0 : i32
    %c0_i32_0 = arith.constant 0 : i32
    %c0_i32_1 = arith.constant 0 : i32
    return %c0_i32, %c0_i32_0 : i32, i32
  }
  func.func @transform_2(%arg0: i32) -> (i32, i32) {
    %c0_i32 = arith.constant 0 : i32
    %c0_i32_0 = arith.constant 0 : i32
    %c0_i32_1 = arith.constant 0 : i32
    return %c0_i32, %c0_i32_0 : i32, i32
  }
  func.func @transform_3(%arg0: i32) -> (i32, i32) {
    %c0_i32 = arith.constant 0 : i32
    %c0_i32_0 = arith.constant 0 : i32
    %c0_i32_1 = arith.constant 0 : i32
    return %c0_i32, %c0_i32_0 : i32, i32
  }
  func.func @transform_4(%arg0: i32) -> (i32, i32) {
    %c0_i32 = arith.constant 0 : i32
    %c0_i32_0 = arith.constant 0 : i32
    %c0_i32_1 = arith.constant 0 : i32
    return %c0_i32, %c0_i32_0 : i32, i32
  }
  func.func @transform_5(%arg0: i32) -> (i32, i32) {
    %c0_i32 = arith.constant 0 : i32
    %c0_i32_0 = arith.constant 0 : i32
    %c0_i32_1 = arith.constant 0 : i32
    return %c0_i32, %c0_i32_0 : i32, i32
  }
  func.func @transform_6(%arg0: i32) -> (i32, i32) {
    %c0_i32 = arith.constant 0 : i32
    %c0_i32_0 = arith.constant 0 : i32
    %c0_i32_1 = arith.constant 0 : i32
    return %c0_i32, %c0_i32_0 : i32, i32
  }
  func.func @transform_7(%arg0: i32) -> (i32, i32) {
    %c0_i32 = arith.constant 0 : i32
    %c0_i32_0 = arith.constant 0 : i32
    %c0_i32_1 = arith.constant 0 : i32
    return %c0_i32, %c0_i32_0 : i32, i32
  }
  func.func @transform_8(%arg0: i32) -> (i32, i32) {
    %c0_i32 = arith.constant 0 : i32
    %c0_i32_0 = arith.constant 0 : i32
    %c0_i32_1 = arith.constant 0 : i32
    return %c0_i32, %c0_i32_0 : i32, i32
  }
  func.func @transform_9(%arg0: i32) -> (i32, i32, i32, i32) {
    %c0_i32 = arith.constant 0 : i32
    %c0_i32_0 = arith.constant 0 : i32
    %c0_i32_1 = arith.constant 0 : i32
    %c0_i32_2 = arith.constant 0 : i32
    return %arg0, %c0_i32, %c0_i32_0, %c0_i32_1 : i32, i32, i32, i32
  }
}

</mosaic_0001>

<bundles_post_ra>
// kernel: tpu_custom_call.1
= control target key start
LH: loop header
LB: loop body
LE: loop exit
PB: predicated region body
PF: predicated region fallthrough
CT: control target
= control target key end

     0   :  { %s8684_s0 = inlined_call_operand.vmem [shape: f32[2,4,9,9,128], index: 0, kind: input, shape index: {}]   ;;  %s8685_s1 = inlined_call_operand.vmem [shape: bf16[1152,128], index: 1, kind: input, shape index: {}]   ;;  %s8686_s2 = inlined_call_operand.vmem [shape: f32[1,128], index: 2, kind: input, shape index: {}]   ;;  %s8687_s3 = inlined_call_operand.vmem [shape: f32[1,128], index: 3, kind: input, shape index: {}]   ;;  %s8688_s4 = inlined_call_operand.vmem [shape: bf16[1152,128], index: 4, kind: input, shape index: {}]   ;;  %s8689_s5 = inlined_call_operand.vmem [shape: f32[1,128], index: 5, kind: input, shape index: {}]   ;;  %s8690_s6 = inlined_call_operand.vmem [shape: f32[1,128], index: 6, kind: input, shape index: {}]   ;;  %s8691_s7 = inlined_call_operand.vmem [shape: bf16[128,128], index: 7, kind: input, shape index: {}]   ;;  %s8692_s8 = inlined_call_operand.vmem [shape: f32[1,128], index: 8, kind: input, shape index: {}]   ;;  %s8693_s9 = inlined_call_operand.hbm [shape: f32[2,8,8,128], index: 9, kind: output, shape index: {}]  }
   0x1   :  { %v5982_v0 = vld [vmem:[%s8685_s1 + $0x40] sm:$0xff]   ;;  %v5986_v4 = vld [vmem:[%s8685_s1 + $0x48] sm:$0xff]   ;;  %v5990_v8 = vld [vmem:[%s8685_s1 + $0x50] sm:$0xff]  }
   0x2   :  { %v5983_v1 = vld [vmem:[%s8685_s1 + $0xc0] sm:$0xff]   ;;  %5306 = vmatprep.subr.bf16.mxu0 %v5982_v0  ;;  %v5987_v5 = vld [vmem:[%s8685_s1 + $0xc8] sm:$0xff]   ;;  %v5991_v9 = vld [vmem:[%s8685_s1 + $0xd0] sm:$0xff]  }
   0x3   :  { %v5984_v2 = vld [vmem:[%s8685_s1] sm:$0xff]   ;;  %5370 = vmatprep.subr.bf16.mxu1 %v5983_v1  ;;  %v5988_v6 = vld [vmem:[%s8685_s1 + $0x8] sm:$0xff]   ;;  %v5992_v10 = vld [vmem:[%s8685_s1 + $0x10] sm:$0xff]  }
   0x4   :  { %v5985_v3 = vld [vmem:[%s8685_s1 + $0x80] sm:$0xff]   ;;  %5307 = vmatpush3.bf16.msra.mxu0 %v5984_v2  ;;  %v5989_v7 = vld [vmem:[%s8685_s1 + $0x88] sm:$0xff]   ;;  %v5993_v11 = vld [vmem:[%s8685_s1 + $0x90] sm:$0xff]  }
   0x5   :  { %5371 = vmatpush3.bf16.msra.mxu1 %v5985_v3  ;;  %5308 = vmatprep.subr.bf16.mxu0 %v5986_v4  ;;  %v5994_v12 = vld [vmem:[%s8685_s1 + $0x58] sm:$0xff]   ;;  %v5998_v16 = vld [vmem:[%s8685_s1 + $0x60] sm:$0xff]   ;;  %v6002_v20 = vld [vmem:[%s8685_s1 + $0x68] sm:$0xff]  }
   0x6   :  { %5372 = vmatprep.subr.bf16.mxu1 %v5987_v5  ;;  %v5995_v13 = vld [vmem:[%s8685_s1 + $0xd8] sm:$0xff]   ;;  %v5999_v17 = vld [vmem:[%s8685_s1 + $0xe0] sm:$0xff]   ;;  %v6003_v21 = vld [vmem:[%s8685_s1 + $0xe8] sm:$0xff]  }
   0x7   :  { %v5996_v14 = vld [vmem:[%s8685_s1 + $0x18] sm:$0xff]   ;;  %v6000_v18 = vld [vmem:[%s8685_s1 + $0x20] sm:$0xff]   ;;  %v6004_v22 = vld [vmem:[%s8685_s1 + $0x28] sm:$0xff]  }
   0x8   :  { %5309 = vmatpush3.bf16.msra.mxu0 %v5988_v6  ;;  %v5997_v15 = vld [vmem:[%s8685_s1 + $0x98] sm:$0xff]   ;;  %v6001_v19 = vld [vmem:[%s8685_s1 + $0xa0] sm:$0xff]   ;;  %v6005_v23 = vld [vmem:[%s8685_s1 + $0xa8] sm:$0xff]  }
   0x9   :  { %5373 = vmatpush3.bf16.msra.mxu1 %v5989_v7  ;;  %5310 = vmatprep.subr.bf16.mxu0 %v5990_v8  ;;  %v6006_v24 = vld [vmem:[%s8685_s1 + $0x70] sm:$0xff]   ;;  %v6010_v28 = vld [vmem:[%s8685_s1 + $0x78] sm:$0xff]   ;;  %v6468_v33 = vld [vmem:[%s8684_s0 + $0xa0] sm:$0xff] }
   0xa   :  { %5374 = vmatprep.subr.bf16.mxu1 %v5991_v9  ;;  %v6007_v25 = vld [vmem:[%s8685_s1 + $0xf0] sm:$0xff]   ;;  %v6011_v29 = vld [vmem:[%s8685_s1 + $0xf8] sm:$0xff]   ;;  %v4853_v34 = vld [vmem:[%s8684_s0 + $0x120] sm:$0xff] }
   0xb   :  { %v6008_v26 = vld [vmem:[%s8685_s1 + $0x30] sm:$0xff]   ;;  %v6012_v30 = vld [vmem:[%s8685_s1 + $0x38] sm:$0xff]   ;;  %v34_v37 = vld [vmem:[%s8684_s0] sm:$0xff] }
   0xc   :  { %5311 = vmatpush3.bf16.msra.mxu0 %v5992_v10  ;;  %v6009_v27 = vld [vmem:[%s8685_s1 + $0xb0] sm:$0xff]   ;;  %v6013_v31 = vld [vmem:[%s8685_s1 + $0xb8] sm:$0xff]   ;;  %v83_v41 = vld [vmem:[%s8684_s0 + $0x1] sm:$0xff] }
   0xd   :  { %5375 = vmatpush3.bf16.msra.mxu1 %v5993_v11  ;;  %5312 = vmatprep.subr.bf16.mxu0 %v5994_v12  ;;  %v4837_v32 = vld [vmem:[%s8684_s0 + $0x90] sm:$0xff]  ;;  %v6014_v44 = vld [vmem:[%s8685_s1 + $0x140] sm:$0xff]   ;;  %v6016_v58 = vld [vmem:[%s8685_s1 + $0x148] sm:$0xff]  }
   0xe   :  { %5376 = vmatprep.subr.bf16.mxu1 %v5995_v13  ;;  %v75_v35 = vpack.c.bf16 %v6468_v33, %v4837_v32  ;;  %v4854_v36 = vld [vmem:[%s8684_s0 + $0x130] sm:$0xff]  ;;  %v6015_v45 = vld [vmem:[%s8685_s1 + $0x100] sm:$0xff]   ;;  %v6017_v60 = vld [vmem:[%s8685_s1 + $0x108] sm:$0xff]  }
   0xf   :  { %v6483_v38 = vld [vmem:[%s8684_s0 + $0x10] sm:$0xff]  ;;  %v124_v39 = vpack.c.bf16 %v4854_v36, %v4853_v34  ;;  %v6509_v47 = vld [vmem:[%s8684_s0 + $0xc0] sm:$0xff] }
  0x10   :  { %5313 = vmatpush3.bf16.msra.mxu0 %v5996_v14  ;;  %v50_v40 = vpack.c.bf16 %v6483_v38, %v34_v37  ;;  %v6492_v42 = vld [vmem:[%s8684_s0 + $0x11] sm:$0xff]  ;;  %863 = vmatprep.mubr.bf16.mxu0 %v75_v35  ;;  %v4855_v48 = vld [vmem:[%s8684_s0 + $0x140] sm:$0xff] }
  0x11   :  { %5377 = vmatpush3.bf16.msra.mxu1 %v5997_v15  ;;  %5314 = vmatprep.subr.bf16.mxu0 %v5998_v16  ;;  %v99_v43 = vpack.c.bf16 %v6492_v42, %v83_v41  ;;  %v6504_v46 = vld [vmem:[%s8684_s0 + $0xb0] sm:$0xff]  ;;  %v6522_v52 = vld [vmem:[%s8684_s0 + $0x20] sm:$0xff] }
  0x12   :  { %5378 = vmatprep.subr.bf16.mxu1 %v5999_v17  ;;  %960 = vmatprep.mubr.bf16.mxu1 %v124_v39  ;;  %v4856_v49 = vld [vmem:[%s8684_s0 + $0x150] sm:$0xff]  ;;  %v76_v50 = vpack.c.bf16 %v6509_v47, %v6504_v46  ;;  %v6532_v54 = vld [vmem:[%s8684_s0 + $0x21] sm:$0xff] }
  0x13   :  { %v125_v51 = vpack.c.bf16 %v4856_v49, %v4855_v48  ;;  %v6527_v53 = vld [vmem:[%s8684_s0 + $0x30] sm:$0xff]  ;;  %v247_v56 = vpack.c.bf16 %v6532_v54, %v6492_v42  ;;  %v6559_v62 = vld [vmem:[%s8684_s0 + $0xe0] sm:$0xff]  ;;  %v6026_v39 = vld [vmem:[%s8685_s1 + $0x1c8] sm:$0xff]  }
  0x14   :  { %5315 = vmatpush3.bf16.msra.mxu0 %v6000_v18  ;;  %v6537_v55 = vld [vmem:[%s8684_s0 + $0x31] sm:$0xff]  ;;  %v51_v57 = vpack.c.bf16 %v6527_v53, %v6522_v52  ;;  %v4857_v0 = vld [vmem:[%s8684_s0 + $0x160] sm:$0xff]  ;;  %v6027_v49 = vld [vmem:[%s8685_s1 + $0x188] sm:$0xff]  }
  0x15   :  { %5379 = vmatpush3.bf16.msra.mxu1 %v6001_v19  ;;  %5316 = vmatprep.subr.bf16.mxu0 %v6002_v20  ;;  %v100_v59 = vpack.c.bf16 %v6537_v55, %v6532_v54  ;;  %v6554_v61 = vld [vmem:[%s8684_s0 + $0xd0] sm:$0xff]  ;;  %v6572_v3 = vld [vmem:[%s8684_s0 + $0x40] sm:$0xff]  ;;  %v6020_v18 = vld [vmem:[%s8685_s1 + $0x158] sm:$0xff]  }
  0x16   :  { %5380 = vmatprep.subr.bf16.mxu1 %v6003_v21  ;;  %v77_v63 = vpack.c.bf16 %v6559_v62, %v6554_v61  ;;  %v4858_v1 = vld [vmem:[%s8684_s0 + $0x170] sm:$0xff]  ;;  %v6582_v5 = vld [vmem:[%s8684_s0 + $0x41] sm:$0xff]  ;;  %v6021_v21 = vld [vmem:[%s8685_s1 + $0x118] sm:$0xff]  }
  0x17   :  { %v126_v2 = vpack.c.bf16 %v4858_v1, %v4857_v0  ;;  %v6577_v4 = vld [vmem:[%s8684_s0 + $0x50] sm:$0xff]  ;;  %v248_v7 = vpack.c.bf16 %v6582_v5, %v6537_v55  ;;  %v6605_v11 = vld [vmem:[%s8684_s0 + $0x100] sm:$0xff] }
  0x18   :  { %5317 = vmatpush3.bf16.msra.mxu0 %v6004_v22  ;;  %v6018_v6 = vld [vmem:[%s8685_s1 + $0x150] sm:$0xff]   ;;  %v4859_v12 = vld [vmem:[%s8684_s0 + $0x180] sm:$0xff]  ;;  %v52_v14 = vpack.c.bf16 %v6577_v4, %v6572_v3 }
  0x19   :  { %5381 = vmatpush3.bf16.msra.mxu1 %v6005_v23  ;;  %5318 = vmatprep.subr.bf16.mxu0 %v6006_v24  ;;  %v6019_v8 = vld [vmem:[%s8685_s1 + $0x110] sm:$0xff]   ;;  %v6618_v15 = vld [vmem:[%s8684_s0 + $0x61] sm:$0xff] }
  0x1a   :  { %5382 = vmatprep.subr.bf16.mxu1 %v6007_v25  ;;  %v6595_v9 = vld [vmem:[%s8684_s0 + $0x51] sm:$0xff]  ;;  %v6635_v22 = vld [vmem:[%s8684_s0 + $0x60] sm:$0xff] }
  0x1b   :  { %v6600_v10 = vld [vmem:[%s8684_s0 + $0xf0] sm:$0xff]  ;;  %v101_v16 = vpack.c.bf16 %v6595_v9, %v6582_v5  ;;  %v249_v19 = vpack.c.bf16 %v6618_v15, %v6595_v9  ;;  %v6024_v32 = vld [vmem:[%s8685_s1 + $0x1c0] sm:$0xff]  }
  0x1c   :  { %5319 = vmatpush3.bf16.msra.mxu0 %v6008_v26  ;;  %v4860_v13 = vld [vmem:[%s8684_s0 + $0x190] sm:$0xff]  ;;  %v78_v17 = vpack.c.bf16 %v6605_v11, %v6600_v10  ;;  %v6653_v26 = vld [vmem:[%s8684_s0 + $0x2e0] sm:$0xff] }
  0x1d   :  { %5383 = vmatpush3.bf16.msra.mxu1 %v6009_v27  ;;  %5320 = vmatprep.subr.bf16.mxu0 %v6010_v28  ;;  %v127_v20 = vpack.c.bf16 %v4860_v13, %v4859_v12  ;;  %v6640_v23 = vld [vmem:[%s8684_s0 + $0x70] sm:$0xff]  ;;  %v4861_v27 = vld [vmem:[%s8684_s0 + $0x360] sm:$0xff]  ;;  %v6032_v12 = vld [vmem:[%s8685_s1 + $0x1d8] sm:$0xff]  }
  0x1e   :  { %5384 = vmatprep.subr.bf16.mxu1 %v6011_v29  ;;  %v6645_v24 = vld [vmem:[%s8684_s0 + $0x71] sm:$0xff]  ;;  %v6022_v29 = vld [vmem:[%s8685_s1 + $0x160] sm:$0xff]  }
  0x1f   :  { %v4845_v25 = vld [vmem:[%s8684_s0 + $0x2d0] sm:$0xff]  ;;  %v102_v34 = vpack.c.bf16 %v6645_v24, %v6618_v15  ;;  %v6025_v36 = vld [vmem:[%s8685_s1 + $0x180] sm:$0xff]  }
  0x20   :  { %5321 = vmatpush3.bf16.msra.mxu0 %v6012_v30  ;;  %v4862_v28 = vld [vmem:[%s8684_s0 + $0x370] sm:$0xff]  ;;  %v6023_v30 = vld [vmem:[%s8685_s1 + $0x120] sm:$0xff]   ;;  %v79_v35 = vpack.c.bf16 %v6653_v26, %v4845_v25 }
  0x21   :  { %5385 = vmatpush3.bf16.msra.mxu1 %v6013_v31  ;;  %5434 = vmatprep.subr.bf16.mxu0 %v6014_v44  ;;  %v53_v31 = vpack.c.bf16 %v6640_v23, %v6635_v22  ;;  %v128_v37 = vpack.c.bf16 %v4862_v28, %v4861_v27  ;;  %v6687_v41 = vld [vmem:[%s8684_s0 + $0x250] sm:$0xff]  ;;  %v91_v44 = vld [vmem:[%s8684_s0 + $0x241] sm:$0xff] }
  0x22   :  { %5498 = vmatprep.subr.bf16.mxu1 %v6024_v32  ;;  %v6705_v48 = vld [vmem:[%s8684_s0 + $0x300] sm:$0xff]  ;;  %v6030_v0 = vld [vmem:[%s8685_s1 + $0x1d0] sm:$0xff]  }
  0x23   :  { %864 = vmatmul.mubr.bf16.vlgmr.msra.gmra.mrb[0].mxu0 %v50_v40  ;;  %v42_v40 = vld [vmem:[%s8684_s0 + $0x240] sm:$0xff]  ;;  %v4866_v25 = vld [vmem:[%s8684_s0 + $0x3b0] sm:$0xff] }
  0x24   :  { %961 = vmatmul.mubr.bf16.vlgmr.msra.gmra.mrb[0].mxu1 %v99_v43  ;;  %5435 = vmatpush3.bf16.msra.mxu0 %v6015_v45  ;;  %v6692_v43 = vld [vmem:[%s8684_s0 + $0x251] sm:$0xff]  ;;  %v6745_v13 = vld [vmem:[%s8684_s0 + $0x260] sm:$0xff] }
  0x25   :  { %871 = vmatprep.mubr.bf16.mxu0 %v76_v50  ;;  %968 = vmatprep.mubr.bf16.mxu1 %v125_v51  ;;  %v6700_v45 = vld [vmem:[%s8684_s0 + $0x2f0] sm:$0xff]  ;;  %v4863_v50 = vld [vmem:[%s8684_s0 + $0x380] sm:$0xff]  ;;  %v103_v1 = vpack.c.bf16 %v6692_v43, %v91_v44 }
  0x26   :  { %5436 = vmatprep.subr.bf16.mxu0 %v6016_v58  ;;  %5499 = vmatpush3.bf16.msra.mxu1 %v6025_v36  ;;  %v4864_v51 = vld [vmem:[%s8684_s0 + $0x390] sm:$0xff]  ;;  %v6028_v58 = vld [vmem:[%s8685_s1 + $0x168] sm:$0xff]  }
  0x27   :  { %5500 = vmatprep.subr.bf16.mxu1 %v6026_v39  ;;  %v6779_v27 = vld [vmem:[%s8684_s0 + $0x281] sm:$0xff]  ;;  %v6034_v28 = vld [vmem:[%s8685_s1 + $0x170] sm:$0xff]  }
  0x28   :  { %5437 = vmatpush3.bf16.msra.mxu0 %v6017_v60  ;;  %v6029_v60 = vld [vmem:[%s8685_s1 + $0x128] sm:$0xff]   ;;  %v6804_v39 = vld [vmem:[%s8684_s0 + $0x280] sm:$0xff]  ;;  %v6812_v44 = vld [vmem:[%s8684_s0 + $0x290] sm:$0xff] }
  0x29   :  { %5438 = vmatprep.subr.bf16.mxu0 %v6018_v6  ;;  %v6031_v6 = vld [vmem:[%s8685_s1 + $0x190] sm:$0xff]  }
  0x2a   :  { %5501 = vmatpush3.bf16.msra.mxu1 %v6027_v49  ;;  %v6817_v49 = vld [vmem:[%s8684_s0 + $0x291] sm:$0xff] }
  0x2b   :  { %872 = vmatmul.mubr.bf16.gmra.mrb[4].mxu0 %v51_v57  ;;  %v6719_v57 = vld [vmem:[%s8684_s0 + $0x261] sm:$0xff]  ;;  %5502 = vmatprep.subr.bf16.mxu1 %v6030_v0  ;;  %v4868_v0 = vld [vmem:[%s8684_s0 + $0x3d0] sm:$0xff] }
  0x2c   :  { %969 = vmatmul.mubr.bf16.gmra.mrb[4].mxu1 %v100_v59  ;;  %879 = vmatprep.mubr.bf16.mxu0 %v77_v63  ;;  %v251_v59 = vpack.c.bf16 %v6719_v57, %v6692_v43  ;;  %v54_v63 = vpack.c.bf16 %v6687_v41, %v42_v40  ;;  %v6038_v40 = vld [vmem:[%s8685_s1 + $0x1e8] sm:$0xff]  }
  0x2d   :  { %976 = vmatprep.mubr.bf16.mxu1 %v126_v2  ;;  %5439 = vmatpush3.bf16.msra.mxu0 %v6019_v8  ;;  %v80_v2 = vpack.c.bf16 %v6705_v48, %v6700_v45  ;;  %v129_v8 = vpack.c.bf16 %v4864_v51, %v4863_v50  ;;  %v6822_v50 = vld [vmem:[%s8684_s0 + $0x330] sm:$0xff]  ;;  %v6039_v51 = vld [vmem:[%s8685_s1 + $0x1a8] sm:$0xff]  }
  0x2e   :  { %5440 = vmatprep.subr.bf16.mxu0 %v6020_v18  ;;  %5503 = vmatpush3.bf16.msra.mxu1 %v6031_v6  ;;  %v6765_v18 = vld [vmem:[%s8684_s0 + $0x320] sm:$0xff]  ;;  %v6040_v6 = vld [vmem:[%s8685_s1 + $0x178] sm:$0xff]  }
  0x2f   :  { %5504 = vmatprep.subr.bf16.mxu1 %v6032_v12 }
  0x31   :  { %5441 = vmatpush3.bf16.msra.mxu0 %v6021_v21  ;;  %v6033_v21 = vld [vmem:[%s8685_s1 + $0x198] sm:$0xff]  }
  0x32   :  { %5442 = vmatprep.subr.bf16.mxu0 %v6022_v29  ;;  %5505 = vmatpush3.bf16.msra.mxu1 %v6033_v21 }
  0x33   :  { %880 = vmatmul.mubr.bf16.gmra.mrb[8].mxu0 %v52_v14  ;;  %v6750_v14 = vld [vmem:[%s8684_s0 + $0x270] sm:$0xff] }
  0x34   :  { %977 = vmatmul.mubr.bf16.gmra.mrb[8].mxu1 %v101_v16  ;;  %887 = vmatprep.mubr.bf16.mxu0 %v78_v17  ;;  %v6755_v16 = vld [vmem:[%s8684_s0 + $0x271] sm:$0xff] }
  0x35   :  { %984 = vmatprep.mubr.bf16.mxu1 %v127_v20  ;;  %5443 = vmatpush3.bf16.msra.mxu0 %v6023_v30  ;;  %v6760_v17 = vld [vmem:[%s8684_s0 + $0x310] sm:$0xff]  ;;  %v4865_v20 = vld [vmem:[%s8684_s0 + $0x3a0] sm:$0xff]  ;;  %v252_v29 = vpack.c.bf16 %v6779_v27, %v6755_v16  ;;  %v55_v30 = vpack.c.bf16 %v6750_v14, %v6745_v13  ;;  %v104_v32 = vpack.c.bf16 %v6755_v16, %v6719_v57 }
  0x36   :  { %5444 = vmatprep.subr.bf16.mxu0 %v6028_v58  ;;  %v130_v36 = vpack.c.bf16 %v4866_v25, %v4865_v20  ;;  %v6830_v58 = vld [vmem:[%s8684_s0 + $0x340] sm:$0xff]  ;;  %v6041_v20 = vld [vmem:[%s8685_s1 + $0x138] sm:$0xff]   ;;  %v6042_v25 = vld [vmem:[%s8685_s1 + $0x1f0] sm:$0xff]  }
  0x37   :  { %v82_v12 = vpack.c.bf16 %v6830_v58, %v6822_v50 }
  0x39   :  { %5445 = vmatpush3.bf16.msra.mxu0 %v6029_v60  ;;  %v4867_v60 = vld [vmem:[%s8684_s0 + $0x3c0] sm:$0xff] }
  0x3a   :  { %5446 = vmatprep.subr.bf16.mxu0 %v6034_v28  ;;  %v131_v21 = vpack.c.bf16 %v4868_v0, %v4867_v60  ;;  %v6863_v28 = vld [vmem:[%s8684_s0 + $0x2a0] sm:$0xff] }
  0x3b   :  { %888 = vmatmul.mubr.bf16.gmra.mrb[12].mxu0 %v53_v31  ;;  %v6035_v31 = vld [vmem:[%s8685_s1 + $0x130] sm:$0xff]  }
  0x3c   :  { %985 = vmatmul.mubr.bf16.gmra.mrb[12].mxu1 %v102_v34  ;;  %895 = vmatprep.mubr.bf16.mxu0 %v79_v35  ;;  %v81_v34 = vpack.c.bf16 %v6765_v18, %v6760_v17  ;;  %v6036_v35 = vld [vmem:[%s8685_s1 + $0x1e0] sm:$0xff]  }
  0x3d   :  { %992 = vmatprep.mubr.bf16.mxu1 %v128_v37  ;;  %5447 = vmatpush3.bf16.msra.mxu0 %v6035_v31  ;;  %v6037_v37 = vld [vmem:[%s8685_s1 + $0x1a0] sm:$0xff]   ;;  %v6871_v31 = vld [vmem:[%s8684_s0 + $0x2b0] sm:$0xff] }
  0x3e   :  { %5506 = vmatprep.subr.bf16.mxu1 %v6036_v35  ;;  %5448 = vmatprep.subr.bf16.mxu0 %v6040_v6  ;;  %v4885_v35 = vld [vmem:[%s8684_s0 + $0x121] sm:$0xff]  ;;  %v4869_v6 = vld [vmem:[%s8684_s0 + $0x1b0] sm:$0xff] }
  0x3f   :  { %5507 = vmatpush3.bf16.msra.mxu1 %v6037_v37  ;;  %v6045_v37 = vld [vmem:[%s8685_s1 + $0x1b8] sm:$0xff]  }
  0x40   :  { %5508 = vmatprep.subr.bf16.mxu1 %v6038_v40  ;;  %v6046_v40 = vld [vmem:[%s8685_s1 + $0x200] sm:$0xff]  }
  0x41   :  { %5449 = vmatpush3.bf16.msra.mxu0 %v6041_v20  ;;  %v198_v20 = vpack.c.bf16 %v6522_v52, %v6483_v38  ;;  %v4889_v38 = vld [vmem:[%s8684_s0 + $0x161] sm:$0xff]  ;;  %v6048_v52 = vld [vmem:[%s8685_s1 + $0x210] sm:$0xff]  }
  0x42   :  { %5866 = vmatprep.subr.bf16.mxu0 %v6046_v40 }
  0x43   :  { %896 = vmatmul.mubr.bf16.gmra.mrb[16].mxu0 %v54_v63  ;;  %v6838_v63 = vld [vmem:[%s8684_s0 + $0x2a1] sm:$0xff]  ;;  %5509 = vmatpush3.bf16.msra.mxu1 %v6039_v51  ;;  %v57_v51 = vpack.c.bf16 %v6871_v31, %v6863_v28 }
  0x44   :  { %993 = vmatmul.mubr.bf16.gmra.mrb[16].mxu1 %v103_v1  ;;  %903 = vmatprep.mubr.bf16.mxu0 %v80_v2  ;;  %v253_v1 = vpack.c.bf16 %v6838_v63, %v6817_v49  ;;  %v56_v2 = vpack.c.bf16 %v6812_v44, %v6804_v39 }
  0x45   :  { %1000 = vmatprep.mubr.bf16.mxu1 %v129_v8  ;;  %v105_v8 = vpack.c.bf16 %v6817_v49, %v6779_v27  ;;  %5510 = vmatprep.subr.bf16.mxu1 %v6042_v25  ;;  %v6047_v25 = vld [vmem:[%s8685_s1 + $0x208] sm:$0xff]  }
  0x4b   :  { %904 = vmatmul.mubr.bf16.gmra.mrb[20].mxu0 %v55_v30  ;;  %v6043_v30 = vld [vmem:[%s8685_s1 + $0x1b0] sm:$0xff]  }
  0x4c   :  { %1001 = vmatmul.mubr.bf16.gmra.mrb[20].mxu1 %v104_v32  ;;  %911 = vmatprep.mubr.bf16.mxu0 %v81_v34  ;;  %v6876_v32 = vld [vmem:[%s8684_s0 + $0x2b1] sm:$0xff] }
  0x4d   :  { %1008 = vmatprep.mubr.bf16.mxu1 %v130_v36  ;;  %v6044_v34 = vld [vmem:[%s8685_s1 + $0x1f8] sm:$0xff]   ;;  %5511 = vmatpush3.bf16.msra.mxu1 %v6043_v30  ;;  %v106_v60 = vpack.c.bf16 %v6876_v32, %v6838_v63  ;;  %v224_v30 = vpack.c.bf16 %v6554_v61, %v6509_v47 }
  0x4e   :  { %v4886_v36 = vld [vmem:[%s8684_s0 + $0x131] sm:$0xff]  ;;  %5512 = vmatprep.subr.bf16.mxu1 %v6044_v34 }
  0x4f   :  { %v173_v0 = vpack.c.bf16 %v4886_v36, %v4885_v35  ;;  %v4871_v34 = vld [vmem:[%s8684_s0 + $0x1d0] sm:$0xff]  ;;  %v4872_v35 = vld [vmem:[%s8684_s0 + $0x1e0] sm:$0xff]  ;;  %v199_v36 = vpack.c.bf16 %v6572_v3, %v6527_v53 }
  0x50   :  { %v4890_v47 = vld [vmem:[%s8684_s0 + $0x171] sm:$0xff]  ;;  %v150_v61 = vpack.c.bf16 %v4872_v35, %v4871_v34  ;;  %v4891_v53 = vld [vmem:[%s8684_s0 + $0x181] sm:$0xff] }
  0x51   :  { %5513 = vmatpush3.bf16.msra.mxu1 %v6045_v37  ;;  %v175_v37 = vpack.c.bf16 %v4890_v47, %v4889_v38  ;;  %v4892_v3 = vld [vmem:[%s8684_s0 + $0x191] sm:$0xff]  ;;  %v227_v38 = vpack.c.bf16 %v6700_v45, %v6653_v26  ;;  %v202_v45 = vpack.c.bf16 %v6745_v13, %v6687_v41  ;;  %v203_v13 = vpack.c.bf16 %v6804_v39, %v6750_v14 }
  0x52   :  { %v6053_v35 = vld [vmem:[%s8685_s1 + $0x238] sm:$0xff]   ;;  %v4877_v47 = vld [vmem:[%s8684_s0 + $0x3f0] sm:$0xff] }
  0x53   :  { %912 = vmatmul.mubr.bf16.gmra.mrb[24].mxu0 %v56_v2  ;;  %v223_v2 = vpack.c.bf16 %v6504_v46, %v6468_v33  ;;  %v4888_v33 = vld [vmem:[%s8684_s0 + $0x151] sm:$0xff] }
  0x54   :  { %1009 = vmatmul.mubr.bf16.gmra.mrb[24].mxu1 %v105_v8  ;;  %919 = vmatprep.mubr.bf16.mxu0 %v82_v12  ;;  %v4870_v8 = vld [vmem:[%s8684_s0 + $0x1c0] sm:$0xff]  ;;  %v4898_v41 = vld [vmem:[%s8684_s0 + $0x3b1] sm:$0xff] }
  0x55   :  { %1016 = vmatprep.mubr.bf16.mxu1 %v131_v21  ;;  %v4887_v12 = vld [vmem:[%s8684_s0 + $0x141] sm:$0xff]  ;;  %v149_v46 = vpack.c.bf16 %v4870_v8, %v4869_v6  ;;  %v200_v6 = vpack.c.bf16 %v6635_v22, %v6577_v4  ;;  %v176_v8 = vpack.c.bf16 %v4892_v3, %v4891_v53  ;;  %v4881_v53 = vld [vmem:[%s8684_s0 + $0x430] sm:$0xff] }
  0x56   :  { %v174_v21 = vpack.c.bf16 %v4888_v33, %v4887_v12  ;;  %v6051_v12 = vld [vmem:[%s8685_s1 + $0x228] sm:$0xff]   ;;  %v4908_v4 = vld [vmem:[%s8684_s0 + $0x80] sm:$0xff]  ;;  %v4900_v14 = vld [vmem:[%s8684_s0 + $0x3d1] sm:$0xff] }
  0x57   :  { %v4893_v22 = vld [vmem:[%s8684_s0 + $0x361] sm:$0xff] }
  0x58   :  { %v4882_v3 = vld [vmem:[%s8684_s0 + $0x440] sm:$0xff] }
  0x59   :  { %v155_v39 = vpack.c.bf16 %v4882_v3, %v4881_v53 }
  0x5b   :  { %920 = vmatmul.mubr.bf16.gmra.mrb[28].mxu0 %v57_v51  ;;  %v225_v51 = vpack.c.bf16 %v6600_v10, %v6559_v62  ;;  %v4924_v62 = vld [vmem:[%s8684_s0 + $0x110] sm:$0xff]  ;;  %v6050_v10 = vld [vmem:[%s8685_s1 + $0x220] sm:$0xff]  }
  0x5c   :  { %1017 = vmatmul.mubr.bf16.gmra.mrb[28].mxu1 %v106_v60  ;;  %1057 = vmatprep.mubr.bf16.mxu0 %v173_v0  ;;  %v4873_v60 = vld [vmem:[%s8684_s0 + $0x1f0] sm:$0xff]  ;;  %v4874_v0 = vld [vmem:[%s8684_s0 + $0x200] sm:$0xff]  ;;  %v226_v33 = vpack.c.bf16 %v4924_v62, %v6605_v11 }
  0x5d   :  { %1154 = vmatprep.mubr.bf16.mxu1 %v223_v2  ;;  %v151_v2 = vpack.c.bf16 %v4874_v0, %v4873_v60  ;;  %v4894_v11 = vld [vmem:[%s8684_s0 + $0x371] sm:$0xff]  ;;  %v4897_v60 = vld [vmem:[%s8684_s0 + $0x3a1] sm:$0xff]  ;;  %v229_v0 = vpack.c.bf16 %v6822_v50, %v6765_v18  ;;  %v204_v50 = vpack.c.bf16 %v6863_v28, %v6812_v44 }
  0x5e   :  { %v177_v34 = vpack.c.bf16 %v4894_v11, %v4893_v22  ;;  %v4899_v62 = vld [vmem:[%s8684_s0 + $0x3c1] sm:$0xff]  ;;  %v4932_v18 = vld [vmem:[%s8684_s0 + $0x350] sm:$0xff] }
  0x63   :  { %1058 = vmatmul.mubr.bf16.vlgmr.msra.gmra.mrb[32].mxu0 %v149_v46  ;;  %v4875_v46 = vld [vmem:[%s8684_s0 + $0x210] sm:$0xff] }
  0x64   :  { %5867 = vmatpush3.bf16.msra.mxu0 %v6046_v40  ;;  %1155 = vmatmul.mubr.bf16.vlgmr.msra.gmra.mrb[32].mxu1 %v198_v20  ;;  %v6049_v40 = vld [vmem:[%s8685_s1 + $0x218] sm:$0xff]   ;;  %v4876_v20 = vld [vmem:[%s8684_s0 + $0x220] sm:$0xff] }
  0x65   :  { %1065 = vmatprep.mubr.bf16.mxu0 %v174_v21  ;;  %5868 = vmatprep.subr.bf16.mxu0 %v6047_v25  ;;  %v6052_v21 = vld [vmem:[%s8685_s1 + $0x230] sm:$0xff]  }
  0x66   :  { %1162 = vmatprep.mubr.bf16.mxu1 %v224_v30  ;;  %v201_v30 = vpack.c.bf16 %v4908_v4, %v6640_v23  ;;  %v4895_v23 = vld [vmem:[%s8684_s0 + $0x381] sm:$0xff] }
  0x68   :  { %5869 = vmatpush3.bf16.msra.mxu0 %v6047_v25  ;;  %v152_v25 = vpack.c.bf16 %v4876_v20, %v4875_v46 }
  0x69   :  { %5870 = vmatprep.subr.bf16.mxu0 %v6048_v52 }
  0x6b   :  { %1066 = vmatmul.mubr.bf16.gmra.mrb[36].mxu0 %v150_v61  ;;  %v4896_v61 = vld [vmem:[%s8684_s0 + $0x391] sm:$0xff] }
  0x6c   :  { %1163 = vmatmul.mubr.bf16.gmra.mrb[36].mxu1 %v199_v36  ;;  %1073 = vmatprep.mubr.bf16.mxu0 %v175_v37  ;;  %v178_v36 = vpack.c.bf16 %v4896_v61, %v4895_v23  ;;  %v228_v37 = vpack.c.bf16 %v6760_v17, %v6705_v48  ;;  %v179_v17 = vpack.c.bf16 %v4898_v41, %v4897_v60 }
  0x6d   :  { %1170 = vmatprep.mubr.bf16.mxu1 %v225_v51  ;;  %5871 = vmatpush3.bf16.msra.mxu0 %v6048_v52  ;;  %v4878_v52 = vld [vmem:[%s8684_s0 + $0x400] sm:$0xff] }
  0x6e   :  { %5872 = vmatprep.subr.bf16.mxu0 %v6049_v40  ;;  %v153_v26 = vpack.c.bf16 %v4878_v52, %v4877_v47  ;;  %v4880_v51 = vld [vmem:[%s8684_s0 + $0x420] sm:$0xff] }
  0x71   :  { %5873 = vmatpush3.bf16.msra.mxu0 %v6049_v40  ;;  %v4879_v40 = vld [vmem:[%s8684_s0 + $0x410] sm:$0xff] }
  0x72   :  { %5874 = vmatprep.subr.bf16.mxu0 %v6050_v10  ;;  %v154_v48 = vpack.c.bf16 %v4880_v51, %v4879_v40 }
  0x73   :  { %1074 = vmatmul.mubr.bf16.gmra.mrb[40].mxu0 %v151_v2  ;;  %v230_v2 = vpack.c.bf16 %v4932_v18, %v6830_v58 }
  0x74   :  { %1171 = vmatmul.mubr.bf16.gmra.mrb[40].mxu1 %v200_v6  ;;  %1081 = vmatprep.mubr.bf16.mxu0 %v176_v8  ;;  %v4883_v6 = vld [vmem:[%s8684_s0 + $0x450] sm:$0xff]  ;;  %v4884_v8 = vld [vmem:[%s8684_s0 + $0x460] sm:$0xff] }
  0x75   :  { %1178 = vmatprep.mubr.bf16.mxu1 %v226_v33  ;;  %5875 = vmatpush3.bf16.msra.mxu0 %v6050_v10  ;;  %v180_v10 = vpack.c.bf16 %v4900_v14, %v4899_v62  ;;  %v156_v44 = vpack.c.bf16 %v4884_v8, %v4883_v6 }
  0x76   :  { %5876 = vmatprep.subr.bf16.mxu0 %v6051_v12 }
  0x79   :  { %5877 = vmatpush3.bf16.msra.mxu0 %v6051_v12  ;;  %v4916_v12 = vld [vmem:[%s8684_s0 + $0x2c0] sm:$0xff] }
  0x7a   :  { %5878 = vmatprep.subr.bf16.mxu0 %v6052_v21  ;;  %v205_v28 = vpack.c.bf16 %v4916_v12, %v6871_v31 }
  0x7b   :  { %1082 = vmatmul.mubr.bf16.gmra.mrb[44].mxu0 %v152_v25 }
  0x7c   :  { %1179 = vmatmul.mubr.bf16.gmra.mrb[44].mxu1 %v201_v30  ;;  %1089 = vmatprep.mubr.bf16.mxu0 %v177_v34 }
  0x7d   :  { %1186 = vmatprep.mubr.bf16.mxu1 %v227_v38  ;;  %5879 = vmatpush3.bf16.msra.mxu0 %v6052_v21 }
  0x7e   :  { %5880 = vmatprep.subr.bf16.mxu0 %v6053_v35 }
  0x81   :  { %5881 = vmatpush3.bf16.msra.mxu0 %v6053_v35 }
  0x83   :  { %1090 = vmatmul.mubr.bf16.gmra.mrb[48].mxu0 %v153_v26 }
  0x84   :  { %1187 = vmatmul.mubr.bf16.gmra.mrb[48].mxu1 %v202_v45  ;;  %1097 = vmatprep.mubr.bf16.mxu0 %v178_v36 }
  0x85   :  { %1194 = vmatprep.mubr.bf16.mxu1 %v228_v37 }
  0x8b   :  { %1098 = vmatmul.mubr.bf16.gmra.mrb[52].mxu0 %v154_v48 }
  0x8c   :  { %1195 = vmatmul.mubr.bf16.gmra.mrb[52].mxu1 %v203_v13  ;;  %1105 = vmatprep.mubr.bf16.mxu0 %v179_v17 }
  0x8d   :  { %1202 = vmatprep.mubr.bf16.mxu1 %v229_v0 }
  0x93   :  { %1106 = vmatmul.mubr.bf16.gmra.mrb[56].mxu0 %v155_v39 }
  0x94   :  { %1203 = vmatmul.mubr.bf16.gmra.mrb[56].mxu1 %v204_v50  ;;  %1113 = vmatprep.mubr.bf16.mxu0 %v180_v10 }
  0x95   :  { %1210 = vmatprep.mubr.bf16.mxu1 %v230_v2 }
  0x9b   :  { %1114 = vmatmul.mubr.bf16.gmra.mrb[60].mxu0 %v156_v44 }
  0x9c   :  { %1211 = vmatmul.mubr.bf16.gmra.mrb[60].mxu1 %v205_v28  ;;  %5882 = vmatprep.mubr.bf16.mxu0 %v247_v56 }
  0x9d   :  { %14 = vsyncpa [#allocation4], 0  ;;  %v4940_v58 = vld [vmem:[%s8684_s0 + $0x81] sm:$0xff]  ;;  %vm1483_vm0 = vcmask 1040384   ;;  %vm1484_vm1 = vsmask.f32 256 }
  0x9e   :  { %v250_v31 = vpack.c.bf16 %v4940_v58, %v6645_v24  ;;  %v4948_v42 = vld [vmem:[%s8684_s0 + $0x2c1] sm:$0xff]  ;;  %vm7096_vm2 = vmand %vm1483_vm0, %vm1484_vm1  ;;  %vm1546_vm3 = vsmask.f32 7938  ;;  %vm2238_vm5 = vcmask 1042432   ;;  %vm2239_vm6 = vcmask 1046532  }
  0x9f   :  { %v254_v54 = vpack.c.bf16 %v4948_v42, %v6876_v32  ;;  %v6054_v12 = vld [vmem:[%s8688_s4 + $0x40] sm:$0xff]   ;;  %vm7103_vm4 = vmand %vm1483_vm0, %vm1546_vm3  ;;  %vm1833_vm8 = vcmask 1043456   ;;  %vm1963_vm10 = vsmask.f32 3328  ;;  %vm1964_vm11 = vsmask.f32 7440 }
  0xa0   :  { %v6055_v58 = vld [vmem:[%s8688_s4] sm:$0xff]   ;;  %5578 = vmatprep.subr.bf16.mxu1 %v6054_v12  ;;  %v1563_v12 = vld [vmem:[#allocation2 + $0x2c] sm:$0x1]  ;;  %vm7387_vm7 = vmor %vm2238_vm5, %vm2239_vm6 }
  0xa1   :  { %5579 = vmatpush3.bf16.msra.mxu1 %v6055_v58  ;;  %vm7494_vm9 = vmand %vm1833_vm8, %vm1546_vm3 }
  0xa2   :  { %vm7540_vm12 = vmor %vm1963_vm10, %vm1964_vm11 }
  0xa3   :  { %5883 = vmatmul.mubr.bf16.vlgmr.msra.gmra.mrb[64].mxu0 %v248_v7 }
  0xa4   :  { %5886 = vmatprep.mubr.bf16.mxu0 %v249_v19 }
  0xab   :  { %5887 = vmatmul.mubr.bf16.gmra.mrb[68].mxu0 %v250_v31 }
  0xac   :  { %5890 = vmatprep.mubr.bf16.mxu0 %v251_v59 }
  0xb3   :  { %5891 = vmatmul.mubr.bf16.gmra.mrb[72].mxu0 %v252_v29 }
  0xb4   :  { %5894 = vmatprep.mubr.bf16.mxu0 %v253_v1 }
  0xbb   :  { %5895 = vmatmul.mubr.bf16.gmra.mrb[76].mxu0 %v254_v54 }
  0xf6   :  { %v5322_v55 = vpop.f32.mrb[0].mxu0 }
  0xf7   :  { %v5386_v56 = vpop.f32.mrb[0].mxu1  ;;  %v5323_v5 = vpop.f32.mrb[1].mxu0 }
  0xf8   :  { %v5324_v7 = vadd.f32 %v5323_v5, %v5322_v55  ;;  %v5387_v9 = vpop.f32.mrb[1].mxu1  ;;  %v5325_v15 = vpop.f32.mrb[2].mxu0 }
  0xf9   :  { %v5388_v19 = vadd.f32 %v5387_v9, %v5386_v56  ;;  %v5389_v24 = vpop.f32.mrb[2].mxu1  ;;  %v5326_v43 = vpop.f32.mrb[3].mxu0  ;;  %v1495_v56 = vld [vmem:[#allocation2 + $0x18] sm:$0x1] }
  0xfa   :  { %v5327_v57 = vadd.f32 %v5326_v43, %v5325_v15  ;;  %v5390_v59 = vpop.f32.mrb[3].mxu1  ;;  %v1496_v15 = vsel %vm7096_vm2, 0, %v1495_v56 }
  0xfb   :  { %v7074_v16 = vadd.f32 %v5388_v19, %v5324_v7  ;;  %v5391_v27 = vadd.f32 %v5390_v59, %v5389_v24  ;;  %v1557_v24 = vld [vmem:[#allocation2 + $0x1c] sm:$0x1]  ;;  %1497 = vst [vmem:[#allocation2 + $0x18] sm:$0x1] %v1496_v15 }
  0xfc   :  { %v1558_v59 = vsel %vm7103_vm4, 0, %v1557_v24 }
  0xfd   :  { %v7076_v29 = vadd.f32 %v5391_v27, %v5327_v57  ;;  %v1489_v27 = vld [vmem:[#allocation2 + $0x8] sm:$0x1]  ;;  %1559 = vst [vmem:[#allocation2 + $0x1c] sm:$0x1] %v1558_v59  ;;  %v1566_v59 = vld [vmem:[#allocation2 + $0x34] sm:$0x1] }
  0xfe   :  { %v5328_v49 = vpop.f32.mrb[4].mxu0 }
  0xff   :  { %v5392_v63 = vpop.f32.mrb[4].mxu1  ;;  %v5329_v1 = vpop.f32.mrb[5].mxu0 }
 0x100   :  { %v5330_v32 = vadd.f32 %v5329_v1, %v5328_v49  ;;  %v5393_v33 = vpop.f32.mrb[5].mxu1  ;;  %v5331_v46 = vpop.f32.mrb[6].mxu0  ;;  %v1551_v49 = vld [vmem:[#allocation2 + $0xc] sm:$0x1] }
 0x101   :  { %v5394_v20 = vadd.f32 %v5393_v33, %v5392_v63  ;;  %v5395_v4 = vpop.f32.mrb[6].mxu1  ;;  %v5332_v22 = vpop.f32.mrb[7].mxu0  ;;  %v1552_v33 = vsel %vm7103_vm4, 0, %v1551_v49 }
 0x102   :  { %v5333_v11 = vadd.f32 %v5332_v22, %v5331_v46  ;;  %v5396_v21 = vpop.f32.mrb[7].mxu1  ;;  %v1498_v46 = vld [vmem:[#allocation2 + $0x20] sm:$0x1]  ;;  %1553 = vst [vmem:[#allocation2 + $0xc] sm:$0x1] %v1552_v33 }
 0x103   :  { %v7078_v25 = vadd.f32 %v5394_v20, %v5330_v32  ;;  %v5397_v30 = vadd.f32 %v5396_v21, %v5395_v4  ;;  %v1490_v32 = vsel %vm7096_vm2, 0, %v1489_v27  ;;  %v1560_v20 = vld [vmem:[#allocation2 + $0x24] sm:$0x1]  ;;  %v1499_v4 = vsel %vm7096_vm2, 0, %v1498_v46  ;;  %v1554_v21 = vld [vmem:[#allocation2 + $0x14] sm:$0x1] }
 0x104   :  { %1491 = vst [vmem:[#allocation2 + $0x8] sm:$0x1] %v1490_v32  ;;  %v1561_v22 = vsel %vm7103_vm4, 0, %v1560_v20  ;;  %1500 = vst [vmem:[#allocation2 + $0x20] sm:$0x1] %v1499_v4  ;;  %v1567_v32 = vsel %vm7103_vm4, 0, %v1566_v59 }
 0x105   :  { %v7080_v34 = vadd.f32 %v5397_v30, %v5333_v11  ;;  %v1492_v11 = vld [vmem:[#allocation2 + $0x10] sm:$0x1]  ;;  %1562 = vst [vmem:[#allocation2 + $0x24] sm:$0x1] %v1561_v22  ;;  %1568 = vst [vmem:[#allocation2 + $0x34] sm:$0x1] %v1567_v32 }
 0x106   :  { %v5334_v35 = vpop.f32.mrb[8].mxu0  ;;  %v1525_v20 = vld [vmem:[#allocation2 + $0x68] sm:$0x1] }
 0x107   :  { %v5398_v38 = vpop.f32.mrb[8].mxu1  ;;  %v5335_v47 = vpop.f32.mrb[9].mxu0 }
 0x108   :  { %v5336_v52 = vadd.f32 %v5335_v47, %v5334_v35  ;;  %v5399_v23 = vpop.f32.mrb[9].mxu1  ;;  %v5337_v61 = vpop.f32.mrb[10].mxu0  ;;  %v1493_v35 = vsel %vm7096_vm2, 0, %v1492_v11  ;;  %v6056_v47 = vld [vmem:[%s8688_s4 + $0x48] sm:$0xff]   ;;  %v1526_v11 = vsel %vm7096_vm2, 0, %v1525_v20 }
 0x109   :  { %v5400_v26 = vadd.f32 %v5399_v23, %v5398_v38  ;;  %v5401_v45 = vpop.f32.mrb[10].mxu1  ;;  %v5338_v36 = vpop.f32.mrb[11].mxu0  ;;  %v1555_v38 = vsel %vm7103_vm4, 0, %v1554_v21  ;;  %1494 = vst [vmem:[#allocation2 + $0x10] sm:$0x1] %v1493_v35  ;;  %5580 = vmatprep.subr.bf16.mxu1 %v6056_v47 }
 0x10a   :  { %v5339_v37 = vadd.f32 %v5338_v36, %v5337_v61  ;;  %v5402_v40 = vpop.f32.mrb[11].mxu1  ;;  %1556 = vst [vmem:[#allocation2 + $0x14] sm:$0x1] %v1555_v38  ;;  %v1587_v21 = vld [vmem:[#allocation2 + $0x6c] sm:$0x1] }
 0x10b   :  { %v7082_v51 = vadd.f32 %v5400_v26, %v5336_v52  ;;  %v5403_v60 = vadd.f32 %v5402_v40, %v5401_v45  ;;  %v6057_v52 = vld [vmem:[%s8688_s4 + $0x8] sm:$0xff]   ;;  %v6062_v45 = vld [vmem:[%s8688_s4 + $0xc0] sm:$0xff]   ;;  %1527 = vst [vmem:[#allocation2 + $0x68] sm:$0x1] %v1526_v11  ;;  %v1588_v35 = vsel %vm7103_vm4, 0, %v1587_v21 }
 0x10c   :  { %5581 = vmatpush3.bf16.msra.mxu1 %v6057_v52  ;;  %5642 = vmatprep.subr.bf16.mxu0 %v6062_v45  ;;  %v1519_v38 = vld [vmem:[#allocation2 + $0x58] sm:$0x1]  ;;  %v1581_v47 = vld [vmem:[#allocation2 + $0x5c] sm:$0x1]  ;;  %v6063_v52 = vld [vmem:[%s8688_s4 + $0x80] sm:$0xff]  }
 0x10d   :  { %v7084_v41 = vadd.f32 %v5403_v60, %v5339_v37  ;;  %v1507_v60 = vld [vmem:[#allocation2 + $0x38] sm:$0x1]  ;;  %1589 = vst [vmem:[#allocation2 + $0x6c] sm:$0x1] %v1588_v35  ;;  %v6059_v45 = vld [vmem:[%s8688_s4 + $0x10] sm:$0xff]   ;;  %5643 = vmatpush3.bf16.msra.mxu0 %v6063_v52 }
 0x10e   :  { %v5340_v48 = vpop.f32.mrb[12].mxu0  ;;  %v1522_v21 = vld [vmem:[#allocation2 + $0x60] sm:$0x1]  ;;  %v1584_v35 = vld [vmem:[#allocation2 + $0x64] sm:$0x1] }
 0x10f   :  { %v5404_v13 = vpop.f32.mrb[12].mxu1  ;;  %v5341_v17 = vpop.f32.mrb[13].mxu0 }
 0x110   :  { %v5342_v0 = vadd.f32 %v5341_v17, %v5340_v48  ;;  %v5405_v53 = vpop.f32.mrb[13].mxu1  ;;  %v5343_v3 = vpop.f32.mrb[14].mxu0  ;;  %v1569_v48 = vld [vmem:[#allocation2 + $0x3c] sm:$0x1] }
 0x111   :  { %v5406_v62 = vadd.f32 %v5405_v53, %v5404_v13  ;;  %v5407_v14 = vpop.f32.mrb[14].mxu1  ;;  %v5344_v18 = vpop.f32.mrb[15].mxu0  ;;  %v1508_v53 = vsel %vm7096_vm2, 0, %v1507_v60 }
 0x112   :  { %v5345_v39 = vadd.f32 %v5344_v18, %v5343_v3  ;;  %v5408_v50 = vpop.f32.mrb[15].mxu1  ;;  %v1570_v3 = vsel %vm7103_vm4, 0, %v1569_v48  ;;  %1509 = vst [vmem:[#allocation2 + $0x38] sm:$0x1] %v1508_v53  ;;  %v1501_v18 = vld [vmem:[#allocation2 + $0x28] sm:$0x1] }
 0x113   :  { %v7086_v10 = vadd.f32 %v5406_v62, %v5342_v0  ;;  %v5409_v2 = vadd.f32 %v5408_v50, %v5407_v14  ;;  %1571 = vst [vmem:[#allocation2 + $0x3c] sm:$0x1] %v1570_v3 }
 0x115   :  { %v7088_v6 = vadd.f32 %v5409_v2, %v5345_v39  ;;  %v6058_v39 = vld [vmem:[%s8688_s4 + $0x50] sm:$0xff]  }
 0x116   :  { %v5346_v8 = vpop.f32.mrb[16].mxu0  ;;  %5582 = vmatprep.subr.bf16.mxu1 %v6058_v39  ;;  %v6060_v39 = vld [vmem:[%s8688_s4 + $0x58] sm:$0xff]  }
 0x117   :  { %v5410_v44 = vpop.f32.mrb[16].mxu1  ;;  %v5347_v28 = vpop.f32.mrb[17].mxu0  ;;  %5583 = vmatpush3.bf16.msra.mxu1 %v6059_v45 }
 0x118   :  { %v5348_v31 = vadd.f32 %v5347_v28, %v5346_v8  ;;  %v5411_v42 = vpop.f32.mrb[17].mxu1  ;;  %v5349_v54 = vpop.f32.mrb[18].mxu0  ;;  %v1502_v8 = vsel %vm7096_vm2, 0, %v1501_v18  ;;  %v1564_v28 = vsel %vm7103_vm4, 0, %v1563_v12  ;;  %v6061_v12 = vld [vmem:[%s8688_s4 + $0x18] sm:$0xff]   ;;  %5584 = vmatprep.subr.bf16.mxu1 %v6060_v39 }
 0x119   :  { %v5412_v5 = vadd.f32 %v5411_v42, %v5410_v44  ;;  %v5413_v7 = vpop.f32.mrb[18].mxu1  ;;  %v5350_v9 = vpop.f32.mrb[19].mxu0  ;;  %1503 = vst [vmem:[#allocation2 + $0x28] sm:$0x1] %v1502_v8  ;;  %1565 = vst [vmem:[#allocation2 + $0x2c] sm:$0x1] %v1564_v28 }
 0x11a   :  { %v5351_v43 = vadd.f32 %v5350_v9, %v5349_v54  ;;  %v5414_v57 = vpop.f32.mrb[19].mxu1  ;;  %v1572_v42 = vld [vmem:[#allocation2 + $0x44] sm:$0x1]  ;;  %v1504_v9 = vld [vmem:[#allocation2 + $0x30] sm:$0x1] }
 0x11b   :  { %v7109_v63 = vadd.f32 %v5412_v5, %v5348_v31  ;;  %v5415_v1 = vadd.f32 %v5414_v57, %v5413_v7  ;;  %v1510_v31 = vld [vmem:[#allocation2 + $0x40] sm:$0x1]  ;;  %v1573_v7 = vsel %vm7103_vm4, 0, %v1572_v42  ;;  %v1505_v57 = vsel %vm7096_vm2, 0, %v1504_v9  ;;  %v6068_v28 = vld [vmem:[%s8688_s4 + $0xd0] sm:$0xff]   ;;  %5585 = vmatpush3.bf16.msra.mxu1 %v6061_v12 }
 0x11c   :  { %v1511_v5 = vsel %vm7096_vm2, 0, %v1510_v31  ;;  %1574 = vst [vmem:[#allocation2 + $0x44] sm:$0x1] %v1573_v7  ;;  %1506 = vst [vmem:[#allocation2 + $0x30] sm:$0x1] %v1505_v57  ;;  %v6312_v7 = vmov 0  }
 0x11d   :  { %v7119_v30 = vadd.f32 %v5415_v1, %v5351_v43  ;;  %1512 = vst [vmem:[#allocation2 + $0x40] sm:$0x1] %v1511_v5  ;;  %v6070_v5 = vld [vmem:[%s8688_s4 + $0xd8] sm:$0xff]   ;;  %1474 = vst [vmem:[#allocation2] sm:$0xf] %v6312_v7 }
 0x11e   :  { %v5352_v23 = vpop.f32.mrb[20].mxu0  ;;  %1475 = vst [vmem:[#allocation2 + $0x4] sm:$0x1] %v6312_v7  ;;  %1476 = vst [vmem:[#allocation2 + $0x50] sm:$0xf] %v6312_v7 }
 0x11f   :  { %v5416_v61 = vpop.f32.mrb[20].mxu1  ;;  %v5353_v26 = vpop.f32.mrb[21].mxu0  ;;  %1477 = vst [vmem:[#allocation2 + $0x54] sm:$0x1] %v6312_v7  ;;  %1479 = vst [vmem:[#allocation2 + $0x48] sm:$0xf] %v6312_v7 }
 0x120   :  { %v5354_v36 = vadd.f32 %v5353_v26, %v5352_v23  ;;  %v5417_v37 = vpop.f32.mrb[21].mxu1  ;;  %v5355_v40 = vpop.f32.mrb[22].mxu0  ;;  %v1582_v26 = vsel %vm7103_vm4, 0, %v1581_v47  ;;  %1480 = vst [vmem:[#allocation2 + $0x4c] sm:$0x1] %v6312_v7 }
 0x121   :  { %v5418_v13 = vadd.f32 %v5417_v37, %v5416_v61  ;;  %v5419_v17 = vpop.f32.mrb[22].mxu1  ;;  %v5356_v0 = vpop.f32.mrb[23].mxu0  ;;  %v1520_v61 = vsel %vm7096_vm2, 0, %v1519_v38  ;;  %1583 = vst [vmem:[#allocation2 + $0x5c] sm:$0x1] %v1582_v26  ;;  %v6074_v38 = vld [vmem:[%s8688_s4 + $0xe0] sm:$0xff]  }
 0x122   :  { %v5357_v62 = vadd.f32 %v5356_v0, %v5355_v40  ;;  %v5420_v14 = vpop.f32.mrb[23].mxu1  ;;  %1521 = vst [vmem:[#allocation2 + $0x58] sm:$0x1] %v1520_v61  ;;  %v6065_v0 = vld [vmem:[%s8688_s4 + $0x88] sm:$0xff]   ;;  %1481 = vst [vmem:[#allocation2 + $0x98] sm:$0xf] %v6312_v7 }
 0x123   :  { %v7141_v50 = vadd.f32 %v5418_v13, %v5354_v36  ;;  %v5421_v2 = vadd.f32 %v5420_v14, %v5419_v17  ;;  %v6064_v17 = vld [vmem:[%s8688_s4 + $0xc8] sm:$0xff]   ;;  %1482 = vst [vmem:[#allocation2 + $0x9c] sm:$0x1] %v6312_v7  ;;  %v1590_v57 = vld [vmem:[#allocation2 + $0x74] sm:$0x1]  ;;  %v1523_v61 = vsel %vm7096_vm2, 0, %v1522_v21 }
 0x124   :  { %5644 = vmatprep.subr.bf16.mxu0 %v6064_v17  ;;  %v1591_v32 = vsel %vm7103_vm4, 0, %v1590_v57  ;;  %v6075_v26 = vld [vmem:[%s8688_s4 + $0xa0] sm:$0xff]   ;;  %1524 = vst [vmem:[#allocation2 + $0x60] sm:$0x1] %v1523_v61  ;;  %v6073_v21 = vld [vmem:[%s8688_s4 + $0x28] sm:$0xff]  }
 0x125   :  { %v7145_v44 = vadd.f32 %v5421_v2, %v5357_v62  ;;  %5645 = vmatpush3.bf16.msra.mxu0 %v6065_v0  ;;  %1592 = vst [vmem:[#allocation2 + $0x74] sm:$0x1] %v1591_v32 }
 0x126   :  { %v5358_v58 = vpop.f32.mrb[24].mxu0  ;;  %5646 = vmatprep.subr.bf16.mxu0 %v6068_v28 }
 0x127   :  { %v5422_v54 = vpop.f32.mrb[24].mxu1  ;;  %v5359_v56 = vpop.f32.mrb[25].mxu0 }
 0x128   :  { %v5360_v15 = vadd.f32 %v5359_v56, %v5358_v58  ;;  %v5423_v24 = vpop.f32.mrb[25].mxu1  ;;  %v5361_v43 = vpop.f32.mrb[26].mxu0  ;;  %v6069_v58 = vld [vmem:[%s8688_s4 + $0x90] sm:$0xff]  }
 0x129   :  { %v5424_v27 = vadd.f32 %v5423_v24, %v5422_v54  ;;  %v5425_v49 = vpop.f32.mrb[26].mxu1  ;;  %v5362_v1 = vpop.f32.mrb[27].mxu0  ;;  %5647 = vmatpush3.bf16.msra.mxu0 %v6069_v58 }
 0x12a   :  { %v5363_v33 = vadd.f32 %v5362_v1, %v5361_v43  ;;  %v5426_v46 = vpop.f32.mrb[27].mxu1  ;;  %v1528_v43 = vld [vmem:[#allocation2 + $0x70] sm:$0x1]  ;;  %5648 = vmatprep.subr.bf16.mxu0 %v6070_v5  ;;  %v6066_v5 = vld [vmem:[%s8688_s4 + $0x60] sm:$0xff]  }
 0x12b   :  { %v7157_v4 = vadd.f32 %v5424_v27, %v5360_v15  ;;  %v5427_v22 = vadd.f32 %v5426_v46, %v5425_v49  ;;  %v1529_v1 = vsel %vm7096_vm2, 0, %v1528_v43  ;;  %5586 = vmatprep.subr.bf16.mxu1 %v6066_v5 }
 0x12c   :  { %1530 = vst [vmem:[#allocation2 + $0x70] sm:$0x1] %v1529_v1  ;;  %v6077_v1 = vld [vmem:[%s8688_s4 + $0xa8] sm:$0xff]  }
 0x12d   :  { %v7166_v23 = vadd.f32 %v5427_v22, %v5363_v33  ;;  %v6071_v33 = vld [vmem:[%s8688_s4 + $0x98] sm:$0xff]  }
 0x12e   :  { %v5364_v36 = vpop.f32.mrb[28].mxu0  ;;  %5649 = vmatpush3.bf16.msra.mxu0 %v6071_v33 }
 0x12f   :  { %v5428_v37 = vpop.f32.mrb[28].mxu1  ;;  %v5365_v40 = vpop.f32.mrb[29].mxu0  ;;  %5650 = vmatprep.subr.bf16.mxu0 %v6074_v38 }
 0x130   :  { %v5366_v60 = vadd.f32 %v5365_v40, %v5364_v36  ;;  %v5429_v48 = vpop.f32.mrb[29].mxu1  ;;  %v5367_v13 = vpop.f32.mrb[30].mxu0 }
 0x131   :  { %v5430_v53 = vadd.f32 %v5429_v48, %v5428_v37  ;;  %v5431_v3 = vpop.f32.mrb[30].mxu1  ;;  %v5368_v62 = vpop.f32.mrb[31].mxu0  ;;  %v1548_v37 = vld [vmem:[#allocation2 + $0x4] sm:$0x1]  ;;  %v6076_v48 = vld [vmem:[%s8688_s4 + $0xe8] sm:$0xff]  }
 0x132   :  { %v5369_v14 = vadd.f32 %v5368_v62, %v5367_v13  ;;  %v5432_v18 = vpop.f32.mrb[31].mxu1  ;;  %5651 = vmatpush3.bf16.msra.mxu0 %v6075_v26  ;;  %v1549_v13 = vsel %vm7103_vm4, 0, %v1548_v37  ;;  %v1537_v62 = vld [vmem:[#allocation2 + $0x88] sm:$0x1] }
 0x133   :  { %v7184_v2 = vadd.f32 %v5430_v53, %v5366_v60  ;;  %v5433_v8 = vadd.f32 %v5432_v18, %v5431_v3  ;;  %1550 = vst [vmem:[#allocation2 + $0x4] sm:$0x1] %v1549_v13  ;;  %5652 = vmatprep.subr.bf16.mxu0 %v6076_v48  ;;  %v6078_v48 = vld [vmem:[%s8688_s4 + $0x70] sm:$0xff]  }
 0x135   :  { %v7195_v31 = vadd.f32 %v5433_v8, %v5369_v14  ;;  %v1599_v14 = vld [vmem:[#allocation2 + $0x8c] sm:$0x1] }
 0x136   :  { %v5450_v42 = vpop.f32.mrb[32].mxu0  ;;  %5653 = vmatpush3.bf16.msra.mxu0 %v6077_v1 }
 0x137   :  { %v5451_v54 = vpop.f32.mrb[33].mxu0  ;;  %v5514_v56 = vpop.f32.mrb[32].mxu1 }
 0x138   :  { %v5452_v9 = vadd.f32 %v5451_v54, %v5450_v42  ;;  %v5453_v15 = vpop.f32.mrb[34].mxu0  ;;  %v5515_v24 = vpop.f32.mrb[33].mxu1  ;;  %v1538_v42 = vsel %vm7096_vm2, 0, %v1537_v62  ;;  %v1600_v54 = vsel %vm7103_vm4, 0, %v1599_v14  ;;  %v6084_v14 = vld [vmem:[%s8688_s4 + $0x78] sm:$0xff]  }
 0x139   :  { %v5454_v59 = vpop.f32.mrb[35].mxu0  ;;  %v5516_v27 = vadd.f32 %v5515_v24, %v5514_v56  ;;  %v5517_v49 = vpop.f32.mrb[34].mxu1  ;;  %v1531_v56 = vld [vmem:[#allocation2 + $0x78] sm:$0x1]  ;;  %1539 = vst [vmem:[#allocation2 + $0x88] sm:$0x1] %v1538_v42 }
 0x13a   :  { %v1060_v46 = vadd.f32 %v5452_v9, %v7074_v16  ;;  %v5455_v20 = vadd.f32 %v5454_v59, %v5453_v15  ;;  %v5518_v22 = vpop.f32.mrb[35].mxu1  ;;  %v1585_v16 = vsel %vm7103_vm4, 0, %v1584_v35  ;;  %1601 = vst [vmem:[#allocation2 + $0x8c] sm:$0x1] %v1600_v54  ;;  %v1532_v9 = vsel %vm7096_vm2, 0, %v1531_v56  ;;  %v6067_v24 = vld [vmem:[%s8688_s4 + $0x20] sm:$0xff]  }
 0x13b   :  { %v5519_v11 = vadd.f32 %v5518_v22, %v5517_v49  ;;  %1586 = vst [vmem:[#allocation2 + $0x64] sm:$0x1] %v1585_v16  ;;  %v1540_v15 = vld [vmem:[#allocation2 + $0x90] sm:$0x1]  ;;  %1533 = vst [vmem:[#allocation2 + $0x78] sm:$0x1] %v1532_v9  ;;  %5587 = vmatpush3.bf16.msra.mxu1 %v6067_v24 }
 0x13c   :  { %v1063_v47 = vadd.f32 %v5455_v20, %v7076_v29  ;;  %v7212_v52 = vadd.f32 %v5516_v27, %v1060_v46  ;;  %v1486_v29 = vld [vmem:[#allocation2] sm:$0x1]  ;;  %v1541_v27 = vsel %vm7096_vm2, 0, %v1540_v15  ;;  %v1602_v49 = vld [vmem:[#allocation2 + $0x94] sm:$0x1]  ;;  %v6072_v20 = vld [vmem:[%s8688_s4 + $0x68] sm:$0xff]  }
 0x13d   :  { %v1487_v17 = vsel %vm7096_vm2, 0, %v1486_v29  ;;  %1542 = vst [vmem:[#allocation2 + $0x90] sm:$0x1] %v1541_v27  ;;  %v1603_v46 = vsel %vm7103_vm4, 0, %v1602_v49  ;;  %v6081_v35 = vld [vmem:[%s8688_s4 + $0xb0] sm:$0xff]   ;;  %5588 = vmatprep.subr.bf16.mxu1 %v6072_v20  ;;  %v6082_v16 = vld [vmem:[%s8688_s4 + $0xf8] sm:$0xff]  }
 0x13e   :  { %v5456_v45 = vpop.f32.mrb[36].mxu0  ;;  %v7221_v36 = vadd.f32 %v5519_v11, %v1063_v47  ;;  %1488 = vst [vmem:[#allocation2] sm:$0x1] %v1487_v17  ;;  %1604 = vst [vmem:[#allocation2 + $0x94] sm:$0x1] %v1603_v46  ;;  %v6079_v17 = vld [vmem:[%s8688_s4 + $0x30] sm:$0xff]  }
 0x13f   :  { %v5457_v40 = vpop.f32.mrb[37].mxu0  ;;  %v5520_v60 = vpop.f32.mrb[36].mxu1  ;;  %5589 = vmatpush3.bf16.msra.mxu1 %v6073_v21  ;;  %v6086_v56 = vld [vmem:[%s8688_s4 + $0x38] sm:$0xff]  }
 0x140   :  { %v5458_v0 = vadd.f32 %v5457_v40, %v5456_v45  ;;  %v5459_v53 = vpop.f32.mrb[38].mxu0  ;;  %v5521_v3 = vpop.f32.mrb[37].mxu1  ;;  %5590 = vmatprep.subr.bf16.mxu1 %v6078_v48 }
 0x141   :  { %v5460_v18 = vpop.f32.mrb[39].mxu0  ;;  %v5522_v39 = vadd.f32 %v5521_v3, %v5520_v60  ;;  %v5523_v8 = vpop.f32.mrb[38].mxu1 }
 0x142   :  { %v1068_v12 = vadd.f32 %v5458_v0, %v7078_v25  ;;  %v5461_v28 = vadd.f32 %v5460_v18, %v5459_v53  ;;  %v5524_v58 = vpop.f32.mrb[39].mxu1  ;;  %v1593_v25 = vld [vmem:[#allocation2 + $0x7c] sm:$0x1] }
 0x143   :  { %v5525_v7 = vadd.f32 %v5524_v58, %v5523_v8  ;;  %v1594_v59 = vsel %vm7103_vm4, 0, %v1593_v25  ;;  %v6083_v0 = vld [vmem:[%s8688_s4 + $0xb8] sm:$0xff]   ;;  %5591 = vmatpush3.bf16.msra.mxu1 %v6079_v17  ;;  %v1534_v8 = vld [vmem:[#allocation2 + $0x80] sm:$0x1] }
 0x144   :  { %v1071_v43 = vadd.f32 %v5461_v28, %v7080_v34  ;;  %v7244_v57 = vadd.f32 %v5522_v39, %v1068_v12  ;;  %1595 = vst [vmem:[#allocation2 + $0x7c] sm:$0x1] %v1594_v59  ;;  %v6080_v34 = vld [vmem:[%s8688_s4 + $0xf0] sm:$0xff]   ;;  %v1596_v12 = vld [vmem:[#allocation2 + $0x84] sm:$0x1]  ;;  %v1535_v42 = vsel %vm7096_vm2, 0, %v1534_v8  ;;  %5592 = vmatprep.subr.bf16.mxu1 %v6084_v14 }
 0x145   :  { %5654 = vmatprep.subr.bf16.mxu0 %v6080_v34  ;;  %v1597_v54 = vsel %vm7103_vm4, 0, %v1596_v12  ;;  %1536 = vst [vmem:[#allocation2 + $0x80] sm:$0x1] %v1535_v42 }
 0x146   :  { %v5462_v32 = vpop.f32.mrb[40].mxu0  ;;  %v7256_v33 = vadd.f32 %v5525_v7, %v1071_v43  ;;  %5655 = vmatpush3.bf16.msra.mxu0 %v6081_v35  ;;  %1598 = vst [vmem:[#allocation2 + $0x84] sm:$0x1] %v1597_v54 }
 0x147   :  { %v5463_v22 = vpop.f32.mrb[41].mxu0  ;;  %v5526_v11 = vpop.f32.mrb[40].mxu1  ;;  %5656 = vmatprep.subr.bf16.mxu0 %v6082_v16  ;;  %5593 = vmatpush3.bf16.msra.mxu1 %v6086_v56 }
 0x148   :  { %v5464_v38 = vadd.f32 %v5463_v22, %v5462_v32  ;;  %v5465_v47 = vpop.f32.mrb[42].mxu0  ;;  %v5527_v61 = vpop.f32.mrb[41].mxu1 }
 0x149   :  { %v5466_v26 = vpop.f32.mrb[43].mxu0  ;;  %v5528_v45 = vadd.f32 %v5527_v61, %v5526_v11  ;;  %v5529_v37 = vpop.f32.mrb[42].mxu1 }
 0x14a   :  { %v1076_v29 = vadd.f32 %v5464_v38, %v7082_v51  ;;  %v5467_v40 = vadd.f32 %v5466_v26, %v5465_v47  ;;  %v5530_v60 = vpop.f32.mrb[43].mxu1  ;;  %5657 = vmatpush3.bf16.msra.mxu0 %v6083_v0 }
 0x14b   :  { %v5531_v13 = vadd.f32 %v5530_v60, %v5529_v37 }
 0x14c   :  { %v1079_v53 = vadd.f32 %v5467_v40, %v7084_v41  ;;  %v7283_v3 = vadd.f32 %v5528_v45, %v1076_v29 }
 0x14e   :  { %v5468_v51 = vpop.f32.mrb[44].mxu0  ;;  %v7285_v62 = vadd.f32 %v5531_v13, %v1079_v53  ;;  %v1516_v53 = vld [vmem:[#allocation2 + $0x50] sm:$0x1] }
 0x14f   :  { %v5469_v18 = vpop.f32.mrb[45].mxu0  ;;  %v5532_v39 = vpop.f32.mrb[44].mxu1 }
 0x150   :  { %v5470_v28 = vadd.f32 %v5469_v18, %v5468_v51  ;;  %v5471_v58 = vpop.f32.mrb[46].mxu0  ;;  %v5533_v41 = vpop.f32.mrb[45].mxu1  ;;  %v1578_v51 = vld [vmem:[#allocation2 + $0x54] sm:$0x1] }
 0x151   :  { %v5472_v5 = vpop.f32.mrb[47].mxu0  ;;  %v5534_v7 = vadd.f32 %v5533_v41, %v5532_v39  ;;  %v5535_v9 = vpop.f32.mrb[46].mxu1  ;;  %v1517_v39 = vsel %vm7096_vm2, 0, %v1516_v53  ;;  %v1579_v8 = vsel %vm7103_vm4, 0, %v1578_v51 }
 0x152   :  { %v1084_v25 = vadd.f32 %v5470_v28, %v7086_v10  ;;  %v5473_v15 = vadd.f32 %v5472_v5, %v5471_v58  ;;  %v5536_v24 = vpop.f32.mrb[47].mxu1  ;;  %1518 = vst [vmem:[#allocation2 + $0x50] sm:$0x1] %v1517_v39  ;;  %1580 = vst [vmem:[#allocation2 + $0x54] sm:$0x1] %v1579_v8 }
 0x153   :  { %v5537_v43 = vadd.f32 %v5536_v24, %v5535_v9  ;;  %v2190_v39 = vld [vmem:[#allocation2] sm:$0xe] }
 0x154   :  { %v1087_v59 = vadd.f32 %v5473_v15, %v7088_v6  ;;  %v7299_v27 = vadd.f32 %v5534_v7, %v1084_v25  ;;  %v6089_v6 = vld [vmem:[%s8688_s4 + $0x140] sm:$0xff]  }
 0x155   :  { %5706 = vmatprep.subr.bf16.mxu1 %v6089_v6 }
 0x156   :  { %v5474_v49 = vpop.f32.mrb[48].mxu0  ;;  %v7301_v1 = vadd.f32 %v5537_v43, %v1087_v59 }
 0x157   :  { %v5475_v34 = vpop.f32.mrb[49].mxu0  ;;  %v5538_v32 = vpop.f32.mrb[48].mxu1 }
 0x158   :  { %v5476_v46 = vadd.f32 %v5475_v34, %v5474_v49  ;;  %v5477_v20 = vpop.f32.mrb[50].mxu0  ;;  %v5539_v22 = vpop.f32.mrb[49].mxu1 }
 0x159   :  { %v5478_v11 = vpop.f32.mrb[51].mxu0  ;;  %v5540_v21 = vadd.f32 %v5539_v22, %v5538_v32  ;;  %v5541_v35 = vpop.f32.mrb[50].mxu1 }
 0x15a   :  { %v1092_v10 = vadd.f32 %v5476_v46, %v7109_v63  ;;  %v5479_v38 = vadd.f32 %v5478_v11, %v5477_v20  ;;  %v5542_v47 = vpop.f32.mrb[51].mxu1 }
 0x15b   :  { %v5543_v61 = vadd.f32 %v5542_v47, %v5541_v35 }
 0x15c   :  { %v1095_v16 = vadd.f32 %v5479_v38, %v7119_v30  ;;  %v7308_v26 = vadd.f32 %v5540_v21, %v1092_v10  ;;  %v6103_v10 = vld [vmem:[%s8688_s4 + $0x1c0] sm:$0xff]  }
 0x15d   :  { %5770 = vmatprep.subr.bf16.mxu0 %v6103_v10  ;;  %v5261_v10 = vld [vmem:[%s8684_s0 + $0x430] sm:$0xff] }
 0x15e   :  { %v5480_v45 = vpop.f32.mrb[52].mxu0  ;;  %v7310_v37 = vadd.f32 %v5543_v61, %v1095_v16 }
 0x15f   :  { %v5481_v29 = vpop.f32.mrb[53].mxu0  ;;  %v5544_v40 = vpop.f32.mrb[52].mxu1 }
 0x160   :  { %v5482_v60 = vadd.f32 %v5481_v29, %v5480_v45  ;;  %v5483_v48 = vpop.f32.mrb[54].mxu0  ;;  %v5545_v63 = vpop.f32.mrb[53].mxu1 }
 0x161   :  { %v5484_v13 = vpop.f32.mrb[55].mxu0  ;;  %v5546_v17 = vadd.f32 %v5545_v63, %v5544_v40  ;;  %v5547_v0 = vpop.f32.mrb[54].mxu1 }
 0x162   :  { %v1100_v14 = vadd.f32 %v5482_v60, %v7141_v50  ;;  %v5485_v18 = vadd.f32 %v5484_v13, %v5483_v48  ;;  %v5548_v30 = vpop.f32.mrb[55].mxu1  ;;  %v7338_v60 = vld [vmem:[%s8686_s2] ss:$0 sm:$0xff] }
 0x163   :  { %v5549_v12 = vadd.f32 %v5548_v30, %v5547_v0 }
 0x164   :  { %v1103_v28 = vadd.f32 %v5485_v18, %v7145_v44  ;;  %v7318_v58 = vadd.f32 %v5546_v17, %v1100_v14 }
 0x166   :  { %v5486_v41 = vpop.f32.mrb[56].mxu0  ;;  %v7320_v42 = vadd.f32 %v5549_v12, %v1103_v28  ;;  %v7361_v12 = vld [vmem:[#allocation2] sm:$0xf] }
 0x167   :  { %v5487_v54 = vpop.f32.mrb[57].mxu0  ;;  %v5550_v50 = vpop.f32.mrb[56].mxu1 }
 0x168   :  { %v5488_v56 = vadd.f32 %v5487_v54, %v5486_v41  ;;  %v5489_v5 = vpop.f32.mrb[58].mxu0  ;;  %v5551_v7 = vpop.f32.mrb[57].mxu1  ;;  %v1947_v41 = vld [vmem:[#allocation2 + $0x4] sm:$0x1] }
 0x169   :  { %v5490_v9 = vpop.f32.mrb[59].mxu0  ;;  %v5552_v25 = vadd.f32 %v5551_v7, %v5550_v50  ;;  %v5553_v15 = vpop.f32.mrb[58].mxu1 }
 0x16a   :  { %v1108_v24 = vadd.f32 %v5488_v56, %v7157_v4  ;;  %v5491_v43 = vadd.f32 %v5490_v9, %v5489_v5  ;;  %v5554_v59 = vpop.f32.mrb[59].mxu1  ;;  %v5055_v56 = vrot.slane %v2190_v39, 9 }
 0x16b   :  { %v5555_v49 = vadd.f32 %v5554_v59, %v5553_v15  ;;  %v1970_v59 = vshll.u32 %v7361_v12, 16 }
 0x16c   :  { %v1111_v44 = vadd.f32 %v5491_v43, %v7166_v23  ;;  %v7324_v34 = vadd.f32 %v5552_v25, %v1108_v24  ;;  %v1967_v25 = vshrl.u32 %v7361_v12, 16 }
 0x16e   :  { %v5492_v32 = vpop.f32.mrb[60].mxu0  ;;  %v7326_v46 = vadd.f32 %v5555_v49, %v1111_v44 }
 0x16f   :  { %v5493_v20 = vpop.f32.mrb[61].mxu0  ;;  %v5556_v22 = vpop.f32.mrb[60].mxu1 }
 0x170   :  { %v5494_v11 = vadd.f32 %v5493_v20, %v5492_v32  ;;  %v5495_v21 = vpop.f32.mrb[62].mxu0  ;;  %v5557_v35 = vpop.f32.mrb[61].mxu1  ;;  %v2243_v20 = vrot.slane %v1947_v41, 5 }
 0x171   :  { %v5496_v4 = vpop.f32.mrb[63].mxu0  ;;  %v5558_v38 = vadd.f32 %v5557_v35, %v5556_v22  ;;  %v5559_v47 = vpop.f32.mrb[62].mxu1 }
 0x172   :  { %v1116_v6 = vadd.f32 %v5494_v11, %v7184_v2  ;;  %v5497_v23 = vadd.f32 %v5496_v4, %v5495_v21  ;;  %v5560_v61 = vpop.f32.mrb[63].mxu1  ;;  %v7346_v2 = vld [vmem:[%s8687_s3] ss:$0 sm:$0xff]  ;;  %v1976_v11 = vshll.u32 %v1947_v41, 16  ;;  %v1939_v21 = vld [vmem:[#allocation2 + $0x50] sm:$0xf] }
 0x173   :  { %v5561_v16 = vadd.f32 %v5560_v61, %v5559_v47 }
 0x174   :  { %v1119_v45 = vadd.f32 %v5497_v23, %v7195_v31  ;;  %v7333_v29 = vadd.f32 %v5558_v38, %v1116_v6  ;;  %v1969_v38 = vrot.slane %v1967_v25, 4  ;;  %v2079_v23 = vshrl.u32 %v1939_v21, 16 }
 0x176   :  { %v5884_v40 = vpop.f32.mrb[64].mxu0  ;;  %v7340_v48 = vadd.f32 %v5561_v16, %v1119_v45  ;;  %v7415_v41 = vrot.slane %v2079_v23, 4 }
 0x177   :  { %v1262_v63 = vadd.f32 %v5884_v40, %v7244_v57  ;;  %v1253_v13 = vpop.f32.mrb[65].mxu0  ;;  %v7405_v40 = vsel %vm7387_vm7, %v5055_v56, %v2243_v20 }
 0x178   :  { %v1254_v31 = vadd.f32 %v1253_v13, %v7212_v52  ;;  %v5885_v17 = vpop.f32.mrb[66].mxu0 }
 0x179   :  { %v1325_v0 = vmul.f32 %v7338_v60, %v1262_v63  ;;  %v1265_v53 = vadd.f32 %v5885_v17, %v7256_v33  ;;  %v1256_v51 = vpop.f32.mrb[67].mxu0  ;;  %v7407_v63 = vrot.slane %v1976_v11, 5  ;;  %v7441_v11 = vld [vmem:[#allocation2 + $0x54] sm:$0x1] }
 0x17a   :  { %v1323_v14 = vmul.f32 %v7338_v60, %v1254_v31  ;;  %v1257_v18 = vadd.f32 %v1256_v51, %v7221_v36 }
 0x17b   :  { %v7354_v57 = vadd.f32 %v7346_v2, %v1325_v0  ;;  %v1326_v30 = vmul.f32 %v7338_v60, %v1265_v53  ;;  %v2082_v0 = vshll.u32 %v1939_v21, 16 }
 0x17c   :  { %v7358_v8 = vadd.f32 %v7346_v2, %v1323_v14  ;;  %v1324_v52 = vmul.f32 %v7338_v60, %v1257_v18 }
 0x17d   :  { %v5025_v33 = vmul.f32 -1.442695, %v7354_v57  ;;  %v7365_v28 = vadd.f32 %v7346_v2, %v1326_v30  ;;  %v7423_v25 = vrot.slane %v2082_v0, 5 }
 0x17e   :  { %v5023_v36 = vmul.f32 -1.442695, %v7358_v8  ;;  %v7369_v54 = vadd.f32 %v7346_v2, %v1324_v52  ;;  %v5888_v50 = vpop.f32.mrb[68].mxu0 }
 0x17f   :  { %6158 = vpow2.f32 %v5025_v33  ;;  %v5026_v5 = vmul.f32 -1.442695, %v7365_v28  ;;  %v1278_v7 = vadd.f32 %v5888_v50, %v7299_v27  ;;  %v1269_v9 = vpop.f32.mrb[69].mxu0 }
 0x180   :  { %6160 = vpow2.f32 %v5023_v36  ;;  %v5024_v15 = vmul.f32 -1.442695, %v7369_v54  ;;  %v1270_v24 = vadd.f32 %v1269_v9, %v7283_v3  ;;  %v5889_v43 = vpop.f32.mrb[70].mxu0 }
 0x181   :  { %6162 = vpow2.f32 %v5026_v5  ;;  %v1329_v49 = vmul.f32 %v7338_v60, %v1278_v7  ;;  %v1281_v44 = vadd.f32 %v5889_v43, %v7301_v1  ;;  %v1272_v32 = vpop.f32.mrb[71].mxu0 }
 0x182   :  { %6164 = vpow2.f32 %v5024_v15  ;;  %v1327_v27 = vmul.f32 %v7338_v60, %v1270_v24  ;;  %v1273_v22 = vadd.f32 %v1272_v32, %v7285_v62  ;;  %v1972_v62 = vrot.slane %v1970_v59, 5 }
 0x183   :  { %v7382_v35 = vadd.f32 %v7346_v2, %v1329_v49  ;;  %v1330_v3 = vmul.f32 %v7338_v60, %v1281_v44  ;;  %v7433_v44 = vld [vmem:[#allocation2 + $0x50] sm:$0xe] }
 0x184   :  { %v7392_v1 = vadd.f32 %v7346_v2, %v1327_v27  ;;  %v1328_v4 = vmul.f32 %v7338_v60, %v1273_v22  ;;  %v1973_v18 = vor.u32 %v1972_v62, %v1969_v38  ;;  %v2088_v38 = vshll.u32 %v7441_v11, 16 }
 0x185   :  { %v5029_v47 = vmul.f32 -1.442695, %v7382_v35  ;;  %v7397_v6 = vadd.f32 %v7346_v2, %v1330_v3 }
 0x186   :  { %v5027_v61 = vmul.f32 -1.442695, %v7392_v1  ;;  %v7401_v16 = vadd.f32 %v7346_v2, %v1328_v4  ;;  %v5892_v45 = vpop.f32.mrb[72].mxu0  ;;  %v7439_v22 = vrot.slane %v1973_v18, 4 }
 0x187   :  { %6166 = vpow2.f32 %v5029_v47  ;;  %v5030_v13 = vmul.f32 -1.442695, %v7397_v6  ;;  %v1294_v31 = vadd.f32 %v5892_v45, %v7318_v58  ;;  %v1285_v17 = vpop.f32.mrb[73].mxu0 }
 0x188   :  { %6168 = vpow2.f32 %v5027_v61  ;;  %v5028_v53 = vmul.f32 -1.442695, %v7401_v16  ;;  %v1286_v51 = vadd.f32 %v1285_v17, %v7308_v26  ;;  %v5893_v14 = vpop.f32.mrb[74].mxu0  ;;  %v5063_v61 = vrot.slane %v7433_v44, 9 }
 0x189   :  { %v6159_v30 = vpop.eup %6158  ;;  %6170 = vpow2.f32 %v5030_v13  ;;  %v1333_v39 = vmul.f32 %v7338_v60, %v1294_v31  ;;  %v1297_v52 = vadd.f32 %v5893_v14, %v7320_v42  ;;  %v1288_v33 = vpop.f32.mrb[75].mxu0 }
 0x18a   :  { %v6161_v36 = vpop.eup %6160  ;;  %v1412_v58 = vadd.f32 1.0, %v6159_v30  ;;  %6172 = vpow2.f32 %v5028_v53  ;;  %v1331_v50 = vmul.f32 %v7338_v60, %v1286_v51  ;;  %v1289_v56 = vadd.f32 %v1288_v33, %v7310_v37 }
 0x18b   :  { %v6163_v5 = vpop.eup %6162  ;;  %v1410_v26 = vadd.f32 1.0, %v6161_v36  ;;  %v7420_v7 = vadd.f32 %v7346_v2, %v1333_v39  ;;  %v1334_v9 = vmul.f32 %v7338_v60, %v1297_v52 }
 0x18c   :  { %v6165_v42 = vpop.eup %6164  ;;  %6174 = vrcp.f32 %v1412_v58  ;;  %v1413_v15 = vadd.f32 1.0, %v6163_v5  ;;  %v7426_v24 = vadd.f32 %v7346_v2, %v1331_v50  ;;  %v1332_v43 = vmul.f32 %v7338_v60, %v1289_v56 }
 0x18d   :  { %6176 = vrcp.f32 %v1410_v26  ;;  %v1411_v59 = vadd.f32 1.0, %v6165_v42  ;;  %v5033_v37 = vmul.f32 -1.442695, %v7420_v7  ;;  %v7431_v49 = vadd.f32 %v7346_v2, %v1334_v9 }
 0x18e   :  { %6178 = vrcp.f32 %v1413_v15  ;;  %v5031_v32 = vmul.f32 -1.442695, %v7426_v24  ;;  %v7437_v20 = vadd.f32 %v7346_v2, %v1332_v43  ;;  %v5896_v27 = vpop.f32.mrb[76].mxu0  ;;  %v2275_v26 = vrot.slane %v7441_v11, 5  ;;  %v1513_v15 = vld [vmem:[#allocation2 + $0x48] sm:$0x1] }
 0x18f   :  { %6180 = vrcp.f32 %v1411_v59  ;;  %v5034_v21 = vmul.f32 -1.442695, %v7431_v49  ;;  %v1310_v3 = vadd.f32 %v5896_v27, %v7333_v29  ;;  %v1301_v4 = vpop.f32.mrb[77].mxu0  ;;  %v2085_v29 = vor.u32 %v7423_v25, %v7415_v41 }
 0x190   :  { %6182 = vpow2.f32 %v5033_v37  ;;  %v5032_v62 = vmul.f32 -1.442695, %v7437_v20  ;;  %v1302_v47 = vadd.f32 %v1301_v4, %v7324_v34  ;;  %v5897_v23 = vpop.f32.mrb[78].mxu0  ;;  %v7474_v42 = vrot.slane %v2088_v38, 5 }
 0x191   :  { %v6167_v45 = vpop.eup %6166  ;;  %6184 = vpow2.f32 %v5031_v32  ;;  %v1337_v13 = vmul.f32 %v7338_v60, %v1310_v3  ;;  %v1313_v31 = vadd.f32 %v5897_v23, %v7340_v48  ;;  %v1304_v17 = vpop.f32.mrb[79].mxu0  ;;  %v7477_v37 = vrot.slane %v2085_v29, 4  ;;  %v1575_v32 = vld [vmem:[#allocation2 + $0x4c] sm:$0x1] }
 0x192   :  { %v6169_v0 = vpop.eup %6168  ;;  %v1416_v53 = vadd.f32 1.0, %v6167_v45  ;;  %6186 = vpow2.f32 %v5034_v21  ;;  %v1335_v51 = vmul.f32 %v7338_v60, %v1302_v47  ;;  %v1305_v34 = vadd.f32 %v1304_v17, %v7326_v46 }
 0x193   :  { %v6171_v14 = vpop.eup %6170  ;;  %v1414_v18 = vadd.f32 1.0, %v6169_v0  ;;  %6188 = vpow2.f32 %v5032_v62  ;;  %v7456_v30 = vadd.f32 %v7346_v2, %v1337_v13  ;;  %v1338_v48 = vmul.f32 %v7338_v60, %v1313_v31 }
 0x194   :  { %v6173_v39 = vpop.eup %6172  ;;  %6190 = vrcp.f32 %v1416_v53  ;;  %v1417_v52 = vadd.f32 1.0, %v6171_v14  ;;  %v7460_v33 = vadd.f32 %v7346_v2, %v1335_v51  ;;  %v1336_v41 = vmul.f32 %v7338_v60, %v1305_v34 }
 0x195   :  { %6192 = vrcp.f32 %v1414_v18  ;;  %v1415_v36 = vadd.f32 1.0, %v6173_v39  ;;  %v5037_v46 = vmul.f32 -1.442695, %v7456_v30  ;;  %v7465_v58 = vadd.f32 %v7346_v2, %v1338_v48 }
 0x196   :  { %v6175_v50 = vpop.eup %6174  ;;  %6194 = vrcp.f32 %v1417_v52  ;;  %v5035_v56 = vmul.f32 -1.442695, %v7460_v33  ;;  %v7469_v5 = vadd.f32 %v7346_v2, %v1336_v41  ;;  %v1514_v2 = vsel %vm7096_vm2, 0, %v1513_v15  ;;  %v1850_v52 = vld [vmem:[#allocation2 + $0x1c] sm:$0x1] }
 0x197   :  { %v6177_v9 = vpop.eup %6176  ;;  %v1460_v25 = vmul.f32 %v6175_v50, %v7354_v57  ;;  %6196 = vrcp.f32 %v1415_v36  ;;  %v5038_v60 = vmul.f32 -1.442695, %v7465_v58  ;;  %1515 = vst [vmem:[#allocation2 + $0x48] sm:$0x1] %v1514_v2  ;;  %v1576_v3 = vsel %vm7103_vm4, 0, %v1575_v32 }
 0x198   :  { %v6179_v43 = vpop.eup %6178  ;;  %v1458_v59 = vmul.f32 %v6177_v9, %v7358_v8  ;;  %6198 = vpow2.f32 %v5037_v46  ;;  %v7486_v62 = vmul.f32 -1.442695, %v7469_v5  ;;  %1577 = vst [vmem:[#allocation2 + $0x4c] sm:$0x1] %v1576_v3 }
 0x199   :  { %v6181_v27 = vpop.eup %6180  ;;  %v5292_v21 = vpack.c.bf16 %v1460_v25, %v1460_v25  ;;  %v1461_v57 = vmul.f32 %v6179_v43, %v7365_v28  ;;  %6200 = vpow2.f32 %v5035_v56  ;;  %v1835_v25 = vld [vmem:[#allocation2 + $0x8] sm:$0xf] }
 0x19a   :  { %v6183_v4 = vpop.eup %6182  ;;  %v5290_v38 = vpack.c.bf16 %v1458_v59, %v1458_v59  ;;  %v1459_v8 = vmul.f32 %v6181_v27, %v7369_v54  ;;  %6202 = vpow2.f32 %v5038_v60  ;;  %v1847_v54 = vld [vmem:[#allocation2 + $0x18] sm:$0xf]  ;;  %v1838_v60 = vld [vmem:[#allocation2 + $0xc] sm:$0x1]  ;;  %v1853_v27 = vld [vmem:[#allocation2 + $0x20] sm:$0xf] }
 0x19b   :  { %v6185_v47 = vpop.eup %6184  ;;  %v1689_v23 = vshrl.u32 %v5292_v21, 16  ;;  %v1692_v45 = vshll.u32 %v5292_v21, 16  ;;  %v5293_v13 = vpack.c.bf16 %v1461_v57, %v1461_v57  ;;  %v1420_v31 = vadd.f32 1.0, %v6183_v4  ;;  %v1856_v21 = vld [vmem:[#allocation2 + $0x24] sm:$0x1] }
 0x19c   :  { %v7488_v28 = vpop.eup %6186  ;;  %v1673_v17 = vshrl.u32 %v5290_v38, 16  ;;  %v1676_v29 = vshll.u32 %v5290_v38, 16  ;;  %v5291_v0 = vpack.c.bf16 %v1459_v8, %v1459_v8  ;;  %v1418_v53 = vadd.f32 1.0, %v6185_v47 }
 0x19d   :  { %v7490_v51 = vpop.eup %6188  ;;  %v1691_v34 = vrot.slane %v1689_v23, 7  ;;  %v1697_v14 = vshrl.u32 %v5293_v13, 16  ;;  %v1700_v18 = vshll.u32 %v5293_v13, 16  ;;  %6204 = vrcp.f32 %v1420_v31  ;;  %v1844_v13 = vld [vmem:[#allocation2 + $0x14] sm:$0x1] }
 0x19e   :  { %v6191_v48 = vpop.eup %6190  ;;  %v1675_v41 = vrot.slane %v1673_v17, 7  ;;  %v1681_v36 = vshrl.u32 %v5291_v0, 16  ;;  %v1684_v46 = vshll.u32 %v5291_v0, 16  ;;  %6206 = vrcp.f32 %v1418_v53 }
 0x19f   :  { %v6193_v50 = vpop.eup %6192  ;;  %v1694_v56 = vor.u32 %v1692_v45, %v1691_v34  ;;  %v1695_v9 = vrot.slane %v1691_v34, 4  ;;  %v1699_v15 = vrot.slane %v1697_v14, 7  ;;  %v1464_v43 = vmul.f32 %v6191_v48, %v7382_v35  ;;  %v1841_v45 = vld [vmem:[#allocation2 + $0x10] sm:$0xf] }
 0x1a0   :  { %v6195_v59 = vpop.eup %6194  ;;  %v1678_v2 = vor.u32 %v1676_v29, %v1675_v41  ;;  %v1679_v32 = vrot.slane %v1675_v41, 4  ;;  %v1683_v57 = vrot.slane %v1681_v36, 7  ;;  %v1462_v3 = vmul.f32 %v6193_v50, %v7392_v1 }
 0x1a1   :  { %v6197_v4 = vpop.eup %6196  ;;  %v1848_v38 = vsel %vm7494_vm9, %v1694_v56, %v1847_v54  ;;  %v1851_v8 = vsel %vm7096_vm2, %v1695_v9, %v1850_v52  ;;  %v1702_v47 = vor.u32 %v1700_v18, %v1699_v15  ;;  %v1703_v23 = vrot.slane %v1699_v15, 4 }
 0x1a2   :  { %v6199_v35 = vpop.eup %6198  ;;  %1849 = vst [vmem:[#allocation2 + $0x18] sm:$0xf] %v1848_v38  ;;  %1852 = vst [vmem:[#allocation2 + $0x1c] sm:$0x1] %v1851_v8  ;;  %v1836_v31 = vsel %vm7494_vm9, %v1678_v2, %v1835_v25  ;;  %v1839_v1 = vsel %vm7096_vm2, %v1679_v32, %v1838_v60  ;;  %v1686_v17 = vor.u32 %v1684_v46, %v1683_v57  ;;  %v1687_v29 = vrot.slane %v1683_v57, 4 }
 0x1a3   :  { %v6201_v0 = vpop.eup %6200  ;;  %1837 = vst [vmem:[#allocation2 + $0x8] sm:$0xf] %v1836_v31  ;;  %1840 = vst [vmem:[#allocation2 + $0xc] sm:$0x1] %v1839_v1  ;;  %v1854_v53 = vsel %vm7494_vm9, %v1702_v47, %v1853_v27  ;;  %v1857_v34 = vsel %vm7096_vm2, %v1703_v23, %v1856_v21  ;;  %v5296_v54 = vpack.c.bf16 %v1464_v43, %v1464_v43  ;;  %v1871_v25 = vld [vmem:[#allocation2 + $0x38] sm:$0xf] }
 0x1a4   :  { %v5294_v14 = vpack.c.bf16 %v1462_v3, %v1462_v3  ;;  %v6203_v18 = vpop.eup %6202  ;;  %1855 = vst [vmem:[#allocation2 + $0x20] sm:$0xf] %v1854_v53  ;;  %1858 = vst [vmem:[#allocation2 + $0x24] sm:$0x1] %v1857_v34  ;;  %v1842_v48 = vsel %vm7494_vm9, %v1686_v17, %v1841_v45  ;;  %v1845_v52 = vsel %vm7096_vm2, %v1687_v29, %v1844_v13  ;;  %v1874_v60 = vld [vmem:[#allocation2 + $0x3c] sm:$0x1] }
 0x1a5   :  { %v1465_v41 = vmul.f32 %v6195_v59, %v7397_v6  ;;  %v1463_v36 = vmul.f32 %v6197_v4, %v7401_v16  ;;  %1843 = vst [vmem:[#allocation2 + $0x10] sm:$0xf] %v1842_v48  ;;  %1846 = vst [vmem:[#allocation2 + $0x14] sm:$0x1] %v1845_v52  ;;  %v1721_v46 = vshrl.u32 %v5296_v54, 16  ;;  %v1724_v50 = vshll.u32 %v5296_v54, 16 }
 0x1a6   :  { %v1705_v56 = vshrl.u32 %v5294_v14, 16  ;;  %v1708_v9 = vshll.u32 %v5294_v14, 16  ;;  %v1421_v2 = vadd.f32 1.0, %v7488_v28  ;;  %v1419_v32 = vadd.f32 1.0, %v7490_v51  ;;  %v1859_v6 = vld [vmem:[#allocation2 + $0x28] sm:$0xf] }
 0x1a7   :  { %v5297_v15 = vpack.c.bf16 %v1465_v41, %v1465_v41  ;;  %v5295_v43 = vpack.c.bf16 %v1463_v36, %v1463_v36  ;;  %v6205_v27 = vpop.eup %6204  ;;  %v1723_v21 = vrot.slane %v1721_v46, 7  ;;  %v1424_v59 = vadd.f32 1.0, %v6199_v35  ;;  %v1862_v4 = vld [vmem:[#allocation2 + $0x2c] sm:$0x1]  ;;  %v1877_v51 = vld [vmem:[#allocation2 + $0x40] sm:$0xf] }
 0x1a8   :  { %v1707_v57 = vrot.slane %v1705_v56, 7  ;;  %v1422_v16 = vadd.f32 1.0, %v6201_v0  ;;  %v6207_v3 = vpop.eup %6206  ;;  %v1468_v29 = vmul.f32 %v6205_v27, %v7420_v7  ;;  %v1880_v14 = vld [vmem:[#allocation2 + $0x44] sm:$0x1]  ;;  %v1865_v48 = vld [vmem:[#allocation2 + $0x30] sm:$0xf]  ;;  %6208 = vrcp.f32 %v1421_v2 }
 0x1a9   :  { %v1729_v38 = vshrl.u32 %v5297_v15, 16  ;;  %v1732_v8 = vshll.u32 %v5297_v15, 16  ;;  %v1713_v47 = vshrl.u32 %v5295_v43, 16  ;;  %v1716_v23 = vshll.u32 %v5295_v43, 16  ;;  %v1868_v52 = vld [vmem:[#allocation2 + $0x34] sm:$0x1] }
 0x1aa   :  { %v1726_v45 = vor.u32 %v1724_v50, %v1723_v21  ;;  %v1727_v13 = vrot.slane %v1723_v21, 4  ;;  %v1710_v31 = vor.u32 %v1708_v9, %v1707_v57  ;;  %v1711_v28 = vrot.slane %v1707_v57, 4  ;;  %v2305_v9 = vld [vmem:[#allocation2 + $0x8] sm:$0xf] }
 0x1ab   :  { %v1731_v1 = vrot.slane %v1729_v38, 7  ;;  %v1715_v17 = vrot.slane %v1713_v47, 7  ;;  %v1466_v35 = vmul.f32 %v6207_v3, %v7426_v24  ;;  %v5300_v46 = vpack.c.bf16 %v1468_v29, %v1468_v29  ;;  %v1898_v3 = vld [vmem:[#allocation2 + $0x6c] sm:$0x1] }
 0x1ac   :  { %v1872_v0 = vsel %vm7494_vm9, %v1726_v45, %v1871_v25  ;;  %v1875_v53 = vsel %vm7096_vm2, %v1727_v13, %v1874_v60  ;;  %v1860_v34 = vsel %vm7494_vm9, %v1710_v31, %v1859_v6  ;;  %v1863_v54 = vsel %vm7096_vm2, %v1711_v28, %v1862_v4  ;;  %v2306_v25 = vld [vmem:[#allocation2 + $0x10] sm:$0xf]  ;;  %v1895_v6 = vld [vmem:[#allocation2 + $0x68] sm:$0xf]  ;;  %v1883_v45 = vld [vmem:[#allocation2 + $0x58] sm:$0xf] }
 0x1ad   :  { %1873 = vst [vmem:[#allocation2 + $0x38] sm:$0xf] %v1872_v0  ;;  %1876 = vst [vmem:[#allocation2 + $0x3c] sm:$0x1] %v1875_v53  ;;  %v1734_v7 = vor.u32 %v1732_v8, %v1731_v1  ;;  %v1735_v24 = vrot.slane %v1731_v1, 4  ;;  %v1718_v41 = vor.u32 %v1716_v23, %v1715_v17  ;;  %v1719_v36 = vrot.slane %v1715_v17, 4 }
 0x1ae   :  { %1861 = vst [vmem:[#allocation2 + $0x28] sm:$0xf] %v1860_v34  ;;  %1864 = vst [vmem:[#allocation2 + $0x2c] sm:$0x1] %v1863_v54  ;;  %v5298_v50 = vpack.c.bf16 %v1466_v35, %v1466_v35  ;;  %v1425_v56 = vadd.f32 1.0, %v6203_v18  ;;  %v1753_v2 = vshrl.u32 %v5300_v46, 16  ;;  %6210 = vrcp.f32 %v1419_v32 }
 0x1af   :  { %v1878_v60 = vsel %vm7494_vm9, %v1734_v7, %v1877_v51  ;;  %v1881_v15 = vsel %vm7096_vm2, %v1735_v24, %v1880_v14  ;;  %v1866_v43 = vsel %vm7494_vm9, %v1718_v41, %v1865_v48  ;;  %v1869_v27 = vsel %vm7096_vm2, %v1719_v36, %v1868_v52  ;;  %v1886_v31 = vld [vmem:[#allocation2 + $0x5c] sm:$0x1]  ;;  %v2191_v53 = vld [vmem:[#allocation2 + $0x8] sm:$0xe]  ;;  %v1948_v14 = vld [vmem:[#allocation2 + $0xc] sm:$0x1] }
 0x1b0   :  { %1879 = vst [vmem:[#allocation2 + $0x40] sm:$0xf] %v1878_v60  ;;  %1882 = vst [vmem:[#allocation2 + $0x44] sm:$0x1] %v1881_v15  ;;  %v1756_v18 = vshll.u32 %v5300_v46, 16  ;;  %v1737_v21 = vshrl.u32 %v5298_v50, 16  ;;  %6212 = vrcp.f32 %v1424_v59  ;;  %v5127_v54 = vcombine.low %v2305_v9, %v2306_v25 }
 0x1b1   :  { %1867 = vst [vmem:[#allocation2 + $0x30] sm:$0xf] %v1866_v43  ;;  %1870 = vst [vmem:[#allocation2 + $0x34] sm:$0x1] %v1869_v27  ;;  %v1740_v57 = vshll.u32 %v5298_v50, 16  ;;  %v2338_v4 = vshrl.u32 %v2305_v9, 16  ;;  %6214 = vrcp.f32 %v1422_v16  ;;  %v1979_v50 = vsel %vm7540_vm12, %v7439_v22, %v7407_v63 }
 0x1b2   :  { %v2341_v38 = vshll.u32 %v2305_v9, 16  ;;  %v2352_v8 = vshrl.u32 %v2306_v25, 16  ;;  %v1755_v47 = vrot.slane %v1753_v2, 7  ;;  %v1739_v23 = vrot.slane %v1737_v21, 7  ;;  %v2307_v16 = vld [vmem:[#allocation2 + $0x18] sm:$0xf]  ;;  %4083 = vmatprep.mubr.bf16.mxu0 %v5127_v54 }
 0x1b3   :  { %v2355_v13 = vshll.u32 %v2306_v25, 16  ;;  %v2340_v28 = vrot.slane %v2338_v4, 4  ;;  %6216 = vrcp.f32 %v1425_v56  ;;  %v7552_v41 = vld [vmem:[#allocation2 + $0x20] sm:$0xf]  ;;  %v5056_v46 = vrot.slane %v2191_v53, 9  ;;  %v6209_v56 = vpop.eup %6208  ;;  %v6107_v53 = vld [vmem:[%s8688_s4 + $0x188] sm:$0xff]  }
 0x1b4   :  { %v2343_v1 = vrot.slane %v2341_v38, 5  ;;  %v2354_v51 = vrot.slane %v2352_v8, 4  ;;  %v1758_v17 = vor.u32 %v1756_v18, %v1755_v47  ;;  %v1759_v29 = vrot.slane %v1755_v47, 4  ;;  %v7559_v15 = vld [vmem:[#allocation2 + $0x8] sm:$0xf] }
 0x1b5   :  { %v1742_v35 = vor.u32 %v1740_v57, %v1739_v23  ;;  %v1743_v0 = vrot.slane %v1739_v23, 4  ;;  %v2357_v59 = vrot.slane %v2355_v13, 5  ;;  %6218 = vpow2.f32 %v7486_v62  ;;  %v6106_v38 = vld [vmem:[%s8688_s4 + $0x1c8] sm:$0xff]  }
 0x1b6   :  { %v2344_v34 = vor.u32 %v2343_v1, %v2340_v28  ;;  %v1896_v48 = vsel %vm7494_vm9, %v1758_v17, %v1895_v6  ;;  %v1899_v52 = vsel %vm7096_vm2, %v1759_v29, %v1898_v3  ;;  %v2247_v9 = vrot.slane %v1948_v14, 5 }
 0x1b7   :  { %v1884_v7 = vsel %vm7494_vm9, %v1742_v35, %v1883_v45  ;;  %v1887_v24 = vsel %vm7096_vm2, %v1743_v0, %v1886_v31  ;;  %1897 = vst [vmem:[#allocation2 + $0x68] sm:$0xf] %v1896_v48  ;;  %1900 = vst [vmem:[#allocation2 + $0x6c] sm:$0x1] %v1899_v52  ;;  %v2358_v36 = vor.u32 %v2357_v59, %v2354_v51  ;;  %v2366_v25 = vshrl.u32 %v2307_v16, 16 }
 0x1b8   :  { %1885 = vst [vmem:[#allocation2 + $0x58] sm:$0xf] %v1884_v7  ;;  %1888 = vst [vmem:[#allocation2 + $0x5c] sm:$0x1] %v1887_v24  ;;  %v2369_v60 = vshll.u32 %v2307_v16, 16  ;;  %v7567_v62 = vsel %vm7387_vm7, %v5063_v61, %v2275_v26  ;;  %v1469_v43 = vmul.f32 %v6209_v56, %v7431_v49  ;;  %v7570_v27 = vrot.slane %v2344_v34, 4  ;;  %v6211_v26 = vpop.eup %6210 }
 0x1b9   :  { %v2380_v2 = vshrl.u32 %v7552_v41, 16  ;;  %v2091_v18 = vsel %vm7540_vm12, %v7477_v37, %v7474_v42  ;;  %v7577_v21 = vrot.slane %v2358_v36, 4  ;;  %v2248_v44 = vsel %vm7387_vm7, %v5056_v46, %v2247_v9  ;;  %v6105_v49 = vld [vmem:[%s8688_s4 + $0x180] sm:$0xff]   ;;  %v7597_v31 = vld [vmem:[#allocation2 + $0x10] sm:$0xf] }
 0x1ba   :  { %v2383_v11 = vshll.u32 %v7552_v41, 16  ;;  %v5128_v61 = vcombine.low %v2307_v16, %v7552_v41  ;;  %v5301_v57 = vpack.c.bf16 %v1469_v43, %v1469_v43  ;;  %v5119_v6 = vcombine.low %v7405_v40, %v2248_v44  ;;  %v6213_v8 = vpop.eup %6212  ;;  %v1901_v16 = vld [vmem:[#allocation2 + $0x70] sm:$0xf]  ;;  %v1904_v48 = vld [vmem:[#allocation2 + $0x74] sm:$0x1] }
 0x1bb   :  { %v7587_v3 = vrot.slane %v2366_v25, 4  ;;  %v1981_v4 = vshrl.u32 %v7559_v15, 16  ;;  %v1467_v47 = vmul.f32 %v6211_v26, %v7437_v20  ;;  %v7594_v23 = vrot.slane %v2369_v60, 5  ;;  %v6215_v28 = vpop.eup %6214  ;;  %v1889_v25 = vld [vmem:[#allocation2 + $0x60] sm:$0xf] }
 0x1bc   :  { %v1984_v45 = vshll.u32 %v7559_v15, 16  ;;  %v1990_v13 = vshll.u32 %v1948_v14, 16  ;;  %v1761_v40 = vshrl.u32 %v5301_v57, 16  ;;  %v1764_v1 = vshll.u32 %v5301_v57, 16  ;;  %4084 = vmatmul.mubr.bf16.vlgmr.msra.gmra.mrb[80].mxu0 %v5119_v6  ;;  %v6113_v6 = vld [vmem:[%s8688_s4 + $0x190] sm:$0xff]  }
 0x1bd   :  { %v1472_v51 = vmul.f32 %v6213_v8, %v7456_v30  ;;  %v7600_v17 = vrot.slane %v1981_v4, 4  ;;  %v5299_v29 = vpack.c.bf16 %v1467_v47, %v1467_v47  ;;  %v1470_v35 = vmul.f32 %v6215_v28, %v7460_v33  ;;  %4091 = vmatprep.mubr.bf16.mxu0 %v5128_v61  ;;  %5771 = vmatpush3.bf16.msra.mxu0 %v6105_v49  ;;  %v6217_v34 = vpop.eup %6216  ;;  %v6111_v33 = vld [vmem:[%s8688_s4 + $0x1d0] sm:$0xff]   ;;  %v1892_v61 = vld [vmem:[#allocation2 + $0x64] sm:$0x1]  ;;  %v1919_v8 = vld [vmem:[#allocation2 + $0x88] sm:$0xf] }
 0x1be   :  { %v7603_v20 = vrot.slane %v1984_v45, 5  ;;  %v7605_v0 = vrot.slane %v1990_v13, 5  ;;  %v1763_v59 = vrot.slane %v1761_v40, 7  ;;  %v1995_v30 = vshrl.u32 %v7597_v31, 16  ;;  %5772 = vmatprep.subr.bf16.mxu0 %v6106_v38  ;;  %v6114_v45 = vld [vmem:[%s8688_s4 + $0x1d8] sm:$0xff]  }
 0x1bf   :  { %v5304_v54 = vpack.c.bf16 %v1472_v51, %v1472_v51  ;;  %v1998_v14 = vshll.u32 %v7597_v31, 16  ;;  %v1745_v52 = vshrl.u32 %v5299_v29, 16  ;;  %v1748_v7 = vshll.u32 %v5299_v29, 16  ;;  %v6219_v46 = vpop.eup %6218  ;;  %v1922_v40 = vld [vmem:[#allocation2 + $0x8c] sm:$0x1] }
 0x1c0   :  { %v5302_v24 = vpack.c.bf16 %v1470_v35, %v1470_v35  ;;  %v1473_v36 = vmul.f32 %v6217_v34, %v7465_v58  ;;  %v1766_v56 = vor.u32 %v1764_v1, %v1763_v59  ;;  %v1767_v9 = vrot.slane %v1763_v59, 4  ;;  %v1910_v34 = vld [vmem:[#allocation2 + $0x7c] sm:$0x1] }
 0x1c1   :  { %v1785_v60 = vshrl.u32 %v5304_v54, 16  ;;  %v1788_v43 = vshll.u32 %v5304_v54, 16  ;;  %v1747_v44 = vrot.slane %v1745_v52, 7  ;;  %5773 = vmatpush3.bf16.msra.mxu0 %v6107_v53  ;;  %v1423_v47 = vadd.f32 1.0, %v6219_v46  ;;  %v1907_v53 = vld [vmem:[#allocation2 + $0x78] sm:$0xf] }
 0x1c2   :  { %v1769_v49 = vshrl.u32 %v5302_v24, 16  ;;  %v1772_v26 = vshll.u32 %v5302_v24, 16  ;;  %v5305_v57 = vpack.c.bf16 %v1473_v36, %v1473_v36  ;;  %v1902_v4 = vsel %vm7494_vm9, %v1766_v56, %v1901_v16  ;;  %5774 = vmatprep.subr.bf16.mxu0 %v6111_v33  ;;  %v7630_v52 = vld [vmem:[#allocation2 + $0x14] sm:$0x1]  ;;  %v1925_v56 = vld [vmem:[#allocation2 + $0x90] sm:$0xf] }
 0x1c3   :  { %v1905_v58 = vsel %vm7096_vm2, %v1767_v9, %v1904_v48  ;;  %v1787_v38 = vrot.slane %v1785_v60, 7  ;;  %1903 = vst [vmem:[#allocation2 + $0x70] sm:$0xf] %v1902_v4  ;;  %v1750_v13 = vor.u32 %v1748_v7, %v1747_v44  ;;  %v1751_v28 = vrot.slane %v1747_v44, 4  ;;  %v6115_v7 = vld [vmem:[%s8688_s4 + $0x198] sm:$0xff]   ;;  %v6119_v60 = vld [vmem:[%s8688_s4 + $0x1e0] sm:$0xff]  }
 0x1c4   :  { %1906 = vst [vmem:[#allocation2 + $0x74] sm:$0x1] %v1905_v58  ;;  %v1771_v1 = vrot.slane %v1769_v49, 7  ;;  %v1793_v51 = vshrl.u32 %v5305_v57, 16  ;;  %v1796_v59 = vshll.u32 %v5305_v57, 16  ;;  %6220 = vrcp.f32 %v1423_v47  ;;  %v6121_v58 = vld [vmem:[%s8688_s4 + $0x1a0] sm:$0xff]  }
 0x1c5   :  { %v1790_v29 = vor.u32 %v1788_v43, %v1787_v38  ;;  %v1791_v35 = vrot.slane %v1787_v38, 4  ;;  %v1890_v54 = vsel %vm7494_vm9, %v1750_v13, %v1889_v25  ;;  %v1893_v33 = vsel %vm7096_vm2, %v1751_v28, %v1892_v61  ;;  %5775 = vmatpush3.bf16.msra.mxu0 %v6113_v6  ;;  %v7641_v25 = vld [vmem:[#allocation2 + $0x18] sm:$0xf]  ;;  %v1928_v61 = vld [vmem:[#allocation2 + $0x94] sm:$0x1] }
 0x1c6   :  { %v1774_v16 = vor.u32 %v1772_v26, %v1771_v1  ;;  %v1775_v48 = vrot.slane %v1771_v1, 4  ;;  %1891 = vst [vmem:[#allocation2 + $0x60] sm:$0xf] %v1890_v54  ;;  %1894 = vst [vmem:[#allocation2 + $0x64] sm:$0x1] %v1893_v33  ;;  %v1795_v46 = vrot.slane %v1793_v51, 7  ;;  %v1987_v9 = vor.u32 %v7603_v20, %v7600_v17  ;;  %5776 = vmatprep.subr.bf16.mxu0 %v6114_v45 }
 0x1c7   :  { %v1920_v24 = vsel %vm7494_vm9, %v1790_v29, %v1919_v8  ;;  %v1923_v36 = vsel %vm7096_vm2, %v1791_v35, %v1922_v40  ;;  %v1950_v49 = vld [vmem:[#allocation2 + $0x1c] sm:$0x1]  ;;  %v1997_v17 = vrot.slane %v1995_v30, 4  ;;  %v2000_v20 = vrot.slane %v1998_v14, 5  ;;  %v2192_v14 = vld [vmem:[#allocation2 + $0x10] sm:$0xe] }
 0x1c8   :  { %1921 = vst [vmem:[#allocation2 + $0x88] sm:$0xf] %v1920_v24  ;;  %1924 = vst [vmem:[#allocation2 + $0x8c] sm:$0x1] %v1923_v36  ;;  %v1908_v43 = vsel %vm7494_vm9, %v1774_v16, %v1907_v53  ;;  %v1911_v44 = vsel %vm7096_vm2, %v1775_v48, %v1910_v34  ;;  %v1798_v26 = vor.u32 %v1796_v59, %v1795_v46  ;;  %v1799_v57 = vrot.slane %v1795_v46, 4  ;;  %v6093_v16 = vld [vmem:[%s8688_s4 + $0x148] sm:$0xff]  }
 0x1c9   :  { %1909 = vst [vmem:[#allocation2 + $0x78] sm:$0xf] %v1908_v43  ;;  %1912 = vst [vmem:[#allocation2 + $0x7c] sm:$0x1] %v1911_v44  ;;  %v1988_v6 = vrot.slane %v1987_v9, 4  ;;  %v2004_v4 = vshll.u32 %v7630_v52, 16  ;;  %v5103_v38 = vcombine.low %v7361_v12, %v7559_v15  ;;  %v2001_v8 = vor.u32 %v2000_v20, %v1997_v17  ;;  %5777 = vmatpush3.bf16.msra.mxu0 %v6115_v7 }
 0x1ca   :  { %v2009_v30 = vshrl.u32 %v7641_v25, 16  ;;  %v2012_v47 = vshll.u32 %v7641_v25, 16  ;;  %v2193_v45 = vld [vmem:[#allocation2 + $0x18] sm:$0xe]  ;;  %v1926_v13 = vsel %vm7494_vm9, %v1798_v26, %v1925_v56  ;;  %v1929_v28 = vsel %vm7096_vm2, %v1799_v57, %v1928_v61  ;;  %v7669_v12 = vld [vmem:[#allocation2 + $0x28] sm:$0xf]  ;;  %5778 = vmatprep.subr.bf16.mxu0 %v6119_v60 }
 0x1cb   :  { %v1993_v40 = vsel %vm7540_vm12, %v1988_v6, %v7605_v0  ;;  %v2018_v1 = vshll.u32 %v1950_v49, 16  ;;  %v6122_v15 = vld [vmem:[%s8688_s4 + $0x1e8] sm:$0xff]   ;;  %1927 = vst [vmem:[#allocation2 + $0x90] sm:$0xf] %v1926_v13  ;;  %1930 = vst [vmem:[#allocation2 + $0x94] sm:$0x1] %v1929_v28 }
 0x1cc   :  { %v5111_v51 = vcombine.low %v1979_v50, %v1993_v40  ;;  %v2002_v29 = vrot.slane %v2001_v8, 4  ;;  %v2011_v35 = vrot.slane %v2009_v30, 4  ;;  %v2014_v53 = vrot.slane %v2012_v47, 5  ;;  %v6090_v0 = vld [vmem:[%s8688_s4 + $0x100] sm:$0xff]   ;;  %v7690_v48 = vld [vmem:[#allocation2 + $0x30] sm:$0xf] }
 0x1cd   :  { %v2006_v34 = vrot.slane %v2004_v4, 5  ;;  %v5057_v59 = vrot.slane %v2192_v14, 9  ;;  %v2251_v54 = vrot.slane %v7630_v52, 5  ;;  %v5058_v33 = vrot.slane %v2193_v45, 9  ;;  %5779 = vmatpush3.bf16.msra.mxu0 %v6121_v58  ;;  %v6123_v52 = vld [vmem:[%s8688_s4 + $0x1a8] sm:$0xff]   ;;  %v6127_v60 = vld [vmem:[%s8688_s4 + $0x1f0] sm:$0xff]  }
 0x1ce   :  { %v7688_v63 = vrot.slane %v2380_v2, 4  ;;  %3986 = vmatprep.mubr.bf16.mxu1 %v5111_v51  ;;  %v2015_v22 = vor.u32 %v2014_v53, %v2011_v35  ;;  %v2255_v50 = vrot.slane %v1950_v49, 5  ;;  %v2394_v7 = vshrl.u32 %v7669_v12, 16  ;;  %v6221_v24 = vpop.eup %6220  ;;  %v6094_v9 = vld [vmem:[%s8688_s4 + $0x108] sm:$0xff]   ;;  %5780 = vmatprep.subr.bf16.mxu0 %v6122_v15  ;;  %v7714_v61 = vld [vmem:[#allocation2 + $0x20] sm:$0xf] }
 0x1cf   :  { %v7698_v36 = vrot.slane %v2383_v11, 5  ;;  %3987 = vmatmul.mubr.bf16.vlgmr.msra.gmra.mrb[64].mxu1 %v5103_v38  ;;  %v2007_v2 = vsel %vm7540_vm12, %v2002_v29, %v2006_v34  ;;  %v2020_v46 = vrot.slane %v2018_v1, 5  ;;  %v2252_v56 = vsel %vm7387_vm7, %v5057_v59, %v2251_v54  ;;  %v7716_v49 = vld [vmem:[#allocation2 + $0x24] sm:$0x1]  ;;  %v6097_v6 = vld [vmem:[%s8688_s4 + $0x150] sm:$0xff]  }
 0x1d0   :  { %v1471_v41 = vmul.f32 %v6221_v24, %v7469_v5  ;;  %v2016_v11 = vrot.slane %v2015_v22, 4  ;;  %v2256_v43 = vsel %vm7387_vm7, %v5058_v33, %v2255_v50  ;;  %5707 = vmatpush3.bf16.msra.mxu1 %v6090_v0  ;;  %v2397_v44 = vshll.u32 %v7669_v12, 16  ;;  %v7722_v5 = vld [vmem:[#allocation2 + $0x28] sm:$0xf]  ;;  %v1952_v30 = vld [vmem:[#allocation2 + $0x2c] sm:$0x1] }
 0x1d1   :  { %v5120_v17 = vcombine.low %v2252_v56, %v2256_v43  ;;  %v7718_v20 = vrot.slane %v2394_v7, 4  ;;  %v2408_v26 = vshrl.u32 %v7690_v48, 16  ;;  %v2411_v57 = vshll.u32 %v7690_v48, 16  ;;  %5708 = vmatprep.subr.bf16.mxu1 %v6093_v16  ;;  %v6098_v47 = vld [vmem:[%s8688_s4 + $0x110] sm:$0xff]   ;;  %5781 = vmatpush3.bf16.msra.mxu0 %v6123_v52  ;;  %v2194_v1 = vld [vmem:[#allocation2 + $0x20] sm:$0xe] }
 0x1d2   :  { %v5303_v4 = vpack.c.bf16 %v1471_v41, %v1471_v41  ;;  %v2021_v58 = vsel %vm7540_vm12, %v2016_v11, %v2020_v46  ;;  %v5129_v38 = vcombine.low %v7669_v12, %v7690_v48  ;;  %v5104_v8 = vcombine.low %v7597_v31, %v7641_v25  ;;  %v6128_v14 = vld [vmem:[%s8688_s4 + $0x1b0] sm:$0xff]   ;;  %5782 = vmatprep.subr.bf16.mxu0 %v6127_v60  ;;  %v6129_v31 = vld [vmem:[%s8688_s4 + $0x1f8] sm:$0xff]   ;;  %v2195_v35 = vld [vmem:[#allocation2 + $0x28] sm:$0xe] }
 0x1d3   :  { %v5112_v45 = vcombine.low %v2007_v2, %v2021_v58  ;;  %4092 = vmatmul.mubr.bf16.gmra.mrb[84].mxu0 %v5120_v17  ;;  %v2023_v13 = vshrl.u32 %v7714_v61, 16  ;;  %v2026_v28 = vshll.u32 %v7714_v61, 16  ;;  %v2032_v40 = vshll.u32 %v7716_v49, 16  ;;  %v1913_v53 = vld [vmem:[#allocation2 + $0x80] sm:$0xf]  ;;  %v6101_v33 = vld [vmem:[%s8688_s4 + $0x158] sm:$0xff]  }
 0x1d4   :  { %v1777_v25 = vshrl.u32 %v5303_v4, 16  ;;  %v1780_v15 = vshll.u32 %v5303_v4, 16  ;;  %4099 = vmatprep.mubr.bf16.mxu0 %v5129_v38  ;;  %v2037_v51 = vshrl.u32 %v7722_v5, 16  ;;  %v2040_v29 = vshll.u32 %v7722_v5, 16  ;;  %5709 = vmatpush3.bf16.msra.mxu1 %v6094_v9  ;;  %v6130_v16 = vld [vmem:[%s8688_s4 + $0x1b8] sm:$0xff]   ;;  %v7757_v41 = vld [vmem:[%s8691_s7] sm:$0xff]  }
 0x1d5   :  { %3994 = vmatprep.mubr.bf16.mxu1 %v5112_v45  ;;  %v2025_v0 = vrot.slane %v2023_v13, 4  ;;  %v2028_v34 = vrot.slane %v2026_v28, 5  ;;  %v2034_v59 = vrot.slane %v2032_v40, 5  ;;  %v2046_v54 = vshll.u32 %v1952_v30, 16  ;;  %5710 = vmatprep.subr.bf16.mxu1 %v6097_v6  ;;  %v2311_v24 = vld [vmem:[#allocation2 + $0x38] sm:$0xf] }
 0x1d6   :  { %v1779_v22 = vrot.slane %v1777_v25, 7  ;;  %v2039_v50 = vrot.slane %v2037_v51, 4  ;;  %v2042_v7 = vrot.slane %v2040_v29, 5  ;;  %v5059_v52 = vrot.slane %v2194_v1, 9  ;;  %5783 = vmatpush3.bf16.msra.mxu0 %v6128_v14  ;;  %v1916_v2 = vld [vmem:[#allocation2 + $0x84] sm:$0x1] }
 0x1d7   :  { %3995 = vmatmul.mubr.bf16.gmra.mrb[68].mxu1 %v5104_v8  ;;  %v2029_v46 = vor.u32 %v2028_v34, %v2025_v0  ;;  %v2048_v56 = vrot.slane %v2046_v54, 5  ;;  %v2259_v9 = vrot.slane %v7716_v49, 5  ;;  %v5060_v60 = vrot.slane %v2195_v35, 9  ;;  %5784 = vmatprep.subr.bf16.mxu0 %v6129_v31  ;;  %v6102_v4 = vld [vmem:[%s8688_s4 + $0x118] sm:$0xff]   ;;  %v7764_v38 = vld [vmem:[#allocation2 + $0x40] sm:$0xf] }
 0x1d8   :  { %v1782_v11 = vor.u32 %v1780_v15, %v1779_v22  ;;  %v1783_v43 = vrot.slane %v1779_v22, 4  ;;  %v2043_v17 = vor.u32 %v2042_v7, %v2039_v50  ;;  %v2263_v6 = vrot.slane %v1952_v30, 5  ;;  %5711 = vmatpush3.bf16.msra.mxu1 %v6098_v47  ;;  %v6109_v45 = vld [vmem:[%s8688_s4 + $0x160] sm:$0xff]   ;;  %v7775_v40 = vld [vmem:[#allocation2 + $0x30] sm:$0xf]  ;;  %v6117_v7 = vld [vmem:[%s8688_s4 + $0x168] sm:$0xff]  }
 0x1d9   :  { %v2030_v58 = vrot.slane %v2029_v46, 4  ;;  %v2260_v49 = vsel %vm7387_vm7, %v5059_v52, %v2259_v9  ;;  %v2422_v8 = vshrl.u32 %v2311_v24, 16  ;;  %v2425_v14 = vshll.u32 %v2311_v24, 16  ;;  %5712 = vmatprep.subr.bf16.mxu1 %v6101_v33  ;;  %v7789_v15 = vld [vmem:[#allocation2 + $0x38] sm:$0xf] }
 0x1da   :  { %v1914_v30 = vsel %vm7494_vm9, %v1782_v11, %v1913_v53  ;;  %v1917_v47 = vsel %vm7096_vm2, %v1783_v43, %v1916_v2  ;;  %v2044_v13 = vrot.slane %v2043_v17, 4  ;;  %v2264_v28 = vsel %vm7387_vm7, %v5060_v60, %v2263_v6  ;;  %5785 = vmatpush3.bf16.msra.mxu0 %v6130_v16  ;;  %v1953_v29 = vld [vmem:[#allocation2 + $0x34] sm:$0x1]  ;;  %v1954_v35 = vld [vmem:[#allocation2 + $0x3c] sm:$0x1] }
 0x1db   :  { %1915 = vst [vmem:[#allocation2 + $0x80] sm:$0xf] %v1914_v30  ;;  %1918 = vst [vmem:[#allocation2 + $0x84] sm:$0x1] %v1917_v47  ;;  %v7779_v1 = vrot.slane %v2397_v44, 5  ;;  %v7783_v39 = vrot.slane %v2408_v26, 4  ;;  %v5121_v25 = vcombine.low %v2260_v49, %v2264_v28  ;;  %5930 = vmatprep.subr.bf16.mxu0 %v7757_v41  ;;  %v2035_v51 = vsel %vm7540_vm12, %v2030_v58, %v2034_v59 }
 0x1dc   :  { %v7787_v31 = vrot.slane %v2411_v57, 5  ;;  %v2049_v12 = vsel %vm7540_vm12, %v2044_v13, %v2048_v56  ;;  %v7796_v44 = vrot.slane %v2422_v8, 4  ;;  %v5130_v26 = vcombine.low %v2311_v24, %v7764_v38  ;;  %5713 = vmatpush3.bf16.msra.mxu1 %v6102_v4  ;;  %v2196_v34 = vld [vmem:[#allocation2 + $0x30] sm:$0xe]  ;;  %v6110_v59 = vld [vmem:[%s8688_s4 + $0x120] sm:$0xff]   ;;  %v6118_v58 = vld [vmem:[%s8688_s4 + $0x128] sm:$0xff]  }
 0x1dd   :  { %v5113_v48 = vcombine.low %v2035_v51, %v2049_v12  ;;  %4100 = vmatmul.mubr.bf16.gmra.mrb[88].mxu0 %v5121_v25  ;;  %v2436_v57 = vshrl.u32 %v7764_v38, 16  ;;  %v2051_v53 = vshrl.u32 %v7775_v40, 16  ;;  %v2054_v0 = vshll.u32 %v7775_v40, 16  ;;  %5714 = vmatprep.subr.bf16.mxu1 %v6109_v45  ;;  %v2197_v50 = vld [vmem:[#allocation2 + $0x38] sm:$0xe]  ;;  %v6125_v30 = vld [vmem:[%s8688_s4 + $0x170] sm:$0xff]  }
 0x1de   :  { %v7805_v54 = vrot.slane %v2425_v14, 5  ;;  %v2439_v33 = vshll.u32 %v7764_v38, 16  ;;  %4107 = vmatprep.mubr.bf16.mxu0 %v5130_v26  ;;  %v5105_v16 = vcombine.low %v7714_v61, %v7722_v5  ;;  %v2065_v22 = vshrl.u32 %v7789_v15, 16  ;;  %v2313_v56 = vld [vmem:[#allocation2 + $0x58] sm:$0xf] }
 0x1df   :  { %4002 = vmatprep.mubr.bf16.mxu1 %v5113_v48  ;;  %v2053_v52 = vrot.slane %v2051_v53, 4  ;;  %v2056_v24 = vrot.slane %v2054_v0, 5  ;;  %v2060_v2 = vshll.u32 %v1953_v29, 16  ;;  %v2068_v46 = vshll.u32 %v7789_v15, 16  ;;  %v2314_v4 = vld [vmem:[#allocation2 + $0x60] sm:$0xf] }
 0x1e0   :  { %4003 = vmatmul.mubr.bf16.gmra.mrb[72].mxu1 %v5105_v16  ;;  %v2067_v9 = vrot.slane %v2065_v22, 4  ;;  %v2074_v60 = vshll.u32 %v1954_v35, 16  ;;  %v5061_v11 = vrot.slane %v2196_v34, 9  ;;  %v2267_v43 = vrot.slane %v1953_v29, 5  ;;  %v7822_v45 = vld [vmem:[#allocation2 + $0x58] sm:$0xf] }
 0x1e1   :  { %v7815_v61 = vrot.slane %v2436_v57, 4  ;;  %v2057_v5 = vor.u32 %v2056_v24, %v2053_v52  ;;  %v2070_v17 = vrot.slane %v2068_v46, 5  ;;  %v5062_v6 = vrot.slane %v2197_v50, 9  ;;  %5715 = vmatpush3.bf16.msra.mxu1 %v6110_v59  ;;  %v1956_v51 = vld [vmem:[#allocation2 + $0x5c] sm:$0x1] }
 0x1e2   :  { %v2268_v49 = vsel %vm7387_vm7, %v5061_v11, %v2267_v43  ;;  %v2271_v38 = vrot.slane %v1954_v35, 5  ;;  %v2450_v8 = vshrl.u32 %v2313_v56, 16  ;;  %v2453_v14 = vshll.u32 %v2313_v56, 16  ;;  %5716 = vmatprep.subr.bf16.mxu1 %v6117_v7  ;;  %v2199_v48 = vld [vmem:[#allocation2 + $0x58] sm:$0xe] }
 0x1e3   :  { %v7827_v47 = vrot.slane %v2439_v33, 5  ;;  %v2058_v13 = vrot.slane %v2057_v5, 4  ;;  %v2062_v28 = vrot.slane %v2060_v2, 5  ;;  %v2071_v25 = vor.u32 %v2070_v17, %v2067_v9  ;;  %v7835_v59 = vld [vmem:[#allocation2 + $0x68] sm:$0xf]  ;;  %v6126_v33 = vld [vmem:[%s8688_s4 + $0x130] sm:$0xff]  }
 0x1e4   :  { %v2076_v12 = vrot.slane %v2074_v60, 5  ;;  %v2272_v26 = vsel %vm7387_vm7, %v5062_v6, %v2271_v38  ;;  %v2464_v29 = vshrl.u32 %v2314_v4, 16  ;;  %v2467_v35 = vshll.u32 %v2314_v4, 16  ;;  %v7844_v52 = vld [vmem:[#allocation2 + $0x70] sm:$0xf]  ;;  %v6132_v24 = vld [vmem:[%s8688_s4 + $0x178] sm:$0xff]  }
 0x1e5   :  { %v2063_v57 = vsel %vm7540_vm12, %v2058_v13, %v2062_v28  ;;  %v2072_v53 = vrot.slane %v2071_v25, 4  ;;  %v5122_v0 = vcombine.low %v2268_v49, %v2272_v26  ;;  %v7833_v34 = vrot.slane %v2450_v8, 4  ;;  %5717 = vmatpush3.bf16.msra.mxu1 %v6118_v58  ;;  %v6133_v17 = vld [vmem:[%s8688_s4 + $0x138] sm:$0xff]   ;;  %v7861_v38 = vld [vmem:[#allocation2 + $0x60] sm:$0xf] }
 0x1e6   :  { %v7840_v16 = vrot.slane %v2453_v14, 5  ;;  %v5131_v22 = vcombine.low %v2313_v56, %v2314_v4  ;;  %v2093_v50 = vshrl.u32 %v7822_v45, 16  ;;  %v2096_v7 = vshll.u32 %v7822_v45, 16  ;;  %5718 = vmatprep.subr.bf16.mxu1 %v6125_v30  ;;  %v7863_v8 = vld [vmem:[#allocation2 + $0x68] sm:$0xf] }
 0x1e7   :  { %v2077_v2 = vsel %vm7540_vm12, %v2072_v53, %v2076_v12  ;;  %4108 = vmatmul.mubr.bf16.gmra.mrb[92].mxu0 %v5122_v0  ;;  %v2102_v46 = vshll.u32 %v1956_v51, 16  ;;  %v5064_v9 = vrot.slane %v2199_v48, 9  ;;  %v2279_v60 = vrot.slane %v1956_v51, 5 }
 0x1e8   :  { %v5114_v11 = vcombine.low %v2063_v57, %v2077_v2  ;;  %4115 = vmatprep.mubr.bf16.mxu0 %v5131_v22  ;;  %v2095_v56 = vrot.slane %v2093_v50, 4  ;;  %v2098_v43 = vrot.slane %v2096_v7, 5  ;;  %v2478_v5 = vshrl.u32 %v7835_v59, 16  ;;  %v1958_v57 = vld [vmem:[#allocation2 + $0x6c] sm:$0x1] }
 0x1e9   :  { %v5106_v6 = vcombine.low %v7775_v40, %v7789_v15  ;;  %v2280_v4 = vsel %vm7387_vm7, %v5064_v9, %v2279_v60  ;;  %v2481_v58 = vshll.u32 %v7835_v59, 16  ;;  %v2492_v49 = vshrl.u32 %v7844_v52, 16  ;;  %5719 = vmatpush3.bf16.msra.mxu1 %v6126_v33  ;;  %v1957_v40 = vld [vmem:[#allocation2 + $0x64] sm:$0x1]  ;;  %v2201_v7 = vld [vmem:[#allocation2 + $0x68] sm:$0xe] }
 0x1ea   :  { %4010 = vmatprep.mubr.bf16.mxu1 %v5114_v11  ;;  %v7865_v14 = vrot.slane %v2464_v29, 4  ;;  %v7867_v30 = vrot.slane %v2467_v35, 5  ;;  %v2099_v13 = vor.u32 %v2098_v43, %v2095_v56  ;;  %v2104_v28 = vrot.slane %v2102_v46, 5  ;;  %5720 = vmatprep.subr.bf16.mxu1 %v6132_v24  ;;  %v7872_v15 = vld [vmem:[%s8688_s4 + $0x200] sm:$0xff]   ;;  %v2317_v60 = vld [vmem:[#allocation2 + $0x78] sm:$0xf] }
 0x1eb   :  { %4011 = vmatmul.mubr.bf16.gmra.mrb[76].mxu1 %v5106_v6  ;;  %v5123_v25 = vcombine.low %v7567_v62, %v2280_v4  ;;  %v7875_v51 = vrot.slane %v2478_v5, 4  ;;  %v7877_v12 = vrot.slane %v2481_v58, 5  ;;  %v2495_v26 = vshll.u32 %v7844_v52, 16  ;;  %v2200_v29 = vld [vmem:[#allocation2 + $0x60] sm:$0xe] }
 0x1ec   :  { %v2100_v35 = vrot.slane %v2099_v13, 4  ;;  %v7880_v48 = vrot.slane %v2492_v49, 4  ;;  %v2107_v53 = vshrl.u32 %v7861_v38, 16  ;;  %v2110_v0 = vshll.u32 %v7861_v38, 16  ;;  %v6286_v43 = vld [vmem:[#allocation2 + $0x50] sm:$0xf] }
 0x1ed   :  { %v5132_v33 = vcombine.low %v7835_v59, %v7844_v52  ;;  %v2116_v22 = vshll.u32 %v1957_v40, 16  ;;  %v2121_v62 = vshrl.u32 %v7863_v8, 16  ;;  %v2124_v50 = vshll.u32 %v7863_v8, 16  ;;  %5721 = vmatpush3.bf16.msra.mxu1 %v6133_v17  ;;  %v2318_v58 = vld [vmem:[#allocation2 + $0x80] sm:$0xf] }
 0x1ee   :  { %v2105_v24 = vsel %vm7540_vm12, %v2100_v35, %v2104_v28  ;;  %v2109_v2 = vrot.slane %v2107_v53, 4  ;;  %v2112_v46 = vrot.slane %v2110_v0, 5  ;;  %v5065_v9 = vrot.slane %v2200_v29, 9  ;;  %5898 = vmatprep.subr.bf16.mxu1 %v7872_v15  ;;  %v7897_v35 = vld [vmem:[#allocation2 + $0x70] sm:$0xf] }
 0x1ef   :  { %v5115_v59 = vcombine.low %v2091_v18, %v2105_v24  ;;  %4116 = vmatmul.mubr.bf16.gmra.mrb[96].mxu0 %v5123_v25  ;;  %v2123_v52 = vrot.slane %v2121_v62, 4  ;;  %v2126_v11 = vrot.slane %v2124_v50, 5  ;;  %v2130_v56 = vshll.u32 %v1958_v57, 16  ;;  %v1959_v53 = vld [vmem:[#allocation2 + $0x74] sm:$0x1] }
 0x1f0   :  { %4123 = vmatprep.mubr.bf16.mxu0 %v5132_v33  ;;  %v5107_v5 = vcombine.low %v6286_v43, %v7822_v45  ;;  %v2113_v17 = vor.u32 %v2112_v46, %v2109_v2  ;;  %v2283_v6 = vrot.slane %v1957_v40, 5  ;;  %v5066_v4 = vrot.slane %v2201_v7, 9  ;;  %v7903_v62 = vld [vmem:[#allocation2 + $0x78] sm:$0xf]  ;;  %v1960_v7 = vld [vmem:[#allocation2 + $0x7c] sm:$0x1] }
 0x1f1   :  { %4018 = vmatprep.mubr.bf16.mxu1 %v5115_v59  ;;  %v2127_v49 = vor.u32 %v2126_v11, %v2123_v52  ;;  %v2287_v13 = vrot.slane %v1958_v57, 5  ;;  %v2506_v28 = vshrl.u32 %v2317_v60, 16  ;;  %v2509_v29 = vshll.u32 %v2317_v60, 16  ;;  %v2202_v24 = vld [vmem:[#allocation2 + $0x70] sm:$0xe] }
 0x1f2   :  { %v7899_v42 = vrot.slane %v2495_v26, 5  ;;  %v2114_v37 = vrot.slane %v2113_v17, 4  ;;  %v2118_v18 = vrot.slane %v2116_v22, 5  ;;  %v2284_v25 = vsel %vm7387_vm7, %v5065_v9, %v2283_v6 }
 0x1f3   :  { %4019 = vmatmul.mubr.bf16.gmra.mrb[80].mxu1 %v5107_v5  ;;  %v2128_v45 = vrot.slane %v2127_v49, 4  ;;  %v2132_v40 = vrot.slane %v2130_v56, 5  ;;  %v2520_v0 = vshrl.u32 %v2318_v58, 16  ;;  %v2523_v33 = vshll.u32 %v2318_v58, 16  ;;  %v2203_v5 = vld [vmem:[#allocation2 + $0x78] sm:$0xe] }
 0x1f4   :  { %v2119_v57 = vsel %vm7540_vm12, %v2114_v37, %v2118_v18  ;;  %v2288_v26 = vsel %vm7387_vm7, %v5066_v4, %v2287_v13  ;;  %v7909_v50 = vrot.slane %v2506_v28, 4  ;;  %v7911_v22 = vrot.slane %v2509_v29, 5  ;;  %v7919_v13 = vld [vmem:[#allocation2 + $0x88] sm:$0xf] }
 0x1f5   :  { %v2133_v2 = vsel %vm7540_vm12, %v2128_v45, %v2132_v40  ;;  %v5124_v46 = vcombine.low %v2284_v25, %v2288_v26  ;;  %v5133_v9 = vcombine.low %v2317_v60, %v2318_v58  ;;  %v2135_v59 = vshrl.u32 %v7897_v35, 16  ;;  %v7925_v40 = vld [vmem:[#allocation2 + $0x90] sm:$0xf] }
 0x1f6   :  { %v5116_v52 = vcombine.low %v2119_v57, %v2133_v2  ;;  %v2138_v11 = vshll.u32 %v7897_v35, 16  ;;  %v2144_v56 = vshll.u32 %v1959_v53, 16  ;;  %v2149_v43 = vshrl.u32 %v7903_v62, 16 }
 0x1f7   :  { %4124 = vmatmul.mubr.bf16.gmra.mrb[100].mxu0 %v5124_v46  ;;  %v2137_v17 = vrot.slane %v2135_v59, 4  ;;  %v2152_v6 = vshll.u32 %v7903_v62, 16  ;;  %v2158_v4 = vshll.u32 %v1960_v7, 16  ;;  %v5067_v49 = vrot.slane %v2202_v24, 9 }
 0x1f8   :  { %4026 = vmatprep.mubr.bf16.mxu1 %v5116_v52  ;;  %v7921_v28 = vrot.slane %v2520_v0, 4  ;;  %4131 = vmatprep.mubr.bf16.mxu0 %v5133_v9  ;;  %v2140_v60 = vrot.slane %v2138_v11, 5  ;;  %v2151_v58 = vrot.slane %v2149_v43, 4  ;;  %v2291_v29 = vrot.slane %v1959_v53, 5  ;;  %v1961_v11 = vld [vmem:[#allocation2 + $0x84] sm:$0x1] }
 0x1f9   :  { %v5108_v37 = vcombine.low %v7861_v38, %v7863_v8  ;;  %v2154_v18 = vrot.slane %v2152_v6, 5  ;;  %v5068_v25 = vrot.slane %v2203_v5, 9  ;;  %v2295_v45 = vrot.slane %v1960_v7, 5  ;;  %v7934_v8 = vld [vmem:[#allocation2 + $0x80] sm:$0xf] }
 0x1fa   :  { %8706 = vst [vmem:[#allocation6_spill] sm:$0xff] %v7921_v28  ;;  %v7927_v57 = vrot.slane %v2523_v33, 5  ;;  %v2141_v26 = vor.u32 %v2140_v60, %v2137_v17  ;;  %v2146_v24 = vrot.slane %v2144_v56, 5  ;;  %v2534_v2 = vshrl.u32 %v7919_v13, 16  ;;  %v7936_v7 = vld [vmem:[#allocation2 + $0x88] sm:$0xf] }
 0x1fb   :  { %4027 = vmatmul.mubr.bf16.gmra.mrb[84].mxu1 %v5108_v37  ;;  %v2155_v0 = vor.u32 %v2154_v18, %v2151_v58  ;;  %v2160_v46 = vrot.slane %v2158_v4, 5  ;;  %v2292_v53 = vsel %vm7387_vm7, %v5067_v49, %v2291_v29  ;;  %v2296_v38 = vsel %vm7387_vm7, %v5068_v25, %v2295_v45  ;;  %v1962_v6 = vld [vmem:[#allocation2 + $0x8c] sm:$0x1]  ;;  %v2204_v29 = vld [vmem:[#allocation2 + $0x80] sm:$0xe] }
 0x1fc   :  { %8707 = vst [vmem:[#allocation7_spill] sm:$0xff] %v7927_v57  ;;  %v2142_v9 = vrot.slane %v2141_v26, 4  ;;  %v2537_v33 = vshll.u32 %v7919_v13, 16  ;;  %v2548_v59 = vshrl.u32 %v7925_v40, 16  ;;  %v5125_v43 = vcombine.low %v2292_v53, %v2296_v38  ;;  %v7951_v37 = vld [vmem:[#allocation2 + $0x10] sm:$0xf] }
 0x1fd   :  { %v2156_v56 = vrot.slane %v2155_v0, 4  ;;  %v7941_v5 = vrot.slane %v2534_v2, 4  ;;  %v5134_v17 = vcombine.low %v7919_v13, %v7925_v40  ;;  %v5109_v49 = vcombine.low %v7897_v35, %v7903_v62  ;;  %v2205_v26 = vld [vmem:[#allocation2 + $0x88] sm:$0xe]  ;;  %v7957_v0 = vld [vmem:[#allocation2 + $0x18] sm:$0xf] }
 0x1fe   :  { %v2147_v4 = vsel %vm7540_vm12, %v2142_v9, %v2146_v24  ;;  %v2163_v60 = vshrl.u32 %v7934_v8, 16  ;;  %v2166_v58 = vshll.u32 %v7934_v8, 16  ;;  %v2172_v25 = vshll.u32 %v1961_v11, 16 }
 0x1ff   :  { %8708 = vst [vmem:[#allocation8_spill] sm:$0xff] %v7941_v5  ;;  %v2161_v18 = vsel %vm7540_vm12, %v2156_v56, %v2160_v46  ;;  %4132 = vmatmul.mubr.bf16.gmra.mrb[104].mxu0 %v5125_v43  ;;  %v2177_v13 = vshrl.u32 %v7936_v7, 16  ;;  %v2180_v45 = vshll.u32 %v7936_v7, 16  ;;  %v2186_v2 = vshll.u32 %v1962_v6, 16  ;;  %v7959_v5 = vld [vmem:[#allocation2 + $0x14] sm:$0x1] }
 0x200   :  { %v5117_v24 = vcombine.low %v2147_v4, %v2161_v18  ;;  %4139 = vmatprep.mubr.bf16.mxu0 %v5134_v17  ;;  %v2165_v35 = vrot.slane %v2163_v60, 4  ;;  %v2168_v62 = vrot.slane %v2166_v58, 5  ;;  %v2174_v53 = vrot.slane %v2172_v25, 5  ;;  %8709 = vst [vmem:[#allocation9_spill] sm:$0xff] %v7959_v5  ;;  %v7965_v25 = vld [vmem:[#allocation2 + $0x1c] sm:$0x1] }
 0x201   :  { %v2179_v38 = vrot.slane %v2177_v13, 4  ;;  %v2182_v9 = vrot.slane %v2180_v45, 5  ;;  %v5069_v52 = vrot.slane %v2204_v29, 9  ;;  %v2188_v56 = vrot.slane %v2186_v2, 5  ;;  %8710 = vst [vmem:[#allocation10_spill] sm:$0xff] %v7965_v25 }
 0x202   :  { %4034 = vmatprep.mubr.bf16.mxu1 %v5117_v24  ;;  %v2169_v46 = vor.u32 %v2168_v62, %v2165_v35  ;;  %v2299_v43 = vrot.slane %v1961_v11, 5  ;;  %v5070_v57 = vrot.slane %v2205_v26, 9  ;;  %v2303_v4 = vrot.slane %v1962_v6, 5  ;;  %v2321_v26 = vld [vmem:[#allocation2 + $0xc] sm:$0x1] }
 0x203   :  { %4035 = vmatmul.mubr.bf16.gmra.mrb[88].mxu1 %v5109_v49  ;;  %v2183_v28 = vor.u32 %v2182_v9, %v2179_v38  ;;  %v2707_v17 = vshrl.u32 %v7951_v37, 16  ;;  %v2710_v60 = vshll.u32 %v7951_v37, 16  ;;  %v2716_v29 = vshll.u32 %v7959_v5, 16  ;;  %v2561_v2 = vld [vmem:[#allocation2 + $0x8] sm:$0xe] }
 0x204   :  { %v2170_v58 = vrot.slane %v2169_v46, 4  ;;  %v2300_v18 = vsel %vm7387_vm7, %v5069_v52, %v2299_v43  ;;  %v2721_v13 = vshrl.u32 %v7957_v0, 16  ;;  %v2304_v11 = vsel %vm7387_vm7, %v5070_v57, %v2303_v4  ;;  %v2322_v57 = vld [vmem:[#allocation2 + $0x14] sm:$0x1]  ;;  %v2562_v43 = vld [vmem:[#allocation2 + $0x10] sm:$0xe] }
 0x205   :  { %v2184_v45 = vrot.slane %v2183_v28, 4  ;;  %v2709_v49 = vrot.slane %v2707_v17, 4  ;;  %v2712_v6 = vrot.slane %v2710_v60, 5  ;;  %v7971_v24 = vrot.slane %v2537_v33, 5 }
 0x206   :  { %v2175_v35 = vsel %vm7540_vm12, %v2170_v58, %v2174_v53  ;;  %v5126_v62 = vcombine.low %v2300_v18, %v2304_v11  ;;  %v2723_v52 = vrot.slane %v2721_v13, 4  ;;  %v2724_v28 = vshll.u32 %v7957_v0, 16  ;;  %v7981_v53 = vld [vmem:[#allocation2 + $0x20] sm:$0xf] }
 0x207   :  { %v2189_v38 = vsel %vm7540_vm12, %v2184_v45, %v2188_v56  ;;  %v2713_v9 = vor.u32 %v2712_v6, %v2709_v49  ;;  %v2730_v46 = vshll.u32 %v7965_v25, 16  ;;  %v7979_v4 = vrot.slane %v2548_v59, 4  ;;  %v7985_v45 = vld [vmem:[#allocation2 + $0x24] sm:$0x1]  ;;  %v7987_v25 = vld [vmem:[#allocation2 + $0x28] sm:$0xf] }
 0x208   :  { %v5118_v33 = vcombine.low %v2175_v35, %v2189_v38  ;;  %4140 = vmatmul.mubr.bf16.gmra.mrb[108].mxu0 %v5126_v62  ;;  %v2718_v17 = vrot.slane %v2716_v29, 5  ;;  %v2347_v60 = vshll.u32 %v2321_v26, 16  ;;  %v2726_v18 = vrot.slane %v2724_v28, 5 }
 0x209   :  { %v2714_v58 = vrot.slane %v2713_v9, 4  ;;  %v5110_v56 = vcombine.low %v7934_v8, %v7936_v7  ;;  %v5071_v13 = vrot.slane %v2561_v2, 9  ;;  %v2732_v11 = vrot.slane %v2730_v46, 5  ;;  %v7993_v7 = vld [vmem:[#allocation2 + $0x2c] sm:$0x1] }
 0x20a   :  { %4042 = vmatprep.mubr.bf16.mxu1 %v5118_v33  ;;  %v2361_v49 = vshll.u32 %v2322_v57, 16  ;;  %v2611_v6 = vrot.slane %v2321_v26, 5  ;;  %v5072_v59 = vrot.slane %v2562_v43, 9  ;;  %v2727_v35 = vor.u32 %v2726_v18, %v2723_v52 }
 0x20b   :  { %v2719_v29 = vsel %vm7540_vm12, %v2714_v58, %v2718_v17  ;;  %4043 = vmatmul.mubr.bf16.gmra.mrb[92].mxu1 %v5110_v56  ;;  %v2349_v62 = vrot.slane %v2347_v60, 5  ;;  %v2615_v38 = vrot.slane %v2322_v57, 5  ;;  %v2735_v2 = vshrl.u32 %v7981_v53, 16  ;;  %v8002_v58 = vld [vmem:[#allocation2 + $0x1c] sm:$0x1] }
 0x20c   :  { %v2612_v8 = vsel %vm7387_vm7, %v5071_v13, %v2611_v6  ;;  %v2738_v9 = vshll.u32 %v7981_v53, 16  ;;  %v2744_v26 = vshll.u32 %v7985_v45, 16  ;;  %v2728_v28 = vrot.slane %v2727_v35, 4  ;;  %v2563_v35 = vld [vmem:[#allocation2 + $0x18] sm:$0xe] }
 0x20d   :  { %v2616_v46 = vsel %vm7387_vm7, %v5072_v59, %v2615_v38  ;;  %v2749_v52 = vshrl.u32 %v7987_v25, 16  ;;  %v2752_v43 = vshll.u32 %v7987_v25, 16  ;;  %v2363_v57 = vrot.slane %v2361_v49, 5 }
 0x20e   :  { %v5143_v33 = vcombine.low %v2612_v8, %v2616_v46  ;;  %v2737_v17 = vrot.slane %v2735_v2, 4  ;;  %v2740_v60 = vrot.slane %v2738_v9, 5  ;;  %v2733_v18 = vsel %vm7540_vm12, %v2728_v28, %v2732_v11  ;;  %v8009_v8 = vld [vmem:[#allocation2 + $0x24] sm:$0x1]  ;;  %v2564_v2 = vld [vmem:[#allocation2 + $0x20] sm:$0xe] }
 0x20f   :  { %v2751_v56 = vrot.slane %v2749_v52, 4  ;;  %v2754_v13 = vrot.slane %v2752_v43, 5  ;;  %v2758_v6 = vshll.u32 %v7993_v7, 16  ;;  %v5159_v5 = vcombine.low %v2719_v29, %v2733_v18  ;;  %v8017_v29 = vld [vmem:[#allocation2 + $0x30] sm:$0xf] }
 0x210   :  { %4180 = vmatprep.mubr.bf16.mxu1 %v5143_v33  ;;  %v5151_v59 = vcombine.low %v7951_v37, %v7957_v0  ;;  %v2741_v38 = vor.u32 %v2740_v60, %v2737_v17  ;;  %v2746_v49 = vrot.slane %v2744_v26, 5  ;;  %v2350_v11 = vsel %vm7540_vm12, %v7570_v27, %v2349_v62  ;;  %v8019_v52 = vld [vmem:[#allocation2 + $0x38] sm:$0xf]  ;;  %v8024_v37 = vld [vmem:[%s8691_s7 + $0x8] sm:$0xff]   ;;  %v8027_v27 = vld [vmem:[#allocation2 + $0x34] sm:$0x1] }
 0x211   :  { %v2755_v9 = vor.u32 %v2754_v13, %v2751_v56  ;;  %v2760_v46 = vrot.slane %v2758_v6, 5  ;;  %v2364_v28 = vsel %vm7540_vm12, %v7577_v21, %v2363_v57  ;;  %4277 = vmatprep.mubr.bf16.mxu0 %v5159_v5  ;;  %v5073_v43 = vrot.slane %v2563_v35, 9  ;;  %v6137_v21 = vld [vmem:[%s8688_s4 + $0x208] sm:$0xff]   ;;  %v8039_v56 = vld [vmem:[#allocation2 + $0x3c] sm:$0x1] }
 0x212   :  { %v2742_v0 = vrot.slane %v2741_v38, 4  ;;  %v5135_v26 = vcombine.low %v2350_v11, %v2364_v28  ;;  %v2619_v33 = vrot.slane %v8002_v58, 5  ;;  %4278 = vmatmul.mubr.bf16.vlgmr.msra.gmra.mrb[112].mxu0 %v5151_v59  ;;  %v5074_v57 = vrot.slane %v2564_v2, 9 }
 0x213   :  { %v2756_v62 = vrot.slane %v2755_v9, 4  ;;  %v2623_v17 = vrot.slane %v8009_v8, 5  ;;  %v5152_v60 = vcombine.low %v7981_v53, %v7987_v25  ;;  %v2763_v13 = vshrl.u32 %v8017_v29, 16  ;;  %5931 = vmatpush3.bf16.msra.mxu0 %v7757_v41  ;;  %v2565_v41 = vld [vmem:[#allocation2 + $0x28] sm:$0xe] }
 0x214   :  { %v2747_v5 = vsel %vm7540_vm12, %v2742_v0, %v2746_v49  ;;  %4181 = vmatmul.mubr.bf16.vlgmr.msra.gmra.mrb[96].mxu1 %v5135_v26  ;;  %v2620_v18 = vsel %vm7387_vm7, %v5073_v43, %v2619_v33  ;;  %v2766_v6 = vshll.u32 %v8017_v29, 16  ;;  %v2772_v53 = vshll.u32 %v8027_v27, 16  ;;  %5932 = vmatprep.subr.bf16.mxu0 %v8024_v37  ;;  %v8062_v43 = vld [vmem:[#allocation2 + $0x2c] sm:$0x1] }
 0x215   :  { %v2761_v35 = vsel %vm7540_vm12, %v2756_v62, %v2760_v46  ;;  %v2624_v25 = vsel %vm7387_vm7, %v5074_v57, %v2623_v17  ;;  %5899 = vmatpush3.bf16.msra.mxu1 %v7872_v15  ;;  %v2777_v59 = vshrl.u32 %v8019_v52, 16  ;;  %v2765_v2 = vrot.slane %v2763_v13, 4  ;;  %v6139_v46 = vld [vmem:[%s8688_s4 + $0x210] sm:$0xff]  }
 0x216   :  { %v5160_v38 = vcombine.low %v2747_v5, %v2761_v35  ;;  %v5144_v49 = vcombine.low %v2620_v18, %v2624_v25  ;;  %v2768_v9 = vrot.slane %v2766_v6, 5  ;;  %5900 = vmatprep.subr.bf16.mxu1 %v6137_v21  ;;  %v8058_v15 = vld [vmem:[%s8691_s7 + $0x10] sm:$0xff]   ;;  %v2774_v11 = vrot.slane %v2772_v53, 5  ;;  %v8072_v53 = vld [vmem:[#allocation2 + $0x40] sm:$0xf] }
 0x217   :  { %v2779_v28 = vrot.slane %v2777_v59, 4  ;;  %v2780_v0 = vshll.u32 %v8019_v52, 16  ;;  %v2786_v26 = vshll.u32 %v8039_v56, 16  ;;  %v2372_v62 = vor.u32 %v7594_v23, %v7587_v3  ;;  %v8069_v5 = vld [vmem:[#allocation2 + $0x34] sm:$0x1]  ;;  %5933 = vmatpush3.bf16.msra.mxu0 %v8024_v37 }
 0x218   :  { %4285 = vmatprep.mubr.bf16.mxu0 %v5160_v38  ;;  %4188 = vmatprep.mubr.bf16.mxu1 %v5144_v49  ;;  %v2769_v33 = vor.u32 %v2768_v9, %v2765_v2  ;;  %v2375_v57 = vshll.u32 %v8002_v58, 16  ;;  %v2386_v17 = vor.u32 %v7698_v36, %v7688_v63  ;;  %v2566_v18 = vld [vmem:[#allocation2 + $0x30] sm:$0xe]  ;;  %v2389_v35 = vshll.u32 %v8009_v8, 16  ;;  %v6141_v63 = vld [vmem:[%s8688_s4 + $0x218] sm:$0xff]  }
 0x219   :  { %v2782_v13 = vrot.slane %v2780_v0, 5  ;;  %v2788_v6 = vrot.slane %v2786_v26, 5  ;;  %v5075_v25 = vrot.slane %v2565_v41, 9  ;;  %5901 = vmatpush3.bf16.msra.mxu1 %v6137_v21  ;;  %v2373_v3 = vrot.slane %v2372_v62, 4  ;;  %5934 = vmatprep.subr.bf16.mxu0 %v8058_v15  ;;  %v8082_v36 = vld [vmem:[%s8691_s7 + $0x18] sm:$0xff]  }
 0x21a   :  { %v2770_v59 = vrot.slane %v2769_v33, 4  ;;  %v2377_v23 = vrot.slane %v2375_v57, 5  ;;  %v2387_v58 = vrot.slane %v2386_v17, 4  ;;  %5902 = vmatprep.subr.bf16.mxu1 %v6139_v46  ;;  %4286 = vmatmul.mubr.bf16.gmra.mrb[116].mxu0 %v5152_v60  ;;  %v2391_v21 = vrot.slane %v2389_v35, 5  ;;  %v8085_v2 = vld [vmem:[#allocation2 + $0x44] sm:$0x1] }
 0x21b   :  { %v2783_v8 = vor.u32 %v2782_v13, %v2779_v28  ;;  %v2627_v38 = vrot.slane %v8062_v43, 5  ;;  %v5076_v49 = vrot.slane %v2566_v18, 9  ;;  %v2631_v0 = vrot.slane %v8069_v5, 5  ;;  %v8094_v33 = vld [vmem:[#allocation2 + $0x48] sm:$0xf]  ;;  %5935 = vmatpush3.bf16.msra.mxu0 %v8058_v15  ;;  %v6143_v18 = vld [vmem:[%s8688_s4 + $0x220] sm:$0xff]  }
 0x21c   :  { %v2775_v9 = vsel %vm7540_vm12, %v2770_v59, %v2774_v11  ;;  %v2378_v41 = vsel %vm7540_vm12, %v2373_v3, %v2377_v23  ;;  %v5153_v26 = vcombine.low %v8017_v29, %v8019_v52  ;;  %v2392_v28 = vsel %vm7540_vm12, %v2387_v58, %v2391_v21  ;;  %5936 = vmatprep.subr.bf16.mxu0 %v8082_v36  ;;  %v8112_v35 = vld [vmem:[#allocation2 + $0x4c] sm:$0x1]  ;;  %v2567_v21 = vld [vmem:[#allocation2 + $0x38] sm:$0xe] }
 0x21d   :  { %v2784_v60 = vrot.slane %v2783_v8, 4  ;;  %v2628_v62 = vsel %vm7387_vm7, %v5075_v25, %v2627_v38  ;;  %v2791_v57 = vshrl.u32 %v8072_v53, 16  ;;  %5903 = vmatpush3.bf16.msra.mxu1 %v6139_v46  ;;  %v5136_v11 = vcombine.low %v2378_v41, %v2392_v28  ;;  %v8119_v38 = vld [vmem:[%s8688_s4 + $0x228] sm:$0xff]  }
 0x21e   :  { %v2632_v17 = vsel %vm7387_vm7, %v5076_v49, %v2631_v0  ;;  %v2794_v29 = vshll.u32 %v8072_v53, 16  ;;  %v2800_v52 = vshll.u32 %v8085_v2, 16  ;;  %5904 = vmatprep.subr.bf16.mxu1 %v6141_v63  ;;  %v2805_v59 = vshrl.u32 %v8094_v33, 16  ;;  %v8125_v0 = vld [vmem:[#allocation2 + $0x3c] sm:$0x1] }
 0x21f   :  { %v2789_v46 = vsel %vm7540_vm12, %v2784_v60, %v2788_v6  ;;  %v5145_v13 = vcombine.low %v2628_v62, %v2632_v17  ;;  %v2793_v25 = vrot.slane %v2791_v57, 4  ;;  %4189 = vmatmul.mubr.bf16.gmra.mrb[100].mxu1 %v5136_v11  ;;  %v2808_v8 = vshll.u32 %v8094_v33, 16  ;;  %v8130_v60 = vld [vmem:[%s8691_s7 + $0x20] sm:$0xff]   ;;  %5937 = vmatpush3.bf16.msra.mxu0 %v8082_v36 }
 0x220   :  { %v5161_v3 = vcombine.low %v2775_v9, %v2789_v46  ;;  %v2796_v23 = vrot.slane %v2794_v29, 5  ;;  %v2802_v58 = vrot.slane %v2800_v52, 5  ;;  %v2807_v6 = vrot.slane %v2805_v59, 4  ;;  %v8135_v17 = vld [vmem:[#allocation2 + $0x44] sm:$0x1]  ;;  %5938 = vmatprep.subr.bf16.mxu0 %v8130_v60 }
 0x221   :  { %4196 = vmatprep.mubr.bf16.mxu1 %v5145_v13  ;;  %v2814_v49 = vshll.u32 %v8112_v35, 16  ;;  %v2400_v41 = vor.u32 %v7779_v1, %v7718_v20  ;;  %v2403_v9 = vshll.u32 %v8062_v43, 16  ;;  %5905 = vmatpush3.bf16.msra.mxu1 %v6141_v63  ;;  %v2810_v62 = vrot.slane %v2808_v8, 5  ;;  %v2568_v20 = vld [vmem:[#allocation2 + $0x40] sm:$0xe]  ;;  %v8152_v8 = vld [vmem:[%s8691_s7 + $0x28] sm:$0xff]  }
 0x222   :  { %4293 = vmatprep.mubr.bf16.mxu0 %v5161_v3  ;;  %v2797_v28 = vor.u32 %v2796_v23, %v2793_v25  ;;  %v2414_v57 = vor.u32 %v7787_v31, %v7783_v39  ;;  %v2417_v11 = vshll.u32 %v8069_v5, 16  ;;  %5906 = vmatprep.subr.bf16.mxu1 %v6143_v18  ;;  %v5077_v29 = vrot.slane %v2567_v21, 9  ;;  %v8137_v52 = vld [vmem:[#allocation2 + $0x60] sm:$0xf]  ;;  %v8139_v3 = vld [vmem:[#allocation2 + $0x64] sm:$0x1] }
 0x223   :  { %4294 = vmatmul.mubr.bf16.gmra.mrb[120].mxu0 %v5153_v26  ;;  %v2816_v1 = vrot.slane %v2814_v49, 5  ;;  %v2401_v43 = vrot.slane %v2400_v41, 4  ;;  %v2405_v63 = vrot.slane %v2403_v9, 5  ;;  %v2811_v13 = vor.u32 %v2810_v62, %v2807_v6  ;;  %v8160_v41 = vld [vmem:[#allocation2 + $0x68] sm:$0xf] }
 0x224   :  { %v2798_v46 = vrot.slane %v2797_v28, 4  ;;  %v2415_v25 = vrot.slane %v2414_v57, 4  ;;  %v2419_v59 = vrot.slane %v2417_v11, 5  ;;  %v8711_v39 = vshll.u32 %v7925_v40, 16  ;;  %v8167_v62 = vld [vmem:[#allocation2 + $0x6c] sm:$0x1]  ;;  %5939 = vmatpush3.bf16.msra.mxu0 %v8130_v60 }
 0x225   :  { %v2635_v5 = vrot.slane %v8125_v0, 5  ;;  %v5078_v26 = vrot.slane %v2568_v20, 9  ;;  %v2639_v23 = vrot.slane %v8135_v17, 5  ;;  %5907 = vmatpush3.bf16.msra.mxu1 %v6143_v18  ;;  %v2812_v6 = vrot.slane %v2811_v13, 4  ;;  %v6150_v57 = vld [vmem:[%s8688_s4 + $0x230] sm:$0xff]   ;;  %5940 = vmatprep.subr.bf16.mxu0 %v8152_v8 }
 0x226   :  { %v8144_v31 = vrot.slane %v8711_v39, 5  ;;  %v2803_v21 = vsel %vm7540_vm12, %v2798_v46, %v2802_v58  ;;  %v2406_v40 = vsel %vm7540_vm12, %v2401_v43, %v2405_v63  ;;  %v2420_v49 = vsel %vm7540_vm12, %v2415_v25, %v2419_v59  ;;  %5908 = vmatprep.subr.bf16.mxu1 %v8119_v38  ;;  %v8180_v59 = vld [vmem:[#allocation2 + $0x5c] sm:$0x1] }
 0x227   :  { %v5137_v18 = vcombine.low %v2406_v40, %v2420_v49  ;;  %v2636_v9 = vsel %vm7387_vm7, %v5077_v29, %v2635_v5  ;;  %v2640_v28 = vsel %vm7387_vm7, %v5078_v26, %v2639_v23  ;;  %v2819_v58 = vshrl.u32 %v8137_v52, 16  ;;  %v2569_v23 = vld [vmem:[#allocation2 + $0x58] sm:$0xe] }
 0x228   :  { %v2817_v11 = vsel %vm7540_vm12, %v2812_v6, %v2816_v1  ;;  %v5146_v20 = vcombine.low %v2636_v9, %v2640_v28  ;;  %v2822_v43 = vshll.u32 %v8137_v52, 16  ;;  %v2828_v63 = vshll.u32 %v8139_v3, 16  ;;  %v8201_v28 = vld [vmem:[#allocation2 + $0x64] sm:$0x1]  ;;  %5941 = vmatpush3.bf16.msra.mxu0 %v8152_v8 }
 0x229   :  { %v5162_v29 = vcombine.low %v2803_v21, %v2817_v11  ;;  %4197 = vmatmul.mubr.bf16.gmra.mrb[104].mxu1 %v5137_v18  ;;  %v2821_v46 = vrot.slane %v2819_v58, 4  ;;  %v2833_v13 = vshrl.u32 %v8160_v41, 16  ;;  %v2836_v25 = vshll.u32 %v8160_v41, 16  ;;  %v8192_v21 = vld [vmem:[%s8691_s7 + $0x30] sm:$0xff]  }
 0x22a   :  { %4204 = vmatprep.mubr.bf16.mxu1 %v5146_v20  ;;  %v5154_v1 = vcombine.low %v8072_v53, %v8094_v33  ;;  %v2824_v39 = vrot.slane %v2822_v43, 5  ;;  %v2842_v5 = vshll.u32 %v8167_v62, 16  ;;  %v2428_v26 = vor.u32 %v7805_v54, %v7796_v44  ;;  %5909 = vmatpush3.bf16.msra.mxu1 %v8119_v38  ;;  %v2570_v33 = vld [vmem:[#allocation2 + $0x60] sm:$0xe]  ;;  %v6154_v44 = vld [vmem:[%s8688_s4 + $0x238] sm:$0xff]  }
 0x22b   :  { %4301 = vmatprep.mubr.bf16.mxu0 %v5162_v29  ;;  %v2835_v6 = vrot.slane %v2833_v13, 4  ;;  %v2838_v40 = vrot.slane %v2836_v25, 5  ;;  %v2431_v49 = vshll.u32 %v8125_v0, 16  ;;  %v2442_v53 = vor.u32 %v7827_v47, %v7815_v61  ;;  %5910 = vmatprep.subr.bf16.mxu1 %v6150_v57  ;;  %v8203_v43 = vld [vmem:[#allocation2 + $0x70] sm:$0xf] }
 0x22c   :  { %4302 = vmatmul.mubr.bf16.gmra.mrb[124].mxu0 %v5154_v1  ;;  %v2825_v54 = vor.u32 %v2824_v39, %v2821_v46  ;;  %v2830_v38 = vrot.slane %v2828_v63, 5  ;;  %v2429_v18 = vrot.slane %v2428_v26, 4  ;;  %v2445_v9 = vshll.u32 %v8135_v17, 16  ;;  %5942 = vmatprep.subr.bf16.mxu0 %v8192_v21  ;;  %v8211_v17 = vld [vmem:[%s8691_s7 + $0x38] sm:$0xff]   ;;  %v8216_v39 = vld [vmem:[#allocation2 + $0x74] sm:$0x1] }
 0x22d   :  { %v2839_v58 = vor.u32 %v2838_v40, %v2835_v6  ;;  %v2433_v11 = vrot.slane %v2431_v49, 5  ;;  %v2443_v0 = vrot.slane %v2442_v53, 4  ;;  %v5079_v20 = vrot.slane %v2569_v23, 9  ;;  %v8224_v6 = vld [vmem:[#allocation2 + $0x78] sm:$0xf]  ;;  %5943 = vmatpush3.bf16.msra.mxu0 %v8192_v21 }
 0x22e   :  { %v2826_v61 = vrot.slane %v2825_v54, 4  ;;  %v2447_v47 = vrot.slane %v2445_v9, 5  ;;  %v2643_v29 = vrot.slane %v8180_v59, 5  ;;  %v5080_v13 = vrot.slane %v2570_v33, 9  ;;  %5911 = vmatpush3.bf16.msra.mxu1 %v6150_v57  ;;  %v8231_v33 = vld [vmem:[#allocation2 + $0x7c] sm:$0x1]  ;;  %5944 = vmatprep.subr.bf16.mxu0 %v8211_v17 }
 0x22f   :  { %v2840_v63 = vrot.slane %v2839_v58, 4  ;;  %v2844_v46 = vrot.slane %v2842_v5, 5  ;;  %v2434_v25 = vsel %vm7540_vm12, %v2429_v18, %v2433_v11  ;;  %v2647_v1 = vrot.slane %v8201_v28, 5  ;;  %5912 = vmatprep.subr.bf16.mxu1 %v6154_v44 }
 0x230   :  { %v2831_v57 = vsel %vm7540_vm12, %v2826_v61, %v2830_v38  ;;  %v2448_v26 = vsel %vm7540_vm12, %v2443_v0, %v2447_v47  ;;  %v2644_v23 = vsel %vm7387_vm7, %v5079_v20, %v2643_v29  ;;  %v2847_v5 = vshrl.u32 %v8203_v43, 16  ;;  %v8241_v47 = vld [vmem:[#allocation2 + $0x6c] sm:$0x1]  ;;  %v8246_v29 = vld [vmem:[%s8691_s7] sm:$0xff]  }
 0x231   :  { %v2845_v40 = vsel %vm7540_vm12, %v2840_v63, %v2844_v46  ;;  %v5138_v49 = vcombine.low %v2434_v25, %v2448_v26  ;;  %v2648_v53 = vsel %vm7387_vm7, %v5080_v13, %v2647_v1  ;;  %v2850_v54 = vshll.u32 %v8203_v43, 16  ;;  %v8255_v63 = vld [vmem:[#allocation2 + $0x74] sm:$0x1]  ;;  %v2571_v46 = vld [vmem:[#allocation2 + $0x68] sm:$0xe]  ;;  %5945 = vmatpush3.bf16.msra.mxu0 %v8211_v17 }
 0x232   :  { %v5163_v38 = vcombine.low %v2831_v57, %v2845_v40  ;;  %v5147_v18 = vcombine.low %v2644_v23, %v2648_v53  ;;  %v2849_v9 = vrot.slane %v2847_v5, 4  ;;  %v2856_v58 = vshll.u32 %v8216_v39, 16  ;;  %5913 = vmatpush3.bf16.msra.mxu1 %v6154_v44  ;;  %v2572_v23 = vld [vmem:[#allocation2 + $0x70] sm:$0xe] }
 0x233   :  { %4205 = vmatmul.mubr.bf16.gmra.mrb[108].mxu1 %v5138_v49  ;;  %v5155_v11 = vcombine.low %v8137_v52, %v8160_v41  ;;  %v2852_v0 = vrot.slane %v2850_v54, 5  ;;  %v2861_v20 = vshrl.u32 %v8224_v6, 16  ;;  %v2864_v61 = vshll.u32 %v8224_v6, 16  ;;  %5962 = vmatprep.subr.bf16.mxu1 %v8246_v29 }
 0x234   :  { %4309 = vmatprep.mubr.bf16.mxu0 %v5163_v38  ;;  %4212 = vmatprep.mubr.bf16.mxu1 %v5147_v18  ;;  %v2870_v44 = vshll.u32 %v8231_v33, 16  ;;  %v2456_v52 = vor.u32 %v7840_v16, %v7833_v34  ;;  %v2459_v41 = vshll.u32 %v8180_v59, 16  ;;  %v2470_v13 = vor.u32 %v7867_v30, %v7865_v14  ;;  %v8260_v30 = vld [vmem:[#allocation2 + $0x80] sm:$0xf] }
 0x235   :  { %4310 = vmatmul.mubr.bf16.gmra.mrb[128].mxu0 %v5155_v11  ;;  %v2853_v25 = vor.u32 %v2852_v0, %v2849_v9  ;;  %v2858_v1 = vrot.slane %v2856_v58, 5  ;;  %v2863_v57 = vrot.slane %v2861_v20, 4  ;;  %v2866_v26 = vrot.slane %v2864_v61, 5  ;;  %v8263_v58 = vld [vmem:[#allocation2 + $0x84] sm:$0x1] }
 0x236   :  { %v2457_v5 = vrot.slane %v2456_v52, 4  ;;  %v2461_v40 = vrot.slane %v2459_v41, 5  ;;  %v2471_v49 = vrot.slane %v2470_v13, 4  ;;  %v2473_v53 = vshll.u32 %v8201_v28, 16  ;;  %v8271_v61 = vld [vmem:[#allocation2 + $0x88] sm:$0xf] }
 0x237   :  { %v2854_v34 = vrot.slane %v2853_v25, 4  ;;  %v2867_v16 = vor.u32 %v2866_v26, %v2863_v57  ;;  %v5081_v59 = vrot.slane %v2571_v46, 9  ;;  %v2651_v14 = vrot.slane %v8241_v47, 5  ;;  %v8277_v41 = vld [vmem:[#allocation2 + $0x8c] sm:$0x1] }
 0x238   :  { %v2872_v54 = vrot.slane %v2870_v44, 5  ;;  %v2475_v38 = vrot.slane %v2473_v53, 5  ;;  %v5082_v18 = vrot.slane %v2572_v23, 9  ;;  %v2655_v9 = vrot.slane %v8255_v63, 5 }
 0x239   :  { %v2859_v11 = vsel %vm7540_vm12, %v2854_v34, %v2858_v1  ;;  %v2868_v28 = vrot.slane %v2867_v16, 4  ;;  %v2462_v0 = vsel %vm7540_vm12, %v2457_v5, %v2461_v40  ;;  %v2652_v20 = vsel %vm7387_vm7, %v5081_v59, %v2651_v14  ;;  %v2333_v14 = vld [vmem:[#allocation2 + $0x7c] sm:$0x1] }
 0x23a   :  { %v2476_v44 = vsel %vm7540_vm12, %v2471_v49, %v2475_v38  ;;  %v2656_v52 = vsel %vm7387_vm7, %v5082_v18, %v2655_v9  ;;  %v2875_v13 = vshrl.u32 %v8260_v30, 16  ;;  %v2878_v46 = vshll.u32 %v8260_v30, 16 }
 0x23b   :  { %v2873_v25 = vsel %vm7540_vm12, %v2868_v28, %v2872_v54  ;;  %v5139_v1 = vcombine.low %v2462_v0, %v2476_v44  ;;  %v5148_v57 = vcombine.low %v2652_v20, %v2656_v52  ;;  %v2884_v26 = vshll.u32 %v8263_v58, 16  ;;  %v2573_v54 = vld [vmem:[#allocation2 + $0x78] sm:$0xe]  ;;  %v2334_v28 = vld [vmem:[#allocation2 + $0x84] sm:$0x1] }
 0x23c   :  { %v5164_v23 = vcombine.low %v2859_v11, %v2873_v25  ;;  %v2877_v5 = vrot.slane %v2875_v13, 4  ;;  %v2880_v40 = vrot.slane %v2878_v46, 5  ;;  %v2889_v49 = vshrl.u32 %v8271_v61, 16  ;;  %v1605_v25 = vld [vmem:[#allocation2 + $0x9c] sm:$0x1] }
 0x23d   :  { %4213 = vmatmul.mubr.bf16.gmra.mrb[112].mxu1 %v5139_v1  ;;  %v5156_v53 = vcombine.low %v8203_v43, %v8224_v6  ;;  %v2892_v34 = vshll.u32 %v8271_v61, 16  ;;  %v2898_v16 = vshll.u32 %v8277_v41, 16  ;;  %v2484_v59 = vor.u32 %v7877_v12, %v7875_v51  ;;  %v2574_v43 = vld [vmem:[#allocation2 + $0x80] sm:$0xe]  ;;  %v1543_v51 = vld [vmem:[#allocation2 + $0x98] sm:$0x1] }
 0x23e   :  { %4317 = vmatprep.mubr.bf16.mxu0 %v5164_v23  ;;  %4220 = vmatprep.mubr.bf16.mxu1 %v5148_v57  ;;  %v2881_v38 = vor.u32 %v2880_v40, %v2877_v5  ;;  %v2891_v18 = vrot.slane %v2889_v49, 4  ;;  %v2487_v9 = vshll.u32 %v8241_v47, 16  ;;  %v2498_v11 = vor.u32 %v7899_v42, %v7880_v48  ;;  %v8295_v5 = vld [vmem:[#allocation2 + $0x90] sm:$0xf] }
 0x23f   :  { %4318 = vmatmul.mubr.bf16.gmra.mrb[132].mxu0 %v5156_v53  ;;  %v2886_v6 = vrot.slane %v2884_v26, 5  ;;  %v2894_v0 = vrot.slane %v2892_v34, 5  ;;  %v2485_v20 = vrot.slane %v2484_v59, 4  ;;  %v2501_v44 = vshll.u32 %v8255_v63, 16 }
 0x240   :  { %v2882_v12 = vrot.slane %v2881_v38, 4  ;;  %v2489_v52 = vrot.slane %v2487_v9, 5  ;;  %v2499_v13 = vrot.slane %v2498_v11, 4  ;;  %v5083_v46 = vrot.slane %v2573_v54, 9 }
 0x241   :  { %v2895_v1 = vor.u32 %v2894_v0, %v2891_v18  ;;  %v2503_v57 = vrot.slane %v2501_v44, 5  ;;  %v2659_v47 = vrot.slane %v2333_v14, 5  ;;  %v5084_v23 = vrot.slane %v2574_v43, 9  ;;  %v2335_v43 = vld [vmem:[#allocation2 + $0x8c] sm:$0x1] }
 0x242   :  { %v2887_v48 = vsel %vm7540_vm12, %v2882_v12, %v2886_v6  ;;  %v2900_v42 = vrot.slane %v2898_v16, 5  ;;  %v2490_v26 = vsel %vm7540_vm12, %v2485_v20, %v2489_v52  ;;  %v2663_v63 = vrot.slane %v2334_v28, 5  ;;  %v2575_v6 = vld [vmem:[#allocation2 + $0x88] sm:$0xe]  ;;  %v8316_v20 = vld [vmem:[#allocation2 + $0x94] sm:$0x1] }
 0x243   :  { %v2896_v40 = vrot.slane %v2895_v1, 4  ;;  %v2504_v49 = vsel %vm7540_vm12, %v2499_v13, %v2503_v57  ;;  %v2660_v53 = vsel %vm7387_vm7, %v5083_v46, %v2659_v47  ;;  %v1544_v34 = vsel %vm7096_vm2, 0, %v1543_v51  ;;  %v2576_v12 = vld [vmem:[#allocation2 + $0x90] sm:$0xe]  ;;  %v8712_v46 = vld [vmem:[#allocation6_spill] sm:$0xff] }
 0x244   :  { %v5140_v59 = vcombine.low %v2490_v26, %v2504_v49  ;;  %v2664_v54 = vsel %vm7387_vm7, %v5084_v23, %v2663_v63  ;;  %1545 = vst [vmem:[#allocation2 + $0x98] sm:$0x1] %v1544_v34  ;;  %v1606_v16 = vsel %vm7103_vm4, 0, %v1605_v25  ;;  %v2903_v38 = vshrl.u32 %v8295_v5, 16  ;;  %v8713_v25 = vld [vmem:[#allocation7_spill] sm:$0xff]  ;;  %v8714_v49 = vld [vmem:[#allocation8_spill] sm:$0xff] }
 0x245   :  { %v2988_v18 = vrot.slane %v7985_v45, 5  ;;  %v2901_v9 = vsel %vm7540_vm12, %v2896_v40, %v2900_v42  ;;  %v5149_v11 = vcombine.low %v2660_v53, %v2664_v54  ;;  %1607 = vst [vmem:[#allocation2 + $0x9c] sm:$0x1] %v1606_v16  ;;  %v2906_v55 = vshll.u32 %v8295_v5, 16  ;;  %v2336_v47 = vld [vmem:[#allocation2 + $0x94] sm:$0x1] }
 0x246   :  { %v5165_v0 = vcombine.low %v2887_v48, %v2901_v9  ;;  %4221 = vmatmul.mubr.bf16.gmra.mrb[116].mxu1 %v5140_v59  ;;  %v2905_v44 = vrot.slane %v2903_v38, 4  ;;  %v2512_v19 = vor.u32 %v7911_v22, %v7909_v50  ;;  %v2515_v51 = vshll.u32 %v2333_v14, 16  ;;  %v2930_v38 = vld [vmem:[#allocation2 + $0x10] sm:$0xe] }
 0x247   :  { %4228 = vmatprep.mubr.bf16.mxu1 %v5149_v11  ;;  %v5157_v52 = vcombine.low %v8260_v30, %v8271_v61  ;;  %v2908_v13 = vrot.slane %v2906_v55, 5  ;;  %v2526_v1 = vor.u32 %v8713_v25, %v8712_v46  ;;  %v2529_v57 = vshll.u32 %v2334_v28, 16  ;;  %v2933_v46 = vld [vmem:[#allocation2 + $0x28] sm:$0xe] }
 0x248   :  { %4325 = vmatprep.mubr.bf16.mxu0 %v5165_v0  ;;  %v2513_v23 = vrot.slane %v2512_v19, 4  ;;  %v2517_v48 = vrot.slane %v2515_v51, 5  ;;  %v5085_v42 = vrot.slane %v2575_v6, 9  ;;  %v2667_v26 = vrot.slane %v2335_v43, 5  ;;  %v2931_v0 = vld [vmem:[#allocation2 + $0x18] sm:$0xe] }
 0x249   :  { %4326 = vmatmul.mubr.bf16.gmra.mrb[136].mxu0 %v5157_v52  ;;  %v2912_v50 = vshll.u32 %v8316_v20, 16  ;;  %v2527_v22 = vrot.slane %v2526_v1, 4  ;;  %v2531_v14 = vrot.slane %v2529_v57, 5  ;;  %v5086_v63 = vrot.slane %v2576_v12, 9 }
 0x24a   :  { %v2909_v40 = vor.u32 %v2908_v13, %v2905_v44  ;;  %v2518_v30 = vsel %vm7540_vm12, %v2513_v23, %v2517_v48  ;;  %v2671_v61 = vrot.slane %v2336_v47, 5  ;;  %v2540_v28 = vor.u32 %v7971_v24, %v8714_v49 }
 0x24b   :  { %v2689_v53 = vld [vmem:[#allocation2 + $0x98] sm:$0xf]  ;;  %v2532_v34 = vsel %vm7540_vm12, %v2527_v22, %v2531_v14  ;;  %v2668_v59 = vsel %vm7387_vm7, %v5085_v42, %v2667_v26  ;;  %v2543_v54 = vshll.u32 %v2335_v43, 16  ;;  %v2554_v16 = vor.u32 %v8144_v31, %v7979_v4  ;;  %v2932_v43 = vld [vmem:[#allocation2 + $0x20] sm:$0xe] }
 0x24c   :  { %v8335_v9 = vld [vmem:[#allocation2 + $0x9c] sm:$0x1]  ;;  %v2917_v11 = vshrl.u32 %v2689_v53, 16  ;;  %v2920_v55 = vshll.u32 %v2689_v53, 16  ;;  %v5141_v6 = vcombine.low %v2518_v30, %v2532_v34  ;;  %v2672_v24 = vsel %vm7387_vm7, %v5086_v63, %v2671_v61  ;;  %v8716_v14 = vld [vmem:[#allocation10_spill] sm:$0xff] }
 0x24d   :  { %v2992_v44 = vrot.slane %v7993_v7, 5  ;;  %v2914_v19 = vrot.slane %v2912_v50, 5  ;;  %v2926_v51 = vshll.u32 %v8335_v9, 16  ;;  %v5150_v12 = vcombine.low %v2668_v59, %v2672_v24  ;;  %v8715_v26 = vld [vmem:[#allocation9_spill] sm:$0xff] }
 0x24e   :  { %v2910_v52 = vrot.slane %v2909_v40, 4  ;;  %v2919_v13 = vrot.slane %v2917_v11, 4  ;;  %v2922_v4 = vrot.slane %v2920_v55, 5  ;;  %4229 = vmatmul.mubr.bf16.gmra.mrb[120].mxu1 %v5141_v6  ;;  %v2541_v31 = vrot.slane %v2540_v28, 4  ;;  %v5250_v11 = vld [vmem:[%s8684_s0 + $0x1c0] sm:$0xff] }
 0x24f   :  { %4236 = vmatprep.mubr.bf16.mxu1 %v5150_v12  ;;  %v2545_v25 = vrot.slane %v2543_v54, 5  ;;  %v2555_v1 = vrot.slane %v2554_v16, 4  ;;  %v2557_v57 = vshll.u32 %v2336_v47, 16  ;;  %v5087_v23 = vrot.slane %v2930_v38, 9  ;;  %v2934_v16 = vld [vmem:[#allocation2 + $0x30] sm:$0xe] }
 0x250   :  { %v2923_v48 = vor.u32 %v2922_v4, %v2919_v13  ;;  %v2928_v42 = vrot.slane %v2926_v51, 5  ;;  %v2980_v7 = vrot.slane %v8715_v26, 5  ;;  %v5088_v50 = vrot.slane %v2931_v0, 9  ;;  %v5249_v38 = vld [vmem:[%s8684_s0 + $0x1b0] sm:$0xff]  ;;  %v2937_v4 = vld [vmem:[#allocation2 + $0x48] sm:$0xe] }
 0x251   :  { %v2559_v22 = vrot.slane %v2557_v57, 5  ;;  %v2984_v63 = vrot.slane %v8716_v14, 5  ;;  %v5089_v30 = vrot.slane %v2932_v43, 9  ;;  %v5090_v40 = vrot.slane %v2933_v46, 9  ;;  %v5251_v13 = vld [vmem:[%s8684_s0 + $0x1d0] sm:$0xff] }
 0x252   :  { %v2915_v61 = vsel %vm7540_vm12, %v2910_v52, %v2914_v19  ;;  %v2924_v49 = vrot.slane %v2923_v48, 4  ;;  %v2981_v28 = vsel %vm7387_vm7, %v5087_v23, %v2980_v7  ;;  %v2546_v47 = vsel %vm7540_vm12, %v2541_v31, %v2545_v25  ;;  %v5253_v31 = vld [vmem:[%s8684_s0 + $0x1f0] sm:$0xff]  ;;  %v2938_v46 = vld [vmem:[#allocation2 + $0x60] sm:$0xe]  ;;  %v2939_v7 = vld [vmem:[#allocation2 + $0x68] sm:$0xe] }
 0x253   :  { %v2560_v34 = vsel %vm7540_vm12, %v2555_v1, %v2559_v22  ;;  %v2989_v59 = vsel %vm7387_vm7, %v5089_v30, %v2988_v18  ;;  %v2993_v54 = vsel %vm7387_vm7, %v5090_v40, %v2992_v44  ;;  %v2985_v45 = vsel %vm7387_vm7, %v5088_v50, %v2984_v63  ;;  %v2935_v44 = vld [vmem:[#allocation2 + $0x38] sm:$0xe] }
 0x254   :  { %v2929_v55 = vsel %vm7540_vm12, %v2924_v49, %v2928_v42  ;;  %v5142_v6 = vcombine.low %v2546_v47, %v2560_v34  ;;  %v5168_v18 = vcombine.low %v2989_v59, %v2993_v54  ;;  %v5167_v0 = vcombine.low %v2981_v28, %v2985_v45  ;;  %v2940_v34 = vld [vmem:[#allocation2 + $0x70] sm:$0xe] }
 0x255   :  { %v5166_v24 = vcombine.low %v2915_v61, %v2929_v55  ;;  %v5158_v19 = vcombine.low %v8295_v5, %v2689_v53  ;;  %v5091_v51 = vrot.slane %v2934_v16, 9  ;;  %v2996_v12 = vrot.slane %v8027_v27, 5  ;;  %v5252_v5 = vld [vmem:[%s8684_s0 + $0x1e0] sm:$0xff]  ;;  %v2941_v61 = vld [vmem:[#allocation2 + $0x78] sm:$0xe] }
 0x256   :  { %4237 = vmatmul.mubr.bf16.gmra.mrb[124].mxu1 %v5142_v6  ;;  %v4501_v43 = vpack.c.bf16 %v5250_v11, %v5249_v38  ;;  %v5092_v32 = vrot.slane %v2935_v44, 9  ;;  %v3000_v52 = vrot.slane %v8039_v56, 5  ;;  %v2936_v53 = vld [vmem:[#allocation2 + $0x40] sm:$0xe]  ;;  %v4502_v1 = vpack.c.bf16 %v5252_v5, %v5251_v13  ;;  %v2943_v38 = vld [vmem:[#allocation2 + $0x88] sm:$0xe] }
 0x257   :  { %4333 = vmatprep.mubr.bf16.mxu0 %v5166_v24  ;;  %5914 = vmatprep.mubr.bf16.mxu1 %v5167_v0  ;;  %v2997_v27 = vsel %vm7387_vm7, %v5091_v51, %v2996_v12  ;;  %v5254_v56 = vld [vmem:[%s8684_s0 + $0x200] sm:$0xff]  ;;  %v5093_v57 = vrot.slane %v2936_v53, 9  ;;  %v3004_v23 = vrot.slane %v8085_v2, 5  ;;  %v5094_v42 = vrot.slane %v2937_v4, 9  ;;  %v2944_v24 = vld [vmem:[#allocation2 + $0x90] sm:$0xe] }
 0x258   :  { %4334 = vmatmul.mubr.bf16.gmra.mrb[140].mxu0 %v5158_v19  ;;  %v3001_v25 = vsel %vm7387_vm7, %v5092_v32, %v3000_v52  ;;  %v3008_v26 = vrot.slane %v8112_v35, 5  ;;  %v4503_v50 = vpack.c.bf16 %v5254_v56, %v5253_v31  ;;  %v5095_v22 = vrot.slane %v2938_v46, 9  ;;  %v5258_v32 = vld [vmem:[%s8684_s0 + $0x400] sm:$0xff]  ;;  %v5259_v13 = vld [vmem:[%s8684_s0 + $0x410] sm:$0xff] }
 0x259   :  { %5946 = vmatprep.mubr.bf16.mxu0 %v4501_v43  ;;  %v5169_v48 = vcombine.low %v2997_v27, %v3001_v25  ;;  %v3012_v14 = vrot.slane %v8139_v3, 5  ;;  %v5096_v63 = vrot.slane %v2939_v7, 9  ;;  %v3016_v30 = vrot.slane %v8167_v62, 5  ;;  %v5255_v3 = vld [vmem:[%s8684_s0 + $0x210] sm:$0xff]  ;;  %v2942_v62 = vld [vmem:[#allocation2 + $0x80] sm:$0xe] }
 0x25a   :  { %v3005_v2 = vsel %vm7387_vm7, %v5093_v57, %v3004_v23  ;;  %v3009_v35 = vsel %vm7387_vm7, %v5094_v42, %v3008_v26  ;;  %v5098_v54 = vrot.slane %v2941_v61, 9  ;;  %v3024_v16 = vrot.slane %v8231_v33, 5  ;;  %v5260_v5 = vld [vmem:[%s8684_s0 + $0x420] sm:$0xff]  ;;  %v5263_v27 = vld [vmem:[%s8684_s0 + $0x450] sm:$0xff] }
 0x25b   :  { %v3013_v40 = vsel %vm7387_vm7, %v5095_v22, %v3012_v14  ;;  %v5170_v49 = vcombine.low %v3005_v2, %v3009_v35  ;;  %v3017_v28 = vsel %vm7387_vm7, %v5096_v63, %v3016_v30  ;;  %v5099_v11 = vrot.slane %v2942_v62, 9  ;;  %v5264_v4 = vld [vmem:[%s8684_s0 + $0x460] sm:$0xff] }
 0x25c   :  { %v5171_v59 = vcombine.low %v3013_v40, %v3017_v28  ;;  %v3028_v55 = vrot.slane %v8263_v58, 5  ;;  %v3020_v6 = vrot.slane %v8216_v39, 5  ;;  %v5100_v45 = vrot.slane %v2943_v38, 9  ;;  %v2945_v58 = vld [vmem:[#allocation2 + $0x98] sm:$0xe] }
 0x25d   :  { %v3025_v33 = vsel %vm7387_vm7, %v5098_v54, %v3024_v16  ;;  %v3036_v51 = vrot.slane %v8316_v20, 5  ;;  %v5102_v12 = vrot.slane %v2945_v58, 9  ;;  %v3040_v43 = vrot.slane %v8335_v9, 5 }
 0x25e   :  { %5915 = vmatmul.mubr.bf16.vlgmr.msra.gmra.mrb[128].mxu1 %v5168_v18  ;;  %v3032_v18 = vrot.slane %v8277_v41, 5  ;;  %v3029_v0 = vsel %vm7387_vm7, %v5099_v11, %v3028_v55  ;;  %v5101_v41 = vrot.slane %v2944_v24, 9  ;;  %v4508_v31 = vpack.c.bf16 %v5264_v4, %v5263_v27 }
 0x25f   :  { %5918 = vmatprep.mubr.bf16.mxu1 %v5169_v48  ;;  %5970 = vmatpush3.bf16.msra.mxu1 %v8246_v29  ;;  %v5256_v29 = vld [vmem:[%s8684_s0 + $0x220] sm:$0xff]  ;;  %v3041_v9 = vsel %vm7387_vm7, %v5102_v12, %v3040_v43 }
 0x260   :  { %5963 = vmatprep.subr.bf16.mxu1 %v8024_v37  ;;  %5947 = vmatmul.mubr.bf16.vlgmr.msra.gmra.mrb[144].mxu0 %v4502_v1  ;;  %v4504_v47 = vpack.c.bf16 %v5256_v29, %v5255_v3  ;;  %v3033_v44 = vsel %vm7387_vm7, %v5100_v45, %v3032_v18  ;;  %v3037_v20 = vsel %vm7387_vm7, %v5101_v41, %v3036_v51 }
 0x261   :  { %5950 = vmatprep.mubr.bf16.mxu0 %v4503_v50  ;;  %v5173_v19 = vcombine.low %v3029_v0, %v3033_v44 }
 0x263   :  { %5971 = vmatpush3.bf16.msra.mxu1 %v8024_v37  ;;  %v5097_v37 = vrot.slane %v2940_v34, 9 }
 0x264   :  { %5964 = vmatprep.subr.bf16.mxu1 %v8058_v15 }
 0x266   :  { %5919 = vmatmul.mubr.bf16.gmra.mrb[132].mxu1 %v5170_v49 }
 0x267   :  { %5922 = vmatprep.mubr.bf16.mxu1 %v5171_v59  ;;  %5972 = vmatpush3.bf16.msra.mxu1 %v8058_v15  ;;  %v3021_v15 = vsel %vm7387_vm7, %v5097_v37, %v3020_v6 }
 0x268   :  { %5965 = vmatprep.subr.bf16.mxu1 %v8082_v36  ;;  %5951 = vmatmul.mubr.bf16.gmra.mrb[148].mxu0 %v4504_v47  ;;  %v5172_v39 = vcombine.low %v3021_v15, %v3025_v33 }
 0x26b   :  { %5973 = vmatpush3.bf16.msra.mxu1 %v8082_v36  ;;  %v5257_v36 = vld [vmem:[%s8684_s0 + $0x3f0] sm:$0xff] }
 0x26c   :  { %5966 = vmatprep.subr.bf16.mxu1 %v8130_v60  ;;  %v4505_v52 = vpack.c.bf16 %v5258_v32, %v5257_v36 }
 0x26e   :  { %5923 = vmatmul.mubr.bf16.gmra.mrb[136].mxu1 %v5172_v39 }
 0x26f   :  { %5926 = vmatprep.mubr.bf16.mxu1 %v5173_v19  ;;  %5974 = vmatpush3.bf16.msra.mxu1 %v8130_v60  ;;  %v5174_v60 = vcombine.low %v3037_v20, %v3041_v9 }
 0x270   :  { %5967 = vmatprep.subr.bf16.mxu1 %v8152_v8 }
 0x273   :  { %5975 = vmatpush3.bf16.msra.mxu1 %v8152_v8  ;;  %v5262_v8 = vld [vmem:[%s8684_s0 + $0x440] sm:$0xff] }
 0x274   :  { %5968 = vmatprep.subr.bf16.mxu1 %v8192_v21  ;;  %v4507_v53 = vpack.c.bf16 %v5262_v8, %v5261_v10 }
 0x276   :  { %5927 = vmatmul.mubr.bf16.gmra.mrb[140].mxu1 %v5174_v60 }
 0x277   :  { %5976 = vmatpush3.bf16.msra.mxu1 %v8192_v21  ;;  %5954 = vmatprep.mubr.bf16.mxu1 %v4505_v52  ;;  %v4506_v21 = vpack.c.bf16 %v5260_v5, %v5259_v13 }
 0x278   :  { %5969 = vmatprep.subr.bf16.mxu1 %v8211_v17 }
 0x27b   :  { %5977 = vmatpush3.bf16.msra.mxu1 %v8211_v17 }
 0x27e   :  { %5955 = vmatmul.mubr.bf16.vlgmr.msra.gmra.mrb[144].mxu1 %v4506_v21 }
 0x27f   :  { %5958 = vmatprep.mubr.bf16.mxu1 %v4507_v53 }
 0x286   :  { %5959 = vmatmul.mubr.bf16.gmra.mrb[148].mxu1 %v4508_v31 }
 0x28f   :  { %v5658_v56 = vpop.f32.mrb[80].mxu0 }
 0x290   :  { %v5659_v46 = vpop.f32.mrb[81].mxu0 }
 0x291   :  { %v5660_v25 = vadd.f32 %v5659_v46, %v5658_v56  ;;  %v5661_v1 = vpop.f32.mrb[82].mxu0 }
 0x292   :  { %v5662_v57 = vpop.f32.mrb[83].mxu0 }
 0x293   :  { %v5663_v23 = vadd.f32 %v5662_v57, %v5661_v1 }
 0x2a2   :  { %v5594_v17 = vpop.f32.mrb[64].mxu1 }
 0x2a3   :  { %v5595_v48 = vpop.f32.mrb[65].mxu1 }
 0x2a4   :  { %v5596_v42 = vadd.f32 %v5595_v48, %v5594_v17  ;;  %v5597_v26 = vpop.f32.mrb[66].mxu1 }
 0x2a5   :  { %v5598_v7 = vpop.f32.mrb[67].mxu1 }
 0x2a6   :  { %v8461_v50 = vadd.f32 %v5660_v25, %v5596_v42  ;;  %v5664_v22 = vpop.f32.mrb[84].mxu0  ;;  %v5599_v14 = vadd.f32 %v5598_v7, %v5597_v26 }
 0x2a7   :  { %v5665_v63 = vpop.f32.mrb[85].mxu0 }
 0x2a8   :  { %v5666_v30 = vadd.f32 %v5665_v63, %v5664_v22  ;;  %v8463_v2 = vadd.f32 %v5663_v23, %v5599_v14  ;;  %v5667_v35 = vpop.f32.mrb[86].mxu0 }
 0x2a9   :  { %v5668_v3 = vpop.f32.mrb[87].mxu0 }
 0x2aa   :  { %v5669_v29 = vadd.f32 %v5668_v3, %v5667_v35  ;;  %v5600_v40 = vpop.f32.mrb[68].mxu1 }
 0x2ab   :  { %v5601_v61 = vpop.f32.mrb[69].mxu1 }
 0x2ac   :  { %v5602_v62 = vadd.f32 %v5601_v61, %v5600_v40  ;;  %v5603_v49 = vpop.f32.mrb[70].mxu1 }
 0x2ad   :  { %v5604_v28 = vpop.f32.mrb[71].mxu1 }
 0x2ae   :  { %v8465_v47 = vadd.f32 %v5666_v30, %v5602_v62  ;;  %v5605_v34 = vadd.f32 %v5604_v28, %v5603_v49 }
 0x2b0   :  { %v5670_v59 = vpop.f32.mrb[88].mxu0  ;;  %v8467_v54 = vadd.f32 %v5669_v29, %v5605_v34 }
 0x2b1   :  { %v5671_v16 = vpop.f32.mrb[89].mxu0 }
 0x2b2   :  { %v5672_v38 = vadd.f32 %v5671_v16, %v5670_v59  ;;  %v5673_v11 = vpop.f32.mrb[90].mxu0 }
 0x2b3   :  { %v5674_v55 = vpop.f32.mrb[91].mxu0  ;;  %v5606_v37 = vpop.f32.mrb[72].mxu1 }
 0x2b4   :  { %v5675_v6 = vadd.f32 %v5674_v55, %v5673_v11  ;;  %v5607_v45 = vpop.f32.mrb[73].mxu1 }
 0x2b5   :  { %v5608_v18 = vadd.f32 %v5607_v45, %v5606_v37  ;;  %v5609_v33 = vpop.f32.mrb[74].mxu1 }
 0x2b6   :  { %v5610_v24 = vpop.f32.mrb[75].mxu1 }
 0x2b7   :  { %v8469_v0 = vadd.f32 %v5672_v38, %v5608_v18  ;;  %v5611_v58 = vadd.f32 %v5610_v24, %v5609_v33 }
 0x2b9   :  { %v8471_v15 = vadd.f32 %v5675_v6, %v5611_v58 }
 0x2ba   :  { %v5676_v39 = vpop.f32.mrb[92].mxu0 }
 0x2bb   :  { %v5677_v44 = vpop.f32.mrb[93].mxu0 }
 0x2bc   :  { %v5678_v41 = vadd.f32 %v5677_v44, %v5676_v39  ;;  %v5679_v19 = vpop.f32.mrb[94].mxu0 }
 0x2bd   :  { %v5680_v51 = vpop.f32.mrb[95].mxu0 }
 0x2be   :  { %v5681_v12 = vadd.f32 %v5680_v51, %v5679_v19  ;;  %v5612_v43 = vpop.f32.mrb[76].mxu1 }
 0x2bf   :  { %v5613_v36 = vpop.f32.mrb[77].mxu1 }
 0x2c0   :  { %v5614_v32 = vadd.f32 %v5613_v36, %v5612_v43  ;;  %v5615_v20 = vpop.f32.mrb[78].mxu1 }
 0x2c1   :  { %v5616_v9 = vpop.f32.mrb[79].mxu1 }
 0x2c2   :  { %v8473_v52 = vadd.f32 %v5678_v41, %v5614_v32  ;;  %v5682_v60 = vpop.f32.mrb[96].mxu0  ;;  %v5617_v13 = vadd.f32 %v5616_v9, %v5615_v20 }
 0x2c3   :  { %v5683_v5 = vpop.f32.mrb[97].mxu0 }
 0x2c4   :  { %v5684_v10 = vadd.f32 %v5683_v5, %v5682_v60  ;;  %v8475_v8 = vadd.f32 %v5681_v12, %v5617_v13  ;;  %v5685_v21 = vpop.f32.mrb[98].mxu0 }
 0x2c5   :  { %v5686_v53 = vpop.f32.mrb[99].mxu0 }
 0x2c6   :  { %v5687_v27 = vadd.f32 %v5686_v53, %v5685_v21  ;;  %v5618_v4 = vpop.f32.mrb[80].mxu1 }
 0x2c7   :  { %v5619_v31 = vpop.f32.mrb[81].mxu1 }
 0x2c8   :  { %v5620_v56 = vadd.f32 %v5619_v31, %v5618_v4  ;;  %v5621_v46 = vpop.f32.mrb[82].mxu1 }
 0x2c9   :  { %v5622_v25 = vpop.f32.mrb[83].mxu1 }
 0x2ca   :  { %v8477_v1 = vadd.f32 %v5684_v10, %v5620_v56  ;;  %v5688_v57 = vpop.f32.mrb[100].mxu0  ;;  %v5623_v23 = vadd.f32 %v5622_v25, %v5621_v46 }
 0x2cb   :  { %v5689_v17 = vpop.f32.mrb[101].mxu0 }
 0x2cc   :  { %v5690_v48 = vadd.f32 %v5689_v17, %v5688_v57  ;;  %v8479_v42 = vadd.f32 %v5687_v27, %v5623_v23  ;;  %v5691_v26 = vpop.f32.mrb[102].mxu0 }
 0x2cd   :  { %v5692_v7 = vpop.f32.mrb[103].mxu0 }
 0x2ce   :  { %v5693_v22 = vadd.f32 %v5692_v7, %v5691_v26  ;;  %v5624_v14 = vpop.f32.mrb[84].mxu1 }
 0x2cf   :  { %v5625_v63 = vpop.f32.mrb[85].mxu1 }
 0x2d0   :  { %v5626_v30 = vadd.f32 %v5625_v63, %v5624_v14  ;;  %v5627_v35 = vpop.f32.mrb[86].mxu1 }
 0x2d1   :  { %v5628_v3 = vpop.f32.mrb[87].mxu1 }
 0x2d2   :  { %v8481_v29 = vadd.f32 %v5690_v48, %v5626_v30  ;;  %v5694_v40 = vpop.f32.mrb[104].mxu0  ;;  %v5629_v61 = vadd.f32 %v5628_v3, %v5627_v35 }
 0x2d3   :  { %v5695_v62 = vpop.f32.mrb[105].mxu0 }
 0x2d4   :  { %v5696_v49 = vadd.f32 %v5695_v62, %v5694_v40  ;;  %v8483_v28 = vadd.f32 %v5693_v22, %v5629_v61  ;;  %v5697_v34 = vpop.f32.mrb[106].mxu0 }
 0x2d5   :  { %v5698_v59 = vpop.f32.mrb[107].mxu0 }
 0x2d6   :  { %v5699_v16 = vadd.f32 %v5698_v59, %v5697_v34  ;;  %v5630_v38 = vpop.f32.mrb[88].mxu1 }
 0x2d7   :  { %v5631_v11 = vpop.f32.mrb[89].mxu1 }
 0x2d8   :  { %v5632_v55 = vadd.f32 %v5631_v11, %v5630_v38  ;;  %v5633_v37 = vpop.f32.mrb[90].mxu1 }
 0x2d9   :  { %v5634_v6 = vpop.f32.mrb[91].mxu1 }
 0x2da   :  { %v8485_v45 = vadd.f32 %v5696_v49, %v5632_v55  ;;  %v5635_v18 = vadd.f32 %v5634_v6, %v5633_v37 }
 0x2db   :  { %v5700_v33 = vpop.f32.mrb[108].mxu0 }
 0x2dc   :  { %v5701_v24 = vpop.f32.mrb[109].mxu0  ;;  %v8487_v58 = vadd.f32 %v5699_v16, %v5635_v18 }
 0x2dd   :  { %v5702_v39 = vadd.f32 %v5701_v24, %v5700_v33  ;;  %v5703_v44 = vpop.f32.mrb[110].mxu0 }
 0x2de   :  { %v5704_v41 = vpop.f32.mrb[111].mxu0  ;;  %v5636_v19 = vpop.f32.mrb[92].mxu1 }
 0x2df   :  { %v5705_v51 = vadd.f32 %v5704_v41, %v5703_v44  ;;  %v5637_v12 = vpop.f32.mrb[93].mxu1 }
 0x2e0   :  { %v5638_v43 = vadd.f32 %v5637_v12, %v5636_v19  ;;  %v5639_v36 = vpop.f32.mrb[94].mxu1 }
 0x2e1   :  { %v5640_v32 = vpop.f32.mrb[95].mxu1 }
 0x2e2   :  { %v8489_v20 = vadd.f32 %v5702_v39, %v5638_v43  ;;  %v5641_v9 = vadd.f32 %v5640_v32, %v5639_v36 }
 0x2e4   :  { %v8491_v60 = vadd.f32 %v5705_v51, %v5641_v9 }
 0x2e5   :  { %v5786_v13 = vpop.f32.mrb[112].mxu0 }
 0x2e6   :  { %v5787_v5 = vpop.f32.mrb[113].mxu0 }
 0x2e7   :  { %v5722_v10 = vpop.f32.mrb[96].mxu1  ;;  %v5788_v21 = vadd.f32 %v5787_v5, %v5786_v13  ;;  %v5789_v53 = vpop.f32.mrb[114].mxu0 }
 0x2e8   :  { %v5723_v27 = vpop.f32.mrb[97].mxu1  ;;  %v5790_v4 = vpop.f32.mrb[115].mxu0 }
 0x2e9   :  { %v5724_v31 = vadd.f32 %v5723_v27, %v5722_v10  ;;  %v5725_v56 = vpop.f32.mrb[98].mxu1  ;;  %v5791_v46 = vadd.f32 %v5790_v4, %v5789_v53 }
 0x2ea   :  { %v5726_v25 = vpop.f32.mrb[99].mxu1 }
 0x2eb   :  { %v4183_v57 = vadd.f32 %v5724_v31, %v8461_v50  ;;  %v5727_v23 = vadd.f32 %v5726_v25, %v5725_v56 }
 0x2ed   :  { %v4186_v17 = vadd.f32 %v5727_v23, %v8463_v2  ;;  %v8495_v48 = vadd.f32 %v5788_v21, %v4183_v57  ;;  %v5792_v26 = vpop.f32.mrb[116].mxu0 }
 0x2ee   :  { %v5793_v7 = vpop.f32.mrb[117].mxu0 }
 0x2ef   :  { %v8497_v22 = vadd.f32 %v5791_v46, %v4186_v17  ;;  %v5794_v14 = vadd.f32 %v5793_v7, %v5792_v26  ;;  %v5795_v63 = vpop.f32.mrb[118].mxu0 }
 0x2f0   :  { %v5796_v30 = vpop.f32.mrb[119].mxu0 }
 0x2f1   :  { %v5797_v35 = vadd.f32 %v5796_v30, %v5795_v63 }
 0x2f2   :  { %v5728_v3 = vpop.f32.mrb[100].mxu1 }
 0x2f3   :  { %v5729_v40 = vpop.f32.mrb[101].mxu1 }
 0x2f4   :  { %v5730_v61 = vadd.f32 %v5729_v40, %v5728_v3  ;;  %v5731_v62 = vpop.f32.mrb[102].mxu1 }
 0x2f5   :  { %v5732_v34 = vpop.f32.mrb[103].mxu1 }
 0x2f6   :  { %v5798_v49 = vpop.f32.mrb[120].mxu0  ;;  %v4191_v50 = vadd.f32 %v5730_v61, %v8465_v47  ;;  %v5733_v2 = vadd.f32 %v5732_v34, %v5731_v62 }
 0x2f7   :  { %v5799_v59 = vpop.f32.mrb[121].mxu0 }
 0x2f8   :  { %v5800_v16 = vadd.f32 %v5799_v59, %v5798_v49  ;;  %v5801_v38 = vpop.f32.mrb[122].mxu0  ;;  %v4194_v11 = vadd.f32 %v5733_v2, %v8467_v54  ;;  %v8501_v37 = vadd.f32 %v5794_v14, %v4191_v50 }
 0x2f9   :  { %v5802_v55 = vpop.f32.mrb[123].mxu0 }
 0x2fa   :  { %v5803_v6 = vadd.f32 %v5802_v55, %v5801_v38  ;;  %v8503_v18 = vadd.f32 %v5797_v35, %v4194_v11 }
 0x2fc   :  { %v5734_v33 = vpop.f32.mrb[104].mxu1 }
 0x2fd   :  { %v5735_v24 = vpop.f32.mrb[105].mxu1 }
 0x2fe   :  { %v5736_v39 = vadd.f32 %v5735_v24, %v5734_v33  ;;  %v5737_v44 = vpop.f32.mrb[106].mxu1 }
 0x2ff   :  { %v5804_v41 = vpop.f32.mrb[124].mxu0  ;;  %v5738_v19 = vpop.f32.mrb[107].mxu1 }
 0x300   :  { %v4199_v47 = vadd.f32 %v5736_v39, %v8469_v0  ;;  %v5805_v51 = vpop.f32.mrb[125].mxu0  ;;  %v5739_v12 = vadd.f32 %v5738_v19, %v5737_v44 }
 0x301   :  { %v5806_v43 = vadd.f32 %v5805_v51, %v5804_v41  ;;  %v5807_v36 = vpop.f32.mrb[126].mxu0 }
 0x302   :  { %v4202_v54 = vadd.f32 %v5739_v12, %v8471_v15  ;;  %v5808_v32 = vpop.f32.mrb[127].mxu0  ;;  %v8507_v9 = vadd.f32 %v5800_v16, %v4199_v47 }
 0x303   :  { %v5809_v13 = vadd.f32 %v5808_v32, %v5807_v36 }
 0x304   :  { %v8509_v5 = vadd.f32 %v5803_v6, %v4202_v54 }
 0x306   :  { %v5740_v10 = vpop.f32.mrb[108].mxu1 }
 0x307   :  { %v5741_v21 = vpop.f32.mrb[109].mxu1 }
 0x308   :  { %v5742_v53 = vadd.f32 %v5741_v21, %v5740_v10  ;;  %v5810_v27 = vpop.f32.mrb[128].mxu0  ;;  %v5743_v4 = vpop.f32.mrb[110].mxu1 }
 0x309   :  { %v5811_v31 = vpop.f32.mrb[129].mxu0  ;;  %v5744_v56 = vpop.f32.mrb[111].mxu1 }
 0x30a   :  { %v4207_v0 = vadd.f32 %v5742_v53, %v8473_v52  ;;  %v5812_v46 = vadd.f32 %v5811_v31, %v5810_v27  ;;  %v5745_v25 = vadd.f32 %v5744_v56, %v5743_v4  ;;  %v5813_v57 = vpop.f32.mrb[130].mxu0 }
 0x30b   :  { %v5814_v23 = vpop.f32.mrb[131].mxu0 }
 0x30c   :  { %v4210_v15 = vadd.f32 %v5745_v25, %v8475_v8  ;;  %v5815_v17 = vadd.f32 %v5814_v23, %v5813_v57  ;;  %v8513_v26 = vadd.f32 %v5806_v43, %v4207_v0 }
 0x30e   :  { %v8515_v7 = vadd.f32 %v5809_v13, %v4210_v15 }
 0x310   :  { %v5746_v14 = vpop.f32.mrb[112].mxu1 }
 0x311   :  { %v5747_v63 = vpop.f32.mrb[113].mxu1 }
 0x312   :  { %v5748_v30 = vadd.f32 %v5747_v63, %v5746_v14  ;;  %v5816_v35 = vpop.f32.mrb[132].mxu0  ;;  %v5749_v3 = vpop.f32.mrb[114].mxu1 }
 0x313   :  { %v5817_v40 = vpop.f32.mrb[133].mxu0  ;;  %v5750_v61 = vpop.f32.mrb[115].mxu1 }
 0x314   :  { %v4215_v52 = vadd.f32 %v5748_v30, %v8477_v1  ;;  %v5818_v62 = vadd.f32 %v5817_v40, %v5816_v35  ;;  %v5751_v49 = vadd.f32 %v5750_v61, %v5749_v3  ;;  %v5819_v34 = vpop.f32.mrb[134].mxu0  ;;  %v8542_v3 = vld [vmem:[%s8689_s5] ss:$0 sm:$0xff]  ;;  %s6313_s5 = smov [#allocation3]  }
 0x315   :  { %v5820_v50 = vpop.f32.mrb[135].mxu0  ;;  %v8547_v40 = vld [vmem:[%s8692_s8] ss:$0 sm:$0xff] }
 0x316   :  { %v4218_v8 = vadd.f32 %v5751_v49, %v8479_v42  ;;  %v5821_v59 = vadd.f32 %v5820_v50, %v5819_v34  ;;  %v8519_v2 = vadd.f32 %v5812_v46, %v4215_v52  ;;  %v8556_v49 = vld [vmem:[%s8690_s6] ss:$0 sm:$0xff]  ;;  %s4826_s6 = sshll.u32 %s6313_s5, 4  ;;  %s4827_s6 = int_to_ptr.vmem [resolvable:$true] %s4826_s6 }
 0x317   :  { %s6288_s8 = scalar_lea.vmem %s4827_s6, 2048  ;;  %p6293_p1 = scmp.lt.s32.totalorder %s4827_s6, %s4827_s6 }
 0x318   :  { %v8521_v16 = vadd.f32 %v5815_v17, %v4218_v8  ;;  %p6289_p0 = scmp.ne.s32.totalorder %s4827_s6, %s6288_s8  ;;  %p6294_p2 = scmp.lt.s32.totalorder %s6288_s8, %s6288_s8 }
 0x319   :  { %v5752_v38 = vpop.f32.mrb[116].mxu1 }
 0x31a   :  { %v5753_v11 = vpop.f32.mrb[117].mxu1  ;;  %p6295_p3 = por %p6294_p2, %p6293_p1 }
 0x31b   :  { %v5754_v55 = vadd.f32 %v5753_v11, %v5752_v38  ;;  %v5755_v6 = vpop.f32.mrb[118].mxu1 }
 0x31c   :  { %v5822_v33 = vpop.f32.mrb[136].mxu0  ;;  %v5756_v24 = vpop.f32.mrb[119].mxu1  ;;  %p6296_p4 = pnand %p6295_p3, %p6289_p0 }
 0x31d   :  { %v4223_v39 = vadd.f32 %v5754_v55, %v8481_v29  ;;  %v5823_v1 = vpop.f32.mrb[137].mxu0  ;;  %v5757_v44 = vadd.f32 %v5756_v24, %v5755_v6 }
 0x31e   :  { %v5824_v41 = vadd.f32 %v5823_v1, %v5822_v33  ;;  %v5825_v19 = vpop.f32.mrb[138].mxu0 }
 0x31f   :  { %v4226_v47 = vadd.f32 %v5757_v44, %v8483_v28  ;;  %v5826_v42 = vpop.f32.mrb[139].mxu0  ;;  %v8525_v51 = vadd.f32 %v5818_v62, %v4223_v39 }
 0x320   :  { %v5827_v12 = vadd.f32 %v5826_v42, %v5825_v19 }
 0x321   :  { %v5758_v43 = vpop.f32.mrb[120].mxu1  ;;  %v8527_v36 = vadd.f32 %v5821_v59, %v4226_v47 }
 0x322   :  { %v5759_v54 = vpop.f32.mrb[121].mxu1 }
 0x323   :  { %v5760_v32 = vadd.f32 %v5759_v54, %v5758_v43  ;;  %v5761_v13 = vpop.f32.mrb[122].mxu1 }
 0x324   :  { %v5762_v10 = vpop.f32.mrb[123].mxu1 }
 0x325   :  { %v4231_v21 = vadd.f32 %v5760_v32, %v8485_v45  ;;  %v5763_v29 = vadd.f32 %v5762_v10, %v5761_v13 }
 0x327   :  { %v4234_v53 = vadd.f32 %v5763_v29, %v8487_v58  ;;  %v8531_v27 = vadd.f32 %v5824_v41, %v4231_v21 }
 0x329   :  { %v5764_v4 = vpop.f32.mrb[124].mxu1  ;;  %v8533_v28 = vadd.f32 %v5827_v12, %v4234_v53 }
 0x32a   :  { %v5765_v31 = vpop.f32.mrb[125].mxu1 }
 0x32b   :  { %v5828_v56 = vpop.f32.mrb[140].mxu0  ;;  %v5766_v0 = vadd.f32 %v5765_v31, %v5764_v4  ;;  %v5767_v46 = vpop.f32.mrb[126].mxu1 }
 0x32c   :  { %v5829_v25 = vpop.f32.mrb[141].mxu0  ;;  %v5768_v57 = vpop.f32.mrb[127].mxu1 }
 0x32d   :  { %v5830_v23 = vadd.f32 %v5829_v25, %v5828_v56  ;;  %v5831_v15 = vpop.f32.mrb[142].mxu0  ;;  %v4239_v17 = vadd.f32 %v5766_v0, %v8489_v20  ;;  %v5769_v14 = vadd.f32 %v5768_v57, %v5767_v46 }
 0x32e   :  { %v5832_v45 = vpop.f32.mrb[143].mxu0 }
 0x32f   :  { %v5833_v63 = vadd.f32 %v5832_v45, %v5831_v15  ;;  %v4242_v58 = vadd.f32 %v5769_v14, %v8491_v60  ;;  %v8537_v30 = vadd.f32 %v5830_v23, %v4239_v17 }
 0x331   :  { %v5916_v35 = vpop.f32.mrb[128].mxu1  ;;  %v8549_v61 = vadd.f32 %v5833_v63, %v4242_v58 }
 0x332   :  { %v4385_v20 = vadd.f32 %v5916_v35, %v8501_v37  ;;  %v4376_v52 = vpop.f32.mrb[129].mxu1 }
 0x333   :  { %v4377_v60 = vadd.f32 %v4376_v52, %v8495_v48  ;;  %v5917_v62 = vpop.f32.mrb[130].mxu1  ;;  %v5948_v34 = vpop.f32.mrb[144].mxu0 }
 0x334   :  { %v4448_v50 = vmul.f32 %v8542_v3, %v4385_v20  ;;  %v4388_v8 = vadd.f32 %v5917_v62, %v8503_v18  ;;  %v4379_v59 = vpop.f32.mrb[131].mxu1  ;;  %v4623_v38 = vadd.f32 %v5948_v34, %v8547_v40  ;;  %v4614_v11 = vpop.f32.mrb[145].mxu0 }
 0x335   :  { %v4446_v37 = vmul.f32 %v8542_v3, %v4377_v60  ;;  %v4380_v55 = vadd.f32 %v4379_v59, %v8497_v22  ;;  %v4615_v48 = vadd.f32 %v8547_v40, %v4614_v11  ;;  %v5949_v6 = vpop.f32.mrb[146].mxu0 }
 0x336   :  { %v4449_v33 = vmul.f32 %v8542_v3, %v4388_v8  ;;  %v4471_v24 = vadd.f32 %v8556_v49, %v4448_v50  ;;  %v4626_v39 = vadd.f32 %v5949_v6, %v8547_v40  ;;  %v4617_v1 = vpop.f32.mrb[147].mxu0 }
 0x337   :  { %v4447_v18 = vmul.f32 %v8542_v3, %v4380_v55  ;;  %v4469_v44 = vadd.f32 %v8556_v49, %v4446_v37  ;;  %v4618_v41 = vadd.f32 %v8547_v40, %v4617_v1 }
 0x338   :  { %v8570_v19 = vadd.f32 %v4623_v38, %v4471_v24  ;;  %v4472_v22 = vadd.f32 %v8556_v49, %v4449_v33 }
 0x339   :  { %v8573_v47 = vadd.f32 %v4615_v48, %v4469_v44  ;;  %v4470_v42 = vadd.f32 %v8556_v49, %v4447_v18  ;;  %v5920_v12 = vpop.f32.mrb[132].mxu1 }
 0x33a   :  { %v5276_v43 = vmul.f32 -1.442695, %v8570_v19  ;;  %v8577_v54 = vadd.f32 %v4626_v39, %v4472_v22  ;;  %v4401_v32 = vadd.f32 %v5920_v12, %v8513_v26  ;;  %v4392_v13 = vpop.f32.mrb[133].mxu1 }
 0x33b   :  { %v5274_v10 = vmul.f32 -1.442695, %v8573_v47  ;;  %v8581_v21 = vadd.f32 %v4618_v41, %v4470_v42  ;;  %v4393_v29 = vadd.f32 %v4392_v13, %v8507_v9  ;;  %v5921_v53 = vpop.f32.mrb[134].mxu1  ;;  %v5952_v4 = vpop.f32.mrb[148].mxu0 }
 0x33c   :  { %6222 = vpow2.f32 %v5276_v43  ;;  %v5277_v31 = vmul.f32 -1.442695, %v8577_v54  ;;  %v4452_v56 = vmul.f32 %v8542_v3, %v4401_v32  ;;  %v4404_v0 = vadd.f32 %v5921_v53, %v8515_v7  ;;  %v4395_v46 = vpop.f32.mrb[135].mxu1  ;;  %v4630_v25 = vpop.f32.mrb[149].mxu0 }
 0x33d   :  { %6224 = vpow2.f32 %v5274_v10  ;;  %v5275_v26 = vmul.f32 -1.442695, %v8581_v21  ;;  %v4450_v57 = vmul.f32 %v8542_v3, %v4393_v29  ;;  %v4396_v23 = vadd.f32 %v4395_v46, %v8509_v5  ;;  %v5953_v15 = vpop.f32.mrb[150].mxu0 }
 0x33e   :  { %6226 = vpow2.f32 %v5277_v31  ;;  %v4453_v9 = vmul.f32 %v8542_v3, %v4404_v0  ;;  %v4475_v17 = vadd.f32 %v8556_v49, %v4452_v56  ;;  %v4639_v14 = vadd.f32 %v5952_v4, %v8547_v40  ;;  %v4633_v45 = vpop.f32.mrb[151].mxu0 }
 0x33f   :  { %6228 = vpow2.f32 %v5275_v26  ;;  %v4451_v7 = vmul.f32 %v8542_v3, %v4396_v23  ;;  %v4473_v63 = vadd.f32 %v8556_v49, %v4450_v57  ;;  %v4631_v58 = vadd.f32 %v8547_v40, %v4630_v25 }
 0x340   :  { %v8596_v35 = vadd.f32 %v4639_v14, %v4475_v17  ;;  %v4476_v5 = vadd.f32 %v8556_v49, %v4453_v9  ;;  %v4642_v20 = vadd.f32 %v5953_v15, %v8547_v40  ;;  %v4634_v52 = vadd.f32 %v8547_v40, %v4633_v45 }
 0x341   :  { %v8601_v60 = vadd.f32 %v4631_v58, %v4473_v63  ;;  %v4474_v62 = vadd.f32 %v8556_v49, %v4451_v7  ;;  %v5924_v34 = vpop.f32.mrb[136].mxu1 }
 0x342   :  { %v5280_v50 = vmul.f32 -1.442695, %v8596_v35  ;;  %v8605_v8 = vadd.f32 %v4642_v20, %v4476_v5  ;;  %v4417_v59 = vadd.f32 %v5924_v34, %v8525_v51  ;;  %v4408_v38 = vpop.f32.mrb[137].mxu1 }
 0x343   :  { %v5278_v11 = vmul.f32 -1.442695, %v8601_v60  ;;  %v8609_v37 = vadd.f32 %v4634_v52, %v4474_v62  ;;  %v4409_v55 = vadd.f32 %v4408_v38, %v8519_v2  ;;  %v5925_v48 = vpop.f32.mrb[138].mxu1 }
 0x344   :  { %6230 = vpow2.f32 %v5280_v50  ;;  %v5281_v6 = vmul.f32 -1.442695, %v8605_v8  ;;  %v4420_v33 = vadd.f32 %v5925_v48, %v8527_v36  ;;  %v4411_v24 = vpop.f32.mrb[139].mxu1  ;;  %v4456_v31 = vmul.f32 %v8542_v3, %v4417_v59 }
 0x345   :  { %6232 = vpow2.f32 %v5278_v11  ;;  %v5279_v39 = vmul.f32 -1.442695, %v8609_v37  ;;  %v4412_v1 = vadd.f32 %v4411_v24, %v8521_v16  ;;  %v4454_v46 = vmul.f32 %v8542_v3, %v4409_v55 }
 0x346   :  { %v6223_v51 = vpop.eup %6222  ;;  %6234 = vpow2.f32 %v5281_v6 }
 0x347   :  { %v6225_v18 = vpop.eup %6224  ;;  %v4743_v44 = vadd.f32 1.0, %v6223_v51  ;;  %6236 = vpow2.f32 %v5279_v39  ;;  %v4455_v23 = vmul.f32 %v8542_v3, %v4412_v1  ;;  %v4477_v45 = vadd.f32 %v8556_v49, %v4454_v46 }
 0x348   :  { %v6227_v41 = vpop.eup %6226  ;;  %v4741_v22 = vadd.f32 1.0, %v6225_v18 }
 0x349   :  { %v6229_v2 = vpop.eup %6228  ;;  %6238 = vrcp.f32 %v4743_v44  ;;  %v4744_v42 = vadd.f32 1.0, %v6227_v41  ;;  %v5928_v12 = vpop.f32.mrb[140].mxu1  ;;  %v4478_v11 = vadd.f32 %v8556_v49, %v4455_v23 }
 0x34a   :  { %6240 = vrcp.f32 %v4741_v22  ;;  %v4742_v43 = vadd.f32 1.0, %v6229_v2  ;;  %v4433_v36 = vadd.f32 %v5928_v12, %v8537_v30  ;;  %v4424_v32 = vpop.f32.mrb[141].mxu1  ;;  %v4457_v30 = vmul.f32 %v8542_v3, %v4420_v33 }
 0x34b   :  { %6242 = vrcp.f32 %v4744_v42  ;;  %v4425_v13 = vadd.f32 %v4424_v32, %v8531_v27  ;;  %v5929_v16 = vpop.f32.mrb[142].mxu1 }
 0x34c   :  { %6244 = vrcp.f32 %v4742_v43  ;;  %v4436_v10 = vadd.f32 %v5929_v16, %v8549_v61  ;;  %v4427_v29 = vpop.f32.mrb[143].mxu1  ;;  %v4480_v63 = vadd.f32 %v8556_v49, %v4457_v30 }
 0x34d   :  { %v4428_v53 = vadd.f32 %v4427_v29, %v8533_v28  ;;  %v4479_v28 = vadd.f32 %v8556_v49, %v4456_v31 }
 0x34e   :  { %v6231_v4 = vpop.eup %6230  ;;  %v4461_v18 = vmul.f32 %v8542_v3, %v4436_v10 }
 0x34f   :  { %v6233_v56 = vpop.eup %6232  ;;  %v4747_v0 = vadd.f32 1.0, %v6231_v4  ;;  %v4459_v44 = vmul.f32 %v8542_v3, %v4428_v53 }
 0x350   :  { %v6235_v25 = vpop.eup %6234  ;;  %v4745_v26 = vadd.f32 1.0, %v6233_v56  ;;  %v4484_v10 = vadd.f32 %v8556_v49, %v4461_v18 }
 0x351   :  { %v6237_v57 = vpop.eup %6236  ;;  %6246 = vrcp.f32 %v4747_v0  ;;  %v4748_v27 = vadd.f32 1.0, %v6235_v25  ;;  %v5956_v61 = vpop.f32.mrb[144].mxu1  ;;  %v4482_v0 = vadd.f32 %v8556_v49, %v4459_v44 }
 0x352   :  { %6248 = vrcp.f32 %v4745_v26  ;;  %v4746_v15 = vadd.f32 1.0, %v6237_v57  ;;  %v4655_v9 = vadd.f32 %v5956_v61, %v8547_v40  ;;  %v4646_v17 = vpop.f32.mrb[145].mxu1 }
 0x353   :  { %v6239_v14 = vpop.eup %6238  ;;  %6250 = vrcp.f32 %v4748_v27  ;;  %v4647_v7 = vadd.f32 %v8547_v40, %v4646_v17  ;;  %v5957_v58 = vpop.f32.mrb[146].mxu1 }
 0x354   :  { %v6241_v5 = vpop.eup %6240  ;;  %v4791_v20 = vmul.f32 %v6239_v14, %v8570_v19  ;;  %6252 = vrcp.f32 %v4746_v15  ;;  %v8630_v52 = vadd.f32 %v4655_v9, %v4479_v28  ;;  %v4658_v62 = vadd.f32 %v5957_v58, %v8547_v40  ;;  %v4649_v34 = vpop.f32.mrb[147].mxu1 }
 0x355   :  { %v6243_v50 = vpop.eup %6242  ;;  %v4789_v59 = vmul.f32 %v6241_v5, %v8573_v47  ;;  %v8634_v38 = vadd.f32 %v4647_v7, %v4477_v45  ;;  %v4650_v55 = vadd.f32 %v8547_v40, %v4649_v34  ;;  %v4460_v19 = vmul.f32 %v8542_v3, %v4433_v36 }
 0x356   :  { %v6245_v48 = vpop.eup %6244  ;;  %4807 = vst [vmem:[#allocation3 + $0x10] sm:$0xff] %v4791_v20  ;;  %v4792_v6 = vmul.f32 %v6243_v50, %v8577_v54  ;;  %v5284_v33 = vmul.f32 -1.442695, %v8630_v52  ;;  %v8641_v24 = vadd.f32 %v4658_v62, %v4480_v63  ;;  %v4458_v47 = vmul.f32 %v8542_v3, %v4425_v13 }
 0x357   :  { %4805 = vst [vmem:[#allocation3] sm:$0xff] %v4789_v59  ;;  %v4790_v39 = vmul.f32 %v6245_v48, %v8581_v21  ;;  %v5282_v1 = vmul.f32 -1.442695, %v8634_v38  ;;  %v8646_v51 = vadd.f32 %v4650_v55, %v4478_v11  ;;  %v4483_v21 = vadd.f32 %v8556_v49, %v4460_v19 }
 0x358   :  { %4808 = vst [vmem:[#allocation3 + $0x18] sm:$0xff] %v4792_v6  ;;  %6254 = vpow2.f32 %v5284_v33  ;;  %v5285_v54 = vmul.f32 -1.442695, %v8641_v24  ;;  %v4481_v43 = vadd.f32 %v8556_v49, %v4458_v47 }
 0x359   :  { %4806 = vst [vmem:[#allocation3 + $0x8] sm:$0xff] %v4790_v39  ;;  %6256 = vpow2.f32 %v5282_v1  ;;  %v5283_v41 = vmul.f32 -1.442695, %v8646_v51  ;;  %v5960_v22 = vpop.f32.mrb[148].mxu1 }
 0x35a   :  { %6258 = vpow2.f32 %v5285_v54  ;;  %v4671_v2 = vadd.f32 %v5960_v22, %v8547_v40  ;;  %v4662_v42 = vpop.f32.mrb[149].mxu1 }
 0x35b   :  { %v6247_v12 = vpop.eup %6246  ;;  %6260 = vpow2.f32 %v5283_v41  ;;  %v4663_v36 = vadd.f32 %v8547_v40, %v4662_v42  ;;  %v5961_v32 = vpop.f32.mrb[150].mxu1 }
 0x35c   :  { %v6249_v13 = vpop.eup %6248  ;;  %v4795_v3 = vmul.f32 %v6247_v12, %v8596_v35  ;;  %v8657_v16 = vadd.f32 %v4671_v2, %v4483_v21  ;;  %v4674_v29 = vadd.f32 %v5961_v32, %v8547_v40  ;;  %v4665_v53 = vpop.f32.mrb[151].mxu1 }
 0x35d   :  { %v6251_v4 = vpop.eup %6250  ;;  %v4793_v31 = vmul.f32 %v6249_v13, %v8601_v60  ;;  %v4689_v56 = vadd.f32 %v4663_v36, %v4481_v43  ;;  %v4666_v46 = vadd.f32 %v8547_v40, %v4665_v53 }
 0x35e   :  { %v6253_v30 = vpop.eup %6252  ;;  %4811 = vst [vmem:[#allocation3 + $0x30] sm:$0xff] %v4795_v3  ;;  %v4796_v25 = vmul.f32 %v6251_v4, %v8605_v8  ;;  %v5288_v35 = vmul.f32 -1.442695, %v8657_v16  ;;  %v4692_v26 = vadd.f32 %v4674_v29, %v4484_v10 }
 0x35f   :  { %4809 = vst [vmem:[#allocation3 + $0x20] sm:$0xff] %v4793_v31  ;;  %v4794_v57 = vmul.f32 %v6253_v30, %v8609_v37  ;;  %v5286_v27 = vmul.f32 -1.442695, %v4689_v56  ;;  %v4690_v23 = vadd.f32 %v4666_v46, %v4482_v0 }
 0x360   :  { %4812 = vst [vmem:[#allocation3 + $0x38] sm:$0xff] %v4796_v25  ;;  %6262 = vpow2.f32 %v5288_v35  ;;  %v5289_v60 = vmul.f32 -1.442695, %v4692_v26 }
 0x361   :  { %4810 = vst [vmem:[#allocation3 + $0x28] sm:$0xff] %v4794_v57  ;;  %6264 = vpow2.f32 %v5286_v27  ;;  %v5287_v49 = vmul.f32 -1.442695, %v4690_v23 }
 0x362   :  { %v6255_v61 = vpop.eup %6254  ;;  %6266 = vpow2.f32 %v5289_v60 }
 0x363   :  { %v6257_v40 = vpop.eup %6256  ;;  %v4751_v15 = vadd.f32 1.0, %v6255_v61  ;;  %6268 = vpow2.f32 %v5287_v49 }
 0x364   :  { %v6259_v8 = vpop.eup %6258  ;;  %v4749_v28 = vadd.f32 1.0, %v6257_v40 }
 0x365   :  { %v6261_v9 = vpop.eup %6260  ;;  %6270 = vrcp.f32 %v4751_v15  ;;  %v4752_v17 = vadd.f32 1.0, %v6259_v8 }
 0x366   :  { %6272 = vrcp.f32 %v4749_v28  ;;  %v4750_v37 = vadd.f32 1.0, %v6261_v9 }
 0x367   :  { %6274 = vrcp.f32 %v4752_v17 }
 0x368   :  { %6276 = vrcp.f32 %v4750_v37 }
 0x36a   :  { %v6263_v14 = vpop.eup %6262 }
 0x36b   :  { %v6265_v45 = vpop.eup %6264  ;;  %v4755_v7 = vadd.f32 1.0, %v6263_v14 }
 0x36c   :  { %v6267_v63 = vpop.eup %6266  ;;  %v4753_v58 = vadd.f32 1.0, %v6265_v45 }
 0x36d   :  { %v6269_v5 = vpop.eup %6268  ;;  %6278 = vrcp.f32 %v4755_v7  ;;  %v4756_v20 = vadd.f32 1.0, %v6267_v63 }
 0x36e   :  { %6280 = vrcp.f32 %v4753_v58  ;;  %v4754_v62 = vadd.f32 1.0, %v6269_v5 }
 0x36f   :  { %v6271_v34 = vpop.eup %6270  ;;  %6282 = vrcp.f32 %v4756_v20 }
 0x370   :  { %v6273_v50 = vpop.eup %6272  ;;  %v4799_v59 = vmul.f32 %v6271_v34, %v8630_v52  ;;  %6284 = vrcp.f32 %v4754_v62 }
 0x371   :  { %v6275_v11 = vpop.eup %6274  ;;  %v4797_v55 = vmul.f32 %v6273_v50, %v8634_v38 }
 0x372   :  { %v6277_v48 = vpop.eup %6276  ;;  %4815 = vst [vmem:[#allocation3 + $0x50] sm:$0xff] %v4799_v59  ;;  %v4800_v6 = vmul.f32 %v6275_v11, %v8641_v24 }
 0x373   :  { %4813 = vst [vmem:[#allocation3 + $0x40] sm:$0xff] %v4797_v55  ;;  %v4798_v19 = vmul.f32 %v6277_v48, %v8646_v51 }
 0x374   :  { %4816 = vst [vmem:[#allocation3 + $0x58] sm:$0xff] %v4800_v6 }
 0x375   :  { %4814 = vst [vmem:[#allocation3 + $0x48] sm:$0xff] %v4798_v19 }
 0x377   :  { %v6279_v33 = vpop.eup %6278 }
 0x378   :  { %v6281_v39 = vpop.eup %6280  ;;  %v4803_v47 = vmul.f32 %v6279_v33, %v8657_v16 }
 0x379   :  { %v6283_v52 = vpop.eup %6282  ;;  %v4801_v1 = vmul.f32 %v6281_v39, %v4689_v56 }
 0x37a   :  { %v6285_v18 = vpop.eup %6284  ;;  %4819 = vst [vmem:[#allocation3 + $0x70] sm:$0xff] %v4803_v47  ;;  %v4804_v38 = vmul.f32 %v6283_v52, %v4692_v26 }
 0x37b   :  { %4817 = vst [vmem:[#allocation3 + $0x60] sm:$0xff] %v4801_v1  ;;  %v4802_v54 = vmul.f32 %v6285_v18, %v4690_v23 }
 0x37c   :  { %4820 = vst [vmem:[#allocation3 + $0x78] sm:$0xff] %v4804_v38 }
 0x37d   :  { %4818 = vst [vmem:[#allocation3 + $0x68] sm:$0xff] %v4802_v54 }
 0x37e   :  { %6299 = shalt.err (!%p6296_p4)
}
 0x37f   :  { %s6300_s11 = scalar_lea.hbm %s8693_s9, 2048 }
 0x380   :  { %p6301_p5 = scmp.ne.s32.totalorder %s8693_s9, %s6300_s11  ;;  %p6304_p6 = scmp.lt.u32.totalorder %s6300_s11, %s8693_s9 }
 0x382   :  { %p6306_p7 = pnand %p6304_p6, %p6301_p5 }
 0x384   :  { %6309 = shalt.err (!%p6306_p7)
}
 0x385   :  { %s6314_s15 = smov 128   ;;  %s6315_s16 = smov 8  }
 0x386   :  { %4832 = dma.vmem_to_hbm [thread:$0]  %s4827_s6, 2048, %s8693_s9, [#allocation4], %s6314_s15, %s6314_s15, %s6315_s16  }
 0x387   :  { %6310 = dma.done.wait [#allocation4], 2048  }
 0x388   :  { %6311 = vsyncadd [#allocation4], 4294965248 }
 0x389   :  { %4836 = vsyncpa [#allocation4], 1 }

</bundles_post_ra>
